<compile_context>
chip_gen: v7x
topology: tpu7x:2x2x1
jax: 0.10.0
libtpu: 0.0.40
codegen_flags: <defaults>
</compile_context>

<pallas_src>
import functools

import jax
import jax.numpy as jnp
from jax.experimental import pallas as pl
from jax.experimental.pallas import tpu as pltpu

LEAKY_SLOPE = 0.01  # torch.nn.functional.leaky_relu default negative_slope
LATENT_DIM = 64


# --------------------------------------------------------------------------
# Pallas kernels
# --------------------------------------------------------------------------
def _matmul_bias_act_kernel(w_ref, x_ref, b_ref, o_ref, *, act):
    # w: (N, K) bf16, x: (K, tm) bf16, b: (N, 1) f32 -> o: (N, tm) f32 (lane-dense in M).
    y = jnp.dot(w_ref[...], x_ref[...], preferred_element_type=jnp.float32)
    y = y + b_ref[...]
    if act == "leaky_relu":
        y = jnp.where(y > 0, y, LEAKY_SLOPE * y)
    elif act == "sigmoid":
        y = jax.nn.sigmoid(y)
    o_ref[...] = y.astype(o_ref.dtype)


def matmul_bias_act_T(w, x, b, act="none", max_tile=1024):
    """w: (N, K), x: (K, M), b: (N,) -> (N, M) f32. Tiled over the lane axis M."""
    N, K = w.shape
    M = x.shape[1]
    if M <= max_tile:
        tm, Mp = M, M                      # single block: no padding, full-dim block is legal
    else:
        tm = max_tile                      # multiple of 128
        Mp = pl.cdiv(M, tm) * tm
    x_p = x if Mp == M else jnp.pad(x, ((0, 0), (0, Mp - M)))
    out = pl.pallas_call(
        functools.partial(_matmul_bias_act_kernel, act=act),
        out_shape=jax.ShapeDtypeStruct((N, Mp), jnp.float32),
        grid_spec=pltpu.PrefetchScalarGridSpec(
            num_scalar_prefetch=0,
            grid=(Mp // tm,),
            in_specs=[
                pl.BlockSpec((N, K), lambda i: (0, 0)),
                pl.BlockSpec((K, tm), lambda i: (0, i)),
                pl.BlockSpec((N, 1), lambda i: (0, 0)),
            ],
            out_specs=pl.BlockSpec((N, tm), lambda i: (0, i)),
        ),
        compiler_params=pltpu.CompilerParams(dimension_semantics=("parallel",)),
    )(w.astype(jnp.bfloat16), x_p.astype(jnp.bfloat16),
      b.reshape(N, 1).astype(jnp.float32))
    return out if Mp == M else out[:, :M]


def _latent_kernel(pooled_ref, w1_ref, b1_ref, wc_ref, bc_ref, eps_ref,
                   w2_ref, b2_ref, mu_ref, lv_ref, z2_ref, *, latent):
    # Everything transposed (features on sublanes, batch on lanes); all weights tiny & f32.
    h = jnp.dot(w1_ref[...], pooled_ref[...],
                preferred_element_type=jnp.float32) + b1_ref[...]          # fc1 (no act)
    mulv = jnp.dot(wc_ref[...], h, preferred_element_type=jnp.float32) + bc_ref[...]
    mu = mulv[:latent, :]
    log_var = mulv[latent:, :]
    std = jnp.exp(0.5 * log_var)
    z = mu + eps_ref[...] * std                                            # reparameterize
    z2 = jnp.dot(w2_ref[...], z, preferred_element_type=jnp.float32) + b2_ref[...]  # fc2
    mu_ref[...] = mu
    lv_ref[...] = log_var
    z2_ref[...] = z2


def latent_path(params, pooled_t, eps):
    """pooled_t: (64, B). Returns mu^T, log_var^T, fc2(z)^T each of shape (LATENT_DIM, B)."""
    w1, b1 = params["fc1"]              # (128, 64), (128,)
    w_mu, b_mu = params["fc_mu"]        # (64, 128), (64,)
    w_lv, b_lv = params["fc_log_var"]   # (64, 128), (64,)
    w2, b2 = params["fc2"]              # (64, 64), (64,)
    wc = jnp.concatenate([w_mu, w_lv], axis=0)   # fused mu/log_var matmul: (128, 128)
    bc = jnp.concatenate([b_mu, b_lv], axis=0)   # (128,)
    D, B = pooled_t.shape
    H1 = w1.shape[0]
    L = LATENT_DIM

    def full(r, c):
        return pl.BlockSpec((r, c), lambda i: (0, 0))

    out_sds = jax.ShapeDtypeStruct((L, B), jnp.float32)
    return pl.pallas_call(
        functools.partial(_latent_kernel, latent=L),
        out_shape=(out_sds, out_sds, out_sds),
        grid_spec=pltpu.PrefetchScalarGridSpec(
            num_scalar_prefetch=0,
            grid=(1,),
            in_specs=[
                full(D, B),        # pooled^T
                full(H1, D),       # fc1 weight
                full(H1, 1),       # fc1 bias
                full(2 * L, H1),   # fused fc_mu / fc_log_var weight
                full(2 * L, 1),    # fused bias
                full(L, B),        # eps
                full(L, L),        # fc2 weight
                full(L, 1),        # fc2 bias
            ],
            out_specs=(full(L, B), full(L, B), full(L, B)),
        ),
    )(pooled_t, w1, b1.reshape(-1, 1), wc, bc.reshape(-1, 1), eps,
      w2, b2.reshape(-1, 1))


# --------------------------------------------------------------------------
# Conv / conv-transpose wrappers (im2col glue in CNHW layout + Pallas matmul)
# --------------------------------------------------------------------------
def _im2col_cnhw(x, kh, kw, stride, padding, dilation):
    """x: (C, B, H, W) -> patches (C*kh*kw, B*OH*OW) with feature order (C, kh, kw)."""
    C, B, H, W = x.shape
    if padding:
        x = jnp.pad(x, ((0, 0), (0, 0), (padding, padding), (padding, padding)))
    Hp, Wp = H + 2 * padding, W + 2 * padding
    effh = dilation * (kh - 1) + 1
    effw = dilation * (kw - 1) + 1
    OH = (Hp - effh) // stride + 1
    OW = (Wp - effw) // stride + 1
    cols = []
    for ih in range(kh):
        for iw in range(kw):
            h0 = ih * dilation
            w0 = iw * dilation
            sub = x[:, :,
                    h0:h0 + stride * (OH - 1) + 1:stride,
                    w0:w0 + stride * (OW - 1) + 1:stride]   # (C, B, OH, OW)
            cols.append(sub)
    patches = jnp.stack(cols, axis=1)                       # (C, kh*kw, B, OH, OW)
    patches = patches.reshape(C * kh * kw, B * OH * OW)     # contiguous, no relayout
    return patches, OH, OW


def conv2d_cnhw(x, w, b, stride, padding, dilation=1, act="leaky_relu", max_tile=1024):
    """PyTorch nn.Conv2d semantics on CNHW tensors. w: (Cout, Cin, KH, KW)."""
    Cout, Cin, KH, KW = w.shape
    _, B, _, _ = x.shape
    patches, OH, OW = _im2col_cnhw(x, KH, KW, stride, padding, dilation)
    w2 = w.reshape(Cout, Cin * KH * KW)                     # matches patch feature order
    y = matmul_bias_act_T(w2, patches, b, act=act, max_tile=max_tile)  # (Cout, B*OH*OW)
    return y.reshape(Cout, B, OH, OW)


def conv_transpose2d_cnhw(x, w_t, b, stride, padding, act="leaky_relu"):
    """PyTorch nn.ConvTranspose2d semantics on CNHW tensors. w_t: (Cin, Cout, KH, KW)."""
    Cin, Cout, KH, KW = w_t.shape
    C, B, H, W = x.shape
    if stride > 1:
        Hd = (H - 1) * stride + 1
        Wd = (W - 1) * stride + 1
        xd = jnp.zeros((C, B, Hd, Wd), x.dtype).at[:, :, ::stride, ::stride].set(x)
    else:
        xd = x
    pad = KH - 1 - padding
    w_conv = jnp.flip(w_t, axis=(2, 3)).transpose(1, 0, 2, 3)   # (Cout, Cin, KH, KW)
    return conv2d_cnhw(xd, w_conv, b, stride=1, padding=pad, dilation=1, act=act)


# --------------------------------------------------------------------------
# Parameters (deterministic, PyTorch-default-style uniform init)
# --------------------------------------------------------------------------
def init_params(key):
    def uni(k, shape, bound):
        return jax.random.uniform(k, shape, jnp.float32, -bound, bound)

    def conv_p(k, cout, cin, ksz):
        bound = 1.0 / float(jnp.sqrt(cin * ksz * ksz))
        kw, kb = jax.random.split(k)
        return uni(kw, (cout, cin, ksz, ksz), bound), uni(kb, (cout,), bound)

    def convt_p(k, cin, cout, ksz):
        bound = 1.0 / float(jnp.sqrt(cout * ksz * ksz))
        kw, kb = jax.random.split(k)
        return uni(kw, (cin, cout, ksz, ksz), bound), uni(kb, (cout,), bound)

    def lin_p(k, fout, fin):
        bound = 1.0 / float(jnp.sqrt(fin))
        kw, kb = jax.random.split(k)
        return uni(kw, (fout, fin), bound), uni(kb, (fout,), bound)

    ks = jax.random.split(key, 11)
    return {
        "enc1": conv_p(ks[0], 8, 3, 4),
        "enc2": conv_p(ks[1], 16, 8, 4),
        "enc3": conv_p(ks[2], 32, 16, 4),
        "enc4": conv_p(ks[3], 64, 32, 7),
        "fc1": lin_p(ks[4], 128, 64),
        "fc_mu": lin_p(ks[5], 64, 128),
        "fc_log_var": lin_p(ks[6], 64, 128),
        "fc2": lin_p(ks[7], 64, 64),
        "dec1": convt_p(ks[8], 64, 32, 4),
        "dec2": convt_p(ks[9], 32, 16, 4),
        "dec3": convt_p(ks[10], 16, 1, 5),
    }


# --------------------------------------------------------------------------
# Forward pass (mirrors Landsat2ViirsNet.forward)
# --------------------------------------------------------------------------
def landsat2viirs_forward(params, x, eps_key):
    B = x.shape[0]
    xc = jnp.transpose(x, (1, 0, 2, 3))                      # NCHW -> CNHW, once
    xc = conv2d_cnhw(xc, *params["enc1"], stride=4, padding=1, dilation=2)
    xc = conv2d_cnhw(xc, *params["enc2"], stride=3, padding=1)
    xc = conv2d_cnhw(xc, *params["enc3"], stride=3, padding=1)
    xc = conv2d_cnhw(xc, *params["enc4"], stride=2, padding=0)   # (64, B, OH4, OW4)
    C4, _, OH4, OW4 = xc.shape
    # adaptive_avg_pool2d(., 1): for this config OH4 == OW4 == 1 -> pure reshape (no kernel).
    if OH4 * OW4 == 1:
        pooled_t = xc.reshape(C4, B)
    else:
        pooled_t = xc.reshape(C4, B, OH4 * OW4).mean(axis=2)  # cheap plain-JAX fallback

    eps = jax.random.normal(eps_key, (LATENT_DIM, B), jnp.float32)   # torch.randn_like(std)
    mu_t, log_var_t, z2_t = latent_path(params, pooled_t, eps)       # fused Pallas kernel

    zc = z2_t.reshape(64, B, 1, 1)                           # already CNHW
    xc = conv_transpose2d_cnhw(zc, *params["dec1"], stride=1, padding=0)
    xc = conv_transpose2d_cnhw(xc, *params["dec2"], stride=2, padding=0)
    xc = conv_transpose2d_cnhw(xc, *params["dec3"], stride=2, padding=1, act="sigmoid")
    reconstruction = jnp.transpose(xc, (1, 0, 2, 3))         # CNHW -> NCHW, once
    return reconstruction, mu_t.T, log_var_t.T


if __name__ == "__main__":
    key = jax.random.PRNGKey(0)
    pkey, xkey, ekey = jax.random.split(key, 3)
    params = init_params(pkey)
    # Smallest spatial size compatible with the fixed encoder kernels/strides
    # (enc4 needs a 7x7 feature map before its 7x7 stride-2 conv).
    x = jax.random.normal(xkey, (2, 3, 240, 240), jnp.float32)

    fwd = jax.jit(landsat2viirs_forward)
    recon, mu, log_var = fwd(params, x, ekey)
    jax.block_until_ready((recon, mu, log_var))

    assert recon.shape == (2, 1, 21, 21), recon.shape
    assert mu.shape == (2, 64) and log_var.shape == (2, 64)
    assert bool(jnp.all(jnp.isfinite(recon))) and bool(jnp.all((recon >= 0) & (recon <= 1)))
    print("KERNEL_OK")
</pallas_src>

<mosaic_0001>
module attributes {stable_mosaic.version = 11 : i64} {
  func.func @_matmul_bias_act_kernel(%arg0: i32, %arg1: memref<8x48xbf16, #tpu.memory_space<vmem>>, %arg2: memref<48x1024xbf16, #tpu.memory_space<vmem>>, %arg3: memref<8x1xf32, #tpu.memory_space<vmem>>, %arg4: memref<8x1024xf32, #tpu.memory_space<vmem>>) attributes {dimension_semantics = [#tpu.dimension_semantics<parallel>], iteration_bounds = array<i64: 7>, scalar_prefetch = 0 : i64, scratch_operands = 0 : i64, tpu.core_type = #tpu.core_type<tc>, window_params = [{pipeline_mode = #tpu.pipeline_mode<synchronous>, transform_indices = @transform_0, window_bounds = array<i64: 8, 48>}, {transform_indices = @transform_1, window_bounds = array<i64: 48, 1024>}, {pipeline_mode = #tpu.pipeline_mode<synchronous>, transform_indices = @transform_2, window_bounds = array<i64: 8, 1>}, {transform_indices = @transform_3, window_bounds = array<i64: 8, 1024>}]} {
    %c0 = arith.constant 0 : index
    %c0_0 = arith.constant 0 : index
    %0 = vector.load %arg1[%c0, %c0_0] : memref<8x48xbf16, #tpu.memory_space<vmem>>, vector<8x48xbf16>
    %c0_1 = arith.constant 0 : index
    %c0_2 = arith.constant 0 : index
    %1 = vector.load %arg2[%c0_1, %c0_2] : memref<48x1024xbf16, #tpu.memory_space<vmem>>, vector<48x1024xbf16>
    %cst = arith.constant dense<0.000000e+00> : vector<8x1024xf32>
    %2 = tpu.matmul %0, %1, %cst {dimension_numbers = #tpu.dot_dimension_numbers<[1], [0], [0], [1], [0, 0, 1, 1], [], []>} : vector<8x48xbf16>, vector<48x1024xbf16>, vector<8x1024xf32> -> vector<8x1024xf32>
    %c0_3 = arith.constant 0 : index
    %c0_4 = arith.constant 0 : index
    %3 = vector.load %arg3[%c0_3, %c0_4] : memref<8x1xf32, #tpu.memory_space<vmem>>, vector<8x1xf32>
    %4 = vector.broadcast %3 : vector<8x1xf32> to vector<8x1024xf32>
    %5 = arith.addf %2, %4 : vector<8x1024xf32>
    %cst_5 = arith.constant 0.000000e+00 : f32
    %6 = vector.broadcast %cst_5 : f32 to vector<8x1024xf32>
    %7 = arith.cmpf ogt, %5, %6 : vector<8x1024xf32>
    %cst_6 = arith.constant 0.00999999977 : f32
    %8 = vector.broadcast %cst_6 : f32 to vector<8x1024xf32>
    %9 = arith.mulf %8, %5 : vector<8x1024xf32>
    %10 = arith.select %7, %5, %9 : vector<8x1024xi1>, vector<8x1024xf32>
    %c0_7 = arith.constant 0 : index
    %c0_8 = arith.constant 0 : index
    %11 = vector.load %arg4[%c0_7, %c0_8] : memref<8x1024xf32, #tpu.memory_space<vmem>>, vector<8x1024xf32>
    tpu.vector_store %arg4[%c0_7, %c0_8], %10 {strides = array<i32>} : memref<8x1024xf32, #tpu.memory_space<vmem>>, vector<8x1024xf32>,
    return
  }
  func.func @transform_0(%arg0: i32) -> (i32, i32) {
    %c0_i32 = arith.constant 0 : i32
    %c0_i32_0 = arith.constant 0 : i32
    %c0_i32_1 = arith.constant 0 : i32
    return %c0_i32, %c0_i32_0 : i32, i32
  }
  func.func @transform_1(%arg0: i32) -> (i32, i32) {
    %c0_i32 = arith.constant 0 : i32
    %c0_i32_0 = arith.constant 0 : i32
    return %c0_i32, %arg0 : i32, i32
  }
  func.func @transform_2(%arg0: i32) -> (i32, i32) {
    %c0_i32 = arith.constant 0 : i32
    %c0_i32_0 = arith.constant 0 : i32
    %c0_i32_1 = arith.constant 0 : i32
    return %c0_i32, %c0_i32_0 : i32, i32
  }
  func.func @transform_3(%arg0: i32) -> (i32, i32) {
    %c0_i32 = arith.constant 0 : i32
    %c0_i32_0 = arith.constant 0 : i32
    return %c0_i32, %arg0 : i32, i32
  }
}

module attributes {stable_mosaic.version = 11 : i64} {
  func.func @_matmul_bias_act_kernel(%arg0: i32, %arg1: memref<16x128xbf16, #tpu.memory_space<vmem>>, %arg2: memref<128x800xbf16, #tpu.memory_space<vmem>>, %arg3: memref<16x1xf32, #tpu.memory_space<vmem>>, %arg4: memref<16x800xf32, #tpu.memory_space<vmem>>) attributes {dimension_semantics = [#tpu.dimension_semantics<parallel>], iteration_bounds = array<i64: 1>, scalar_prefetch = 0 : i64, scratch_operands = 0 : i64, tpu.core_type = #tpu.core_type<tc>, window_params = [{pipeline_mode = #tpu.pipeline_mode<synchronous>, transform_indices = @transform_0, window_bounds = array<i64: 16, 128>}, {transform_indices = @transform_1, window_bounds = array<i64: 128, 800>}, {pipeline_mode = #tpu.pipeline_mode<synchronous>, transform_indices = @transform_2, window_bounds = array<i64: 16, 1>}, {transform_indices = @transform_3, window_bounds = array<i64: 16, 800>}]} {
    %c0 = arith.constant 0 : index
    %c0_0 = arith.constant 0 : index
    %0 = vector.load %arg1[%c0, %c0_0] : memref<16x128xbf16, #tpu.memory_space<vmem>>, vector<16x128xbf16>
    %c0_1 = arith.constant 0 : index
    %c0_2 = arith.constant 0 : index
    %1 = vector.load %arg2[%c0_1, %c0_2] : memref<128x800xbf16, #tpu.memory_space<vmem>>, vector<128x800xbf16>
    %cst = arith.constant dense<0.000000e+00> : vector<16x800xf32>
    %2 = tpu.matmul %0, %1, %cst {dimension_numbers = #tpu.dot_dimension_numbers<[1], [0], [0], [1], [0, 0, 1, 1], [], []>} : vector<16x128xbf16>, vector<128x800xbf16>, vector<16x800xf32> -> vector<16x800xf32>
    %c0_3 = arith.constant 0 : index
    %c0_4 = arith.constant 0 : index
    %3 = vector.load %arg3[%c0_3, %c0_4] : memref<16x1xf32, #tpu.memory_space<vmem>>, vector<16x1xf32>
    %4 = vector.broadcast %3 : vector<16x1xf32> to vector<16x800xf32>
    %5 = arith.addf %2, %4 : vector<16x800xf32>
    %cst_5 = arith.constant 0.000000e+00 : f32
    %6 = vector.broadcast %cst_5 : f32 to vector<16x800xf32>
    %7 = arith.cmpf ogt, %5, %6 : vector<16x800xf32>
    %cst_6 = arith.constant 0.00999999977 : f32
    %8 = vector.broadcast %cst_6 : f32 to vector<16x800xf32>
    %9 = arith.mulf %8, %5 : vector<16x800xf32>
    %10 = arith.select %7, %5, %9 : vector<16x800xi1>, vector<16x800xf32>
    %c0_7 = arith.constant 0 : index
    %c0_8 = arith.constant 0 : index
    %11 = vector.load %arg4[%c0_7, %c0_8] : memref<16x800xf32, #tpu.memory_space<vmem>>, vector<16x800xf32>
    tpu.vector_store %arg4[%c0_7, %c0_8], %10 {strides = array<i32>} : memref<16x800xf32, #tpu.memory_space<vmem>>, vector<16x800xf32>,
    return
  }
  func.func @transform_0(%arg0: i32) -> (i32, i32) {
    %c0_i32 = arith.constant 0 : i32
    %c0_i32_0 = arith.constant 0 : i32
    %c0_i32_1 = arith.constant 0 : i32
    return %c0_i32, %c0_i32_0 : i32, i32
  }
  func.func @transform_1(%arg0: i32) -> (i32, i32) {
    %c0_i32 = arith.constant 0 : i32
    %c0_i32_0 = arith.constant 0 : i32
    return %c0_i32, %arg0 : i32, i32
  }
  func.func @transform_2(%arg0: i32) -> (i32, i32) {
    %c0_i32 = arith.constant 0 : i32
    %c0_i32_0 = arith.constant 0 : i32
    %c0_i32_1 = arith.constant 0 : i32
    return %c0_i32, %c0_i32_0 : i32, i32
  }
  func.func @transform_3(%arg0: i32) -> (i32, i32) {
    %c0_i32 = arith.constant 0 : i32
    %c0_i32_0 = arith.constant 0 : i32
    return %c0_i32, %arg0 : i32, i32
  }
}

module attributes {stable_mosaic.version = 11 : i64} {
  func.func @_matmul_bias_act_kernel(%arg0: i32, %arg1: memref<32x256xbf16, #tpu.memory_space<vmem>>, %arg2: memref<256x98xbf16, #tpu.memory_space<vmem>>, %arg3: memref<32x1xf32, #tpu.memory_space<vmem>>, %arg4: memref<32x98xf32, #tpu.memory_space<vmem>>) attributes {dimension_semantics = [#tpu.dimension_semantics<parallel>], iteration_bounds = array<i64: 1>, scalar_prefetch = 0 : i64, scratch_operands = 0 : i64, tpu.core_type = #tpu.core_type<tc>, window_params = [{pipeline_mode = #tpu.pipeline_mode<synchronous>, transform_indices = @transform_0, window_bounds = array<i64: 32, 256>}, {transform_indices = @transform_1, window_bounds = array<i64: 256, 98>}, {pipeline_mode = #tpu.pipeline_mode<synchronous>, transform_indices = @transform_2, window_bounds = array<i64: 32, 1>}, {transform_indices = @transform_3, window_bounds = array<i64: 32, 98>}]} {
    %c0 = arith.constant 0 : index
    %c0_0 = arith.constant 0 : index
    %0 = vector.load %arg1[%c0, %c0_0] : memref<32x256xbf16, #tpu.memory_space<vmem>>, vector<32x256xbf16>
    %c0_1 = arith.constant 0 : index
    %c0_2 = arith.constant 0 : index
    %1 = vector.load %arg2[%c0_1, %c0_2] : memref<256x98xbf16, #tpu.memory_space<vmem>>, vector<256x98xbf16>
    %cst = arith.constant dense<0.000000e+00> : vector<32x98xf32>
    %2 = tpu.matmul %0, %1, %cst {dimension_numbers = #tpu.dot_dimension_numbers<[1], [0], [0], [1], [0, 0, 1, 1], [], []>} : vector<32x256xbf16>, vector<256x98xbf16>, vector<32x98xf32> -> vector<32x98xf32>
    %c0_3 = arith.constant 0 : index
    %c0_4 = arith.constant 0 : index
    %3 = vector.load %arg3[%c0_3, %c0_4] : memref<32x1xf32, #tpu.memory_space<vmem>>, vector<32x1xf32>
    %4 = vector.broadcast %3 : vector<32x1xf32> to vector<32x98xf32>
    %5 = arith.addf %2, %4 : vector<32x98xf32>
    %cst_5 = arith.constant 0.000000e+00 : f32
    %6 = vector.broadcast %cst_5 : f32 to vector<32x98xf32>
    %7 = arith.cmpf ogt, %5, %6 : vector<32x98xf32>
    %cst_6 = arith.constant 0.00999999977 : f32
    %8 = vector.broadcast %cst_6 : f32 to vector<32x98xf32>
    %9 = arith.mulf %8, %5 : vector<32x98xf32>
    %10 = arith.select %7, %5, %9 : vector<32x98xi1>, vector<32x98xf32>
    %c0_7 = arith.constant 0 : index
    %c0_8 = arith.constant 0 : index
    %11 = vector.load %arg4[%c0_7, %c0_8] : memref<32x98xf32, #tpu.memory_space<vmem>>, vector<32x98xf32>
    tpu.vector_store %arg4[%c0_7, %c0_8], %10 {strides = array<i32>} : memref<32x98xf32, #tpu.memory_space<vmem>>, vector<32x98xf32>,
    return
  }
  func.func @transform_0(%arg0: i32) -> (i32, i32) {
    %c0_i32 = arith.constant 0 : i32
    %c0_i32_0 = arith.constant 0 : i32
    %c0_i32_1 = arith.constant 0 : i32
    return %c0_i32, %c0_i32_0 : i32, i32
  }
  func.func @transform_1(%arg0: i32) -> (i32, i32) {
    %c0_i32 = arith.constant 0 : i32
    %c0_i32_0 = arith.constant 0 : i32
    return %c0_i32, %arg0 : i32, i32
  }
  func.func @transform_2(%arg0: i32) -> (i32, i32) {
    %c0_i32 = arith.constant 0 : i32
    %c0_i32_0 = arith.constant 0 : i32
    %c0_i32_1 = arith.constant 0 : i32
    return %c0_i32, %c0_i32_0 : i32, i32
  }
  func.func @transform_3(%arg0: i32) -> (i32, i32) {
    %c0_i32 = arith.constant 0 : i32
    %c0_i32_0 = arith.constant 0 : i32
    return %c0_i32, %arg0 : i32, i32
  }
}

module attributes {stable_mosaic.version = 11 : i64} {
  func.func @_matmul_bias_act_kernel(%arg0: i32, %arg1: memref<64x1568xbf16, #tpu.memory_space<vmem>>, %arg2: memref<1568x2xbf16, #tpu.memory_space<vmem>>, %arg3: memref<64x1xf32, #tpu.memory_space<vmem>>, %arg4: memref<64x2xf32, #tpu.memory_space<vmem>>) attributes {dimension_semantics = [#tpu.dimension_semantics<parallel>], iteration_bounds = array<i64: 1>, scalar_prefetch = 0 : i64, scratch_operands = 0 : i64, tpu.core_type = #tpu.core_type<tc>, window_params = [{pipeline_mode = #tpu.pipeline_mode<synchronous>, transform_indices = @transform_0, window_bounds = array<i64: 64, 1568>}, {transform_indices = @transform_1, window_bounds = array<i64: 1568, 2>}, {pipeline_mode = #tpu.pipeline_mode<synchronous>, transform_indices = @transform_2, window_bounds = array<i64: 64, 1>}, {transform_indices = @transform_3, window_bounds = array<i64: 64, 2>}]} {
    %c0 = arith.constant 0 : index
    %c0_0 = arith.constant 0 : index
    %0 = vector.load %arg1[%c0, %c0_0] : memref<64x1568xbf16, #tpu.memory_space<vmem>>, vector<64x1568xbf16>
    %c0_1 = arith.constant 0 : index
    %c0_2 = arith.constant 0 : index
    %1 = vector.load %arg2[%c0_1, %c0_2] : memref<1568x2xbf16, #tpu.memory_space<vmem>>, vector<1568x2xbf16>
    %cst = arith.constant dense<0.000000e+00> : vector<64x2xf32>
    %2 = tpu.matmul %0, %1, %cst {dimension_numbers = #tpu.dot_dimension_numbers<[1], [0], [0], [1], [0, 0, 1, 1], [], []>} : vector<64x1568xbf16>, vector<1568x2xbf16>, vector<64x2xf32> -> vector<64x2xf32>
    %c0_3 = arith.constant 0 : index
    %c0_4 = arith.constant 0 : index
    %3 = vector.load %arg3[%c0_3, %c0_4] : memref<64x1xf32, #tpu.memory_space<vmem>>, vector<64x1xf32>
    %4 = vector.broadcast %3 : vector<64x1xf32> to vector<64x2xf32>
    %5 = arith.addf %2, %4 : vector<64x2xf32>
    %cst_5 = arith.constant 0.000000e+00 : f32
    %6 = vector.broadcast %cst_5 : f32 to vector<64x2xf32>
    %7 = arith.cmpf ogt, %5, %6 : vector<64x2xf32>
    %cst_6 = arith.constant 0.00999999977 : f32
    %8 = vector.broadcast %cst_6 : f32 to vector<64x2xf32>
    %9 = arith.mulf %8, %5 : vector<64x2xf32>
    %10 = arith.select %7, %5, %9 : vector<64x2xi1>, vector<64x2xf32>
    %c0_7 = arith.constant 0 : index
    %c0_8 = arith.constant 0 : index
    %11 = vector.load %arg4[%c0_7, %c0_8] : memref<64x2xf32, #tpu.memory_space<vmem>>, vector<64x2xf32>
    tpu.vector_store %arg4[%c0_7, %c0_8], %10 {strides = array<i32>} : memref<64x2xf32, #tpu.memory_space<vmem>>, vector<64x2xf32>,
    return
  }
  func.func @transform_0(%arg0: i32) -> (i32, i32) {
    %c0_i32 = arith.constant 0 : i32
    %c0_i32_0 = arith.constant 0 : i32
    %c0_i32_1 = arith.constant 0 : i32
    return %c0_i32, %c0_i32_0 : i32, i32
  }
  func.func @transform_1(%arg0: i32) -> (i32, i32) {
    %c0_i32 = arith.constant 0 : i32
    %c0_i32_0 = arith.constant 0 : i32
    return %c0_i32, %arg0 : i32, i32
  }
  func.func @transform_2(%arg0: i32) -> (i32, i32) {
    %c0_i32 = arith.constant 0 : i32
    %c0_i32_0 = arith.constant 0 : i32
    %c0_i32_1 = arith.constant 0 : i32
    return %c0_i32, %c0_i32_0 : i32, i32
  }
  func.func @transform_3(%arg0: i32) -> (i32, i32) {
    %c0_i32 = arith.constant 0 : i32
    %c0_i32_0 = arith.constant 0 : i32
    return %c0_i32, %arg0 : i32, i32
  }
}

module attributes {stable_mosaic.version = 11 : i64} {
  func.func @_latent_kernel(%arg0: i32, %arg1: memref<64x2xf32, #tpu.memory_space<vmem>>, %arg2: memref<128x64xf32, #tpu.memory_space<vmem>>, %arg3: memref<128x1xf32, #tpu.memory_space<vmem>>, %arg4: memref<128x128xf32, #tpu.memory_space<vmem>>, %arg5: memref<128x1xf32, #tpu.memory_space<vmem>>, %arg6: memref<64x2xf32, #tpu.memory_space<vmem>>, %arg7: memref<64x64xf32, #tpu.memory_space<vmem>>, %arg8: memref<64x1xf32, #tpu.memory_space<vmem>>, %arg9: memref<64x2xf32, #tpu.memory_space<vmem>>, %arg10: memref<64x2xf32, #tpu.memory_space<vmem>>, %arg11: memref<64x2xf32, #tpu.memory_space<vmem>>) attributes {dimension_semantics = [#tpu.dimension_semantics<arbitrary>], iteration_bounds = array<i64: 1>, scalar_prefetch = 0 : i64, scratch_operands = 0 : i64, tpu.core_type = #tpu.core_type<tc>, window_params = [{pipeline_mode = #tpu.pipeline_mode<synchronous>, transform_indices = @transform_0, window_bounds = array<i64: 64, 2>}, {pipeline_mode = #tpu.pipeline_mode<synchronous>, transform_indices = @transform_1, window_bounds = array<i64: 128, 64>}, {pipeline_mode = #tpu.pipeline_mode<synchronous>, transform_indices = @transform_2, window_bounds = array<i64: 128, 1>}, {pipeline_mode = #tpu.pipeline_mode<synchronous>, transform_indices = @transform_3, window_bounds = array<i64: 128, 128>}, {pipeline_mode = #tpu.pipeline_mode<synchronous>, transform_indices = @transform_4, window_bounds = array<i64: 128, 1>}, {pipeline_mode = #tpu.pipeline_mode<synchronous>, transform_indices = @transform_5, window_bounds = array<i64: 64, 2>}, {pipeline_mode = #tpu.pipeline_mode<synchronous>, transform_indices = @transform_6, window_bounds = array<i64: 64, 64>}, {pipeline_mode = #tpu.pipeline_mode<synchronous>, transform_indices = @transform_7, window_bounds = array<i64: 64, 1>}, {pipeline_mode = #tpu.pipeline_mode<synchronous>, transform_indices = @transform_8, window_bounds = array<i64: 64, 2>}, {pipeline_mode = #tpu.pipeline_mode<synchronous>, transform_indices = @transform_9, window_bounds = array<i64: 64, 2>}, {pipeline_mode = #tpu.pipeline_mode<synchronous>, transform_indices = @transform_10, window_bounds = array<i64: 64, 2>}]} {
    %c0 = arith.constant 0 : index
    %c0_0 = arith.constant 0 : index
    %0 = vector.load %arg2[%c0, %c0_0] : memref<128x64xf32, #tpu.memory_space<vmem>>, vector<128x64xf32>
    %c0_1 = arith.constant 0 : index
    %c0_2 = arith.constant 0 : index
    %1 = vector.load %arg1[%c0_1, %c0_2] : memref<64x2xf32, #tpu.memory_space<vmem>>, vector<64x2xf32>
    %cst = arith.constant dense<0.000000e+00> : vector<128x2xf32>
    %2 = tpu.matmul %0, %1, %cst {dimension_numbers = #tpu.dot_dimension_numbers<[1], [0], [0], [1], [0, 0, 1, 1], [], []>} : vector<128x64xf32>, vector<64x2xf32>, vector<128x2xf32> -> vector<128x2xf32>
    %c0_3 = arith.constant 0 : index
    %c0_4 = arith.constant 0 : index
    %3 = vector.load %arg3[%c0_3, %c0_4] : memref<128x1xf32, #tpu.memory_space<vmem>>, vector<128x1xf32>
    %4 = vector.broadcast %3 : vector<128x1xf32> to vector<128x2xf32>
    %5 = arith.addf %2, %4 : vector<128x2xf32>
    %c0_5 = arith.constant 0 : index
    %c0_6 = arith.constant 0 : index
    %6 = vector.load %arg4[%c0_5, %c0_6] : memref<128x128xf32, #tpu.memory_space<vmem>>, vector<128x128xf32>
    %cst_7 = arith.constant dense<0.000000e+00> : vector<128x2xf32>
    %7 = tpu.matmul %6, %5, %cst_7 {dimension_numbers = #tpu.dot_dimension_numbers<[1], [0], [0], [1], [0, 0, 1, 1], [], []>} : vector<128x128xf32>, vector<128x2xf32>, vector<128x2xf32> -> vector<128x2xf32>
    %c0_8 = arith.constant 0 : index
    %c0_9 = arith.constant 0 : index
    %8 = vector.load %arg5[%c0_8, %c0_9] : memref<128x1xf32, #tpu.memory_space<vmem>>, vector<128x1xf32>
    %9 = vector.broadcast %8 : vector<128x1xf32> to vector<128x2xf32>
    %10 = arith.addf %7, %9 : vector<128x2xf32>
    %11 = vector.extract_strided_slice %10 {offsets = [0, 0], sizes = [64, 2], strides = [1, 1]} : vector<128x2xf32> to vector<64x2xf32>
    %12 = vector.extract_strided_slice %10 {offsets = [64, 0], sizes = [64, 2], strides = [1, 1]} : vector<128x2xf32> to vector<64x2xf32>
    %cst_10 = arith.constant 5.000000e-01 : f32
    %13 = vector.broadcast %cst_10 : f32 to vector<64x2xf32>
    %14 = arith.mulf %13, %12 : vector<64x2xf32>
    %15 = math.exp %14 : vector<64x2xf32>
    %c0_11 = arith.constant 0 : index
    %c0_12 = arith.constant 0 : index
    %16 = vector.load %arg6[%c0_11, %c0_12] : memref<64x2xf32, #tpu.memory_space<vmem>>, vector<64x2xf32>
    %17 = arith.mulf %16, %15 : vector<64x2xf32>
    %18 = arith.addf %11, %17 : vector<64x2xf32>
    %c0_13 = arith.constant 0 : index
    %c0_14 = arith.constant 0 : index
    %19 = vector.load %arg7[%c0_13, %c0_14] : memref<64x64xf32, #tpu.memory_space<vmem>>, vector<64x64xf32>
    %cst_15 = arith.constant dense<0.000000e+00> : vector<64x2xf32>
    %20 = tpu.matmul %19, %18, %cst_15 {dimension_numbers = #tpu.dot_dimension_numbers<[1], [0], [0], [1], [0, 0, 1, 1], [], []>} : vector<64x64xf32>, vector<64x2xf32>, vector<64x2xf32> -> vector<64x2xf32>
    %c0_16 = arith.constant 0 : index
    %c0_17 = arith.constant 0 : index
    %21 = vector.load %arg8[%c0_16, %c0_17] : memref<64x1xf32, #tpu.memory_space<vmem>>, vector<64x1xf32>
    %22 = vector.broadcast %21 : vector<64x1xf32> to vector<64x2xf32>
    %23 = arith.addf %20, %22 : vector<64x2xf32>
    %c0_18 = arith.constant 0 : index
    %c0_19 = arith.constant 0 : index
    %24 = vector.load %arg9[%c0_18, %c0_19] : memref<64x2xf32, #tpu.memory_space<vmem>>, vector<64x2xf32>
    tpu.vector_store %arg9[%c0_18, %c0_19], %11 {strides = array<i32>} : memref<64x2xf32, #tpu.memory_space<vmem>>, vector<64x2xf32>,
    %c0_20 = arith.constant 0 : index
    %c0_21 = arith.constant 0 : index
    %25 = vector.load %arg10[%c0_20, %c0_21] : memref<64x2xf32, #tpu.memory_space<vmem>>, vector<64x2xf32>
    tpu.vector_store %arg10[%c0_20, %c0_21], %12 {strides = array<i32>} : memref<64x2xf32, #tpu.memory_space<vmem>>, vector<64x2xf32>,
    %c0_22 = arith.constant 0 : index
    %c0_23 = arith.constant 0 : index
    %26 = vector.load %arg11[%c0_22, %c0_23] : memref<64x2xf32, #tpu.memory_space<vmem>>, vector<64x2xf32>
    tpu.vector_store %arg11[%c0_22, %c0_23], %23 {strides = array<i32>} : memref<64x2xf32, #tpu.memory_space<vmem>>, vector<64x2xf32>,
    return
  }
  func.func @transform_0(%arg0: i32) -> (i32, i32) {
    %c0_i32 = arith.constant 0 : i32
    %c0_i32_0 = arith.constant 0 : i32
    %c0_i32_1 = arith.constant 0 : i32
    return %c0_i32, %c0_i32_0 : i32, i32
  }
  func.func @transform_1(%arg0: i32) -> (i32, i32) {
    %c0_i32 = arith.constant 0 : i32
    %c0_i32_0 = arith.constant 0 : i32
    %c0_i32_1 = arith.constant 0 : i32
    return %c0_i32, %c0_i32_0 : i32, i32
  }
  func.func @transform_2(%arg0: i32) -> (i32, i32) {
    %c0_i32 = arith.constant 0 : i32
    %c0_i32_0 = arith.constant 0 : i32
    %c0_i32_1 = arith.constant 0 : i32
    return %c0_i32, %c0_i32_0 : i32, i32
  }
  func.func @transform_3(%arg0: i32) -> (i32, i32) {
    %c0_i32 = arith.constant 0 : i32
    %c0_i32_0 = arith.constant 0 : i32
    %c0_i32_1 = arith.constant 0 : i32
    return %c0_i32, %c0_i32_0 : i32, i32
  }
  func.func @transform_4(%arg0: i32) -> (i32, i32) {
    %c0_i32 = arith.constant 0 : i32
    %c0_i32_0 = arith.constant 0 : i32
    %c0_i32_1 = arith.constant 0 : i32
    return %c0_i32, %c0_i32_0 : i32, i32
  }
  func.func @transform_5(%arg0: i32) -> (i32, i32) {
    %c0_i32 = arith.constant 0 : i32
    %c0_i32_0 = arith.constant 0 : i32
    %c0_i32_1 = arith.constant 0 : i32
    return %c0_i32, %c0_i32_0 : i32, i32
  }
  func.func @transform_6(%arg0: i32) -> (i32, i32) {
    %c0_i32 = arith.constant 0 : i32
    %c0_i32_0 = arith.constant 0 : i32
    %c0_i32_1 = arith.constant 0 : i32
    return %c0_i32, %c0_i32_0 : i32, i32
  }
  func.func @transform_7(%arg0: i32) -> (i32, i32) {
    %c0_i32 = arith.constant 0 : i32
    %c0_i32_0 = arith.constant 0 : i32
    %c0_i32_1 = arith.constant 0 : i32
    return %c0_i32, %c0_i32_0 : i32, i32
  }
  func.func @transform_8(%arg0: i32) -> (i32, i32) {
    %c0_i32 = arith.constant 0 : i32
    %c0_i32_0 = arith.constant 0 : i32
    %c0_i32_1 = arith.constant 0 : i32
    return %c0_i32, %c0_i32_0 : i32, i32
  }
  func.func @transform_9(%arg0: i32) -> (i32, i32) {
    %c0_i32 = arith.constant 0 : i32
    %c0_i32_0 = arith.constant 0 : i32
    %c0_i32_1 = arith.constant 0 : i32
    return %c0_i32, %c0_i32_0 : i32, i32
  }
  func.func @transform_10(%arg0: i32) -> (i32, i32) {
    %c0_i32 = arith.constant 0 : i32
    %c0_i32_0 = arith.constant 0 : i32
    %c0_i32_1 = arith.constant 0 : i32
    return %c0_i32, %c0_i32_0 : i32, i32
  }
}

module attributes {stable_mosaic.version = 11 : i64} {
  func.func @_matmul_bias_act_kernel(%arg0: i32, %arg1: memref<32x1024xbf16, #tpu.memory_space<vmem>>, %arg2: memref<1024x32xbf16, #tpu.memory_space<vmem>>, %arg3: memref<32x1xf32, #tpu.memory_space<vmem>>, %arg4: memref<32x32xf32, #tpu.memory_space<vmem>>) attributes {dimension_semantics = [#tpu.dimension_semantics<parallel>], iteration_bounds = array<i64: 1>, scalar_prefetch = 0 : i64, scratch_operands = 0 : i64, tpu.core_type = #tpu.core_type<tc>, window_params = [{pipeline_mode = #tpu.pipeline_mode<synchronous>, transform_indices = @transform_0, window_bounds = array<i64: 32, 1024>}, {transform_indices = @transform_1, window_bounds = array<i64: 1024, 32>}, {pipeline_mode = #tpu.pipeline_mode<synchronous>, transform_indices = @transform_2, window_bounds = array<i64: 32, 1>}, {transform_indices = @transform_3, window_bounds = array<i64: 32, 32>}]} {
    %c0 = arith.constant 0 : index
    %c0_0 = arith.constant 0 : index
    %0 = vector.load %arg1[%c0, %c0_0] : memref<32x1024xbf16, #tpu.memory_space<vmem>>, vector<32x1024xbf16>
    %c0_1 = arith.constant 0 : index
    %c0_2 = arith.constant 0 : index
    %1 = vector.load %arg2[%c0_1, %c0_2] : memref<1024x32xbf16, #tpu.memory_space<vmem>>, vector<1024x32xbf16>
    %cst = arith.constant dense<0.000000e+00> : vector<32x32xf32>
    %2 = tpu.matmul %0, %1, %cst {dimension_numbers = #tpu.dot_dimension_numbers<[1], [0], [0], [1], [0, 0, 1, 1], [], []>} : vector<32x1024xbf16>, vector<1024x32xbf16>, vector<32x32xf32> -> vector<32x32xf32>
    %c0_3 = arith.constant 0 : index
    %c0_4 = arith.constant 0 : index
    %3 = vector.load %arg3[%c0_3, %c0_4] : memref<32x1xf32, #tpu.memory_space<vmem>>, vector<32x1xf32>
    %4 = vector.broadcast %3 : vector<32x1xf32> to vector<32x32xf32>
    %5 = arith.addf %2, %4 : vector<32x32xf32>
    %cst_5 = arith.constant 0.000000e+00 : f32
    %6 = vector.broadcast %cst_5 : f32 to vector<32x32xf32>
    %7 = arith.cmpf ogt, %5, %6 : vector<32x32xf32>
    %cst_6 = arith.constant 0.00999999977 : f32
    %8 = vector.broadcast %cst_6 : f32 to vector<32x32xf32>
    %9 = arith.mulf %8, %5 : vector<32x32xf32>
    %10 = arith.select %7, %5, %9 : vector<32x32xi1>, vector<32x32xf32>
    %c0_7 = arith.constant 0 : index
    %c0_8 = arith.constant 0 : index
    %11 = vector.load %arg4[%c0_7, %c0_8] : memref<32x32xf32, #tpu.memory_space<vmem>>, vector<32x32xf32>
    tpu.vector_store %arg4[%c0_7, %c0_8], %10 {strides = array<i32>} : memref<32x32xf32, #tpu.memory_space<vmem>>, vector<32x32xf32>,
    return
  }
  func.func @transform_0(%arg0: i32) -> (i32, i32) {
    %c0_i32 = arith.constant 0 : i32
    %c0_i32_0 = arith.constant 0 : i32
    %c0_i32_1 = arith.constant 0 : i32
    return %c0_i32, %c0_i32_0 : i32, i32
  }
  func.func @transform_1(%arg0: i32) -> (i32, i32) {
    %c0_i32 = arith.constant 0 : i32
    %c0_i32_0 = arith.constant 0 : i32
    return %c0_i32, %arg0 : i32, i32
  }
  func.func @transform_2(%arg0: i32) -> (i32, i32) {
    %c0_i32 = arith.constant 0 : i32
    %c0_i32_0 = arith.constant 0 : i32
    %c0_i32_1 = arith.constant 0 : i32
    return %c0_i32, %c0_i32_0 : i32, i32
  }
  func.func @transform_3(%arg0: i32) -> (i32, i32) {
    %c0_i32 = arith.constant 0 : i32
    %c0_i32_0 = arith.constant 0 : i32
    return %c0_i32, %arg0 : i32, i32
  }
}

module attributes {stable_mosaic.version = 11 : i64} {
  func.func @_matmul_bias_act_kernel(%arg0: i32, %arg1: memref<16x512xbf16, #tpu.memory_space<vmem>>, %arg2: memref<512x200xbf16, #tpu.memory_space<vmem>>, %arg3: memref<16x1xf32, #tpu.memory_space<vmem>>, %arg4: memref<16x200xf32, #tpu.memory_space<vmem>>) attributes {dimension_semantics = [#tpu.dimension_semantics<parallel>], iteration_bounds = array<i64: 1>, scalar_prefetch = 0 : i64, scratch_operands = 0 : i64, tpu.core_type = #tpu.core_type<tc>, window_params = [{pipeline_mode = #tpu.pipeline_mode<synchronous>, transform_indices = @transform_0, window_bounds = array<i64: 16, 512>}, {transform_indices = @transform_1, window_bounds = array<i64: 512, 200>}, {pipeline_mode = #tpu.pipeline_mode<synchronous>, transform_indices = @transform_2, window_bounds = array<i64: 16, 1>}, {transform_indices = @transform_3, window_bounds = array<i64: 16, 200>}]} {
    %c0 = arith.constant 0 : index
    %c0_0 = arith.constant 0 : index
    %0 = vector.load %arg1[%c0, %c0_0] : memref<16x512xbf16, #tpu.memory_space<vmem>>, vector<16x512xbf16>
    %c0_1 = arith.constant 0 : index
    %c0_2 = arith.constant 0 : index
    %1 = vector.load %arg2[%c0_1, %c0_2] : memref<512x200xbf16, #tpu.memory_space<vmem>>, vector<512x200xbf16>
    %cst = arith.constant dense<0.000000e+00> : vector<16x200xf32>
    %2 = tpu.matmul %0, %1, %cst {dimension_numbers = #tpu.dot_dimension_numbers<[1], [0], [0], [1], [0, 0, 1, 1], [], []>} : vector<16x512xbf16>, vector<512x200xbf16>, vector<16x200xf32> -> vector<16x200xf32>
    %c0_3 = arith.constant 0 : index
    %c0_4 = arith.constant 0 : index
    %3 = vector.load %arg3[%c0_3, %c0_4] : memref<16x1xf32, #tpu.memory_space<vmem>>, vector<16x1xf32>
    %4 = vector.broadcast %3 : vector<16x1xf32> to vector<16x200xf32>
    %5 = arith.addf %2, %4 : vector<16x200xf32>
    %cst_5 = arith.constant 0.000000e+00 : f32
    %6 = vector.broadcast %cst_5 : f32 to vector<16x200xf32>
    %7 = arith.cmpf ogt, %5, %6 : vector<16x200xf32>
    %cst_6 = arith.constant 0.00999999977 : f32
    %8 = vector.broadcast %cst_6 : f32 to vector<16x200xf32>
    %9 = arith.mulf %8, %5 : vector<16x200xf32>
    %10 = arith.select %7, %5, %9 : vector<16x200xi1>, vector<16x200xf32>
    %c0_7 = arith.constant 0 : index
    %c0_8 = arith.constant 0 : index
    %11 = vector.load %arg4[%c0_7, %c0_8] : memref<16x200xf32, #tpu.memory_space<vmem>>, vector<16x200xf32>
    tpu.vector_store %arg4[%c0_7, %c0_8], %10 {strides = array<i32>} : memref<16x200xf32, #tpu.memory_space<vmem>>, vector<16x200xf32>,
    return
  }
  func.func @transform_0(%arg0: i32) -> (i32, i32) {
    %c0_i32 = arith.constant 0 : i32
    %c0_i32_0 = arith.constant 0 : i32
    %c0_i32_1 = arith.constant 0 : i32
    return %c0_i32, %c0_i32_0 : i32, i32
  }
  func.func @transform_1(%arg0: i32) -> (i32, i32) {
    %c0_i32 = arith.constant 0 : i32
    %c0_i32_0 = arith.constant 0 : i32
    return %c0_i32, %arg0 : i32, i32
  }
  func.func @transform_2(%arg0: i32) -> (i32, i32) {
    %c0_i32 = arith.constant 0 : i32
    %c0_i32_0 = arith.constant 0 : i32
    %c0_i32_1 = arith.constant 0 : i32
    return %c0_i32, %c0_i32_0 : i32, i32
  }
  func.func @transform_3(%arg0: i32) -> (i32, i32) {
    %c0_i32 = arith.constant 0 : i32
    %c0_i32_0 = arith.constant 0 : i32
    return %c0_i32, %arg0 : i32, i32
  }
}

module attributes {stable_mosaic.version = 11 : i64} {
  func.func @_matmul_bias_act_kernel(%arg0: i32, %arg1: memref<1x400xbf16, #tpu.memory_space<vmem>>, %arg2: memref<400x882xbf16, #tpu.memory_space<vmem>>, %arg3: memref<1x1xf32, #tpu.memory_space<vmem>>, %arg4: memref<1x882xf32, #tpu.memory_space<vmem>>) attributes {dimension_semantics = [#tpu.dimension_semantics<parallel>], iteration_bounds = array<i64: 1>, scalar_prefetch = 0 : i64, scratch_operands = 0 : i64, tpu.core_type = #tpu.core_type<tc>, window_params = [{pipeline_mode = #tpu.pipeline_mode<synchronous>, transform_indices = @transform_0, window_bounds = array<i64: 1, 400>}, {transform_indices = @transform_1, window_bounds = array<i64: 400, 882>}, {pipeline_mode = #tpu.pipeline_mode<synchronous>, transform_indices = @transform_2, window_bounds = array<i64: 1, 1>}, {transform_indices = @transform_3, window_bounds = array<i64: 1, 882>}]} {
    %c0 = arith.constant 0 : index
    %c0_0 = arith.constant 0 : index
    %0 = vector.load %arg1[%c0, %c0_0] : memref<1x400xbf16, #tpu.memory_space<vmem>>, vector<1x400xbf16>
    %c0_1 = arith.constant 0 : index
    %c0_2 = arith.constant 0 : index
    %1 = vector.load %arg2[%c0_1, %c0_2] : memref<400x882xbf16, #tpu.memory_space<vmem>>, vector<400x882xbf16>
    %cst = arith.constant dense<0.000000e+00> : vector<1x882xf32>
    %2 = tpu.matmul %0, %1, %cst {dimension_numbers = #tpu.dot_dimension_numbers<[1], [0], [0], [1], [0, 0, 1, 1], [], []>} : vector<1x400xbf16>, vector<400x882xbf16>, vector<1x882xf32> -> vector<1x882xf32>
    %c0_3 = arith.constant 0 : index
    %c0_4 = arith.constant 0 : index
    %3 = vector.load %arg3[%c0_3, %c0_4] : memref<1x1xf32, #tpu.memory_space<vmem>>, vector<1x1xf32>
    %4 = vector.broadcast %3 : vector<1x1xf32> to vector<1x882xf32>
    %5 = arith.addf %2, %4 : vector<1x882xf32>
    %6 = arith.negf %5 : vector<1x882xf32>
    %7 = math.exp %6 : vector<1x882xf32>
    %cst_5 = arith.constant 1.000000e+00 : f32
    %8 = vector.broadcast %cst_5 : f32 to vector<1x882xf32>
    %9 = arith.addf %8, %7 : vector<1x882xf32>
    %10 = arith.divf %8, %9 : vector<1x882xf32>
    %c0_6 = arith.constant 0 : index
    %c0_7 = arith.constant 0 : index
    %11 = vector.load %arg4[%c0_6, %c0_7] : memref<1x882xf32, #tpu.memory_space<vmem>>, vector<1x882xf32>
    tpu.vector_store %arg4[%c0_6, %c0_7], %10 {strides = array<i32>} : memref<1x882xf32, #tpu.memory_space<vmem>>, vector<1x882xf32>,
    return
  }
  func.func @transform_0(%arg0: i32) -> (i32, i32) {
    %c0_i32 = arith.constant 0 : i32
    %c0_i32_0 = arith.constant 0 : i32
    %c0_i32_1 = arith.constant 0 : i32
    return %c0_i32, %c0_i32_0 : i32, i32
  }
  func.func @transform_1(%arg0: i32) -> (i32, i32) {
    %c0_i32 = arith.constant 0 : i32
    %c0_i32_0 = arith.constant 0 : i32
    return %c0_i32, %arg0 : i32, i32
  }
  func.func @transform_2(%arg0: i32) -> (i32, i32) {
    %c0_i32 = arith.constant 0 : i32
    %c0_i32_0 = arith.constant 0 : i32
    %c0_i32_1 = arith.constant 0 : i32
    return %c0_i32, %c0_i32_0 : i32, i32
  }
  func.func @transform_3(%arg0: i32) -> (i32, i32) {
    %c0_i32 = arith.constant 0 : i32
    %c0_i32_0 = arith.constant 0 : i32
    return %c0_i32, %arg0 : i32, i32
  }
}

</mosaic_0001>

<bundles_post_ra>
// kernel: landsat2viirs_forward.8
= control target key start
LH: loop header
LB: loop body
LE: loop exit
PB: predicated region body
PF: predicated region fallthrough
CT: control target
= control target key end

     0   :  { %s766_s12 = smov 0   ;;  %s768_s13 = smov 0   ;;  %s921_s0 = inlined_call_operand.vmem [shape: bf16[8,48], index: 0, kind: input, shape index: {}]   ;;  %s922_s1 = inlined_call_operand.vmem [shape: bf16[48,7168], index: 1, kind: input, shape index: {}]   ;;  %s923_s2 = inlined_call_operand.vmem [shape: f32[8,1], index: 2, kind: input, shape index: {}]   ;;  %s924_s3 = inlined_call_operand.vmem [shape: f32[8,7168], index: 3, kind: output, shape index: {}]  }
   0x1   :  { %s770_s14 = smov 0  }
   0x2 LB: > { %s653_s15 = sadd.s32 4294967295, %s743_s14   ;;  %s783_s16 = sadd.s32 1, %s743_s14   ;;  %s743_s14 = sphi %s770_s14, %s927_s14   ;;  %s739_s13 = sphi %s768_s13, %s926_s13   ;;  %s735_s12 = sphi %s766_s12, %s925_s12  }
   0x3   : > { %s38_s17 = ssub.s32 %s743_s14, %s783_s16  ;;  %s41_s18 = sadd.s32 1, %s739_s13 }
   0x4   : > { %p39_p0 = scmp.eq.s32.totalorder %s38_s17, 0  ;;  %p48_p1 = scmp.ne.s32.totalorder %s739_s13, %s735_s12 }
   0x5   : > { %p49_p2 = scmp.eq.s32.totalorder %s743_s14, 0  ;;  %p656_p4 = scmp.ge.s32.totalorder %s743_s14, 7 }
   0x6   : > { %s792_s19 = scalar_select %p39_p0, %s739_s13, %s41_s18  }
   0x7   : > { %p50_p3 = por %p49_p2, %p48_p1  ;;  %127 = sbr.rel (%p656_p4) target bundleno = 31 (0x1f), region = 24 }
   0xe   : > { %130 = sbr.rel (!%p50_p3) target bundleno = 31 (0x1f), region = 28  ;;  %s132_s20 = sand.u32 (%p50_p3), 1, %s739_s13  }
   0xf   : > { %s692_s21 = sshll.u32 (%p50_p3), %s743_s14, 5  ;;  %s693_s22 = smul.u32 (%p50_p3), 192, %s132_s20 }
  0x10   : > { %s800_s25 = scalar_lea.vmem (%p50_p3), %s922_s1, %s692_s21 }
  0x11   : > { %v150_v0 = vld [vmem:[%s800_s25] sm:$0xff] (%p50_p3)  ;;  %v152_v1 = vld [vmem:[%s800_s25 + $0x8] sm:$0xff] (%p50_p3)  ;;  %v154_v2 = vld [vmem:[%s800_s25 + $0x10] sm:$0xff] (%p50_p3)  ;;  %s808_s26 = scalar_lea.vmem (%p50_p3), [#allocation2], %s693_s22 }
  0x12   : > { %v156_v3 = vld [vmem:[%s800_s25 + $0x18] sm:$0xff] (%p50_p3)  ;;  %v158_v4 = vld [vmem:[%s800_s25 + $0xe0] sm:$0xff] (%p50_p3)  ;;  %v160_v5 = vld [vmem:[%s800_s25 + $0xe8] sm:$0xff] (%p50_p3)  ;;  %151 = vst [vmem:[%s808_s26] sm:$0xff] (%p50_p3), %v150_v0 }
  0x13   : > { %153 = vst [vmem:[%s808_s26 + $0x8] sm:$0xff] (%p50_p3), %v152_v1  ;;  %155 = vst [vmem:[%s808_s26 + $0x10] sm:$0xff] (%p50_p3), %v154_v2  ;;  %v162_v6 = vld [vmem:[%s800_s25 + $0xf0] sm:$0xff] (%p50_p3)  ;;  %v164_v7 = vld [vmem:[%s800_s25 + $0xf8] sm:$0xff] (%p50_p3) }
  0x14   : > { %157 = vst [vmem:[%s808_s26 + $0x18] sm:$0xff] (%p50_p3), %v156_v3  ;;  %159 = vst [vmem:[%s808_s26 + $0x20] sm:$0xff] (%p50_p3), %v158_v4  ;;  %v166_v8 = vld [vmem:[%s800_s25 + $0x1c0] sm:$0xff] (%p50_p3)  ;;  %v168_v9 = vld [vmem:[%s800_s25 + $0x1c8] sm:$0xff] (%p50_p3) }
  0x15   : > { %161 = vst [vmem:[%s808_s26 + $0x28] sm:$0xff] %v160_v5  ;;  %163 = vst [vmem:[%s808_s26 + $0x30] sm:$0xff] %v162_v6  ;;  %v170_v10 = vld [vmem:[%s800_s25 + $0x1d0] sm:$0xff]  ;;  %v172_v11 = vld [vmem:[%s800_s25 + $0x1d8] sm:$0xff] }
  0x16   : > { %165 = vst [vmem:[%s808_s26 + $0x38] sm:$0xff] %v164_v7  ;;  %167 = vst [vmem:[%s808_s26 + $0x40] sm:$0xff] %v166_v8  ;;  %v174_v12 = vld [vmem:[%s800_s25 + $0x2a0] sm:$0xff]  ;;  %v176_v13 = vld [vmem:[%s800_s25 + $0x2a8] sm:$0xff] }
  0x17   : > { %169 = vst [vmem:[%s808_s26 + $0x48] sm:$0xff] %v168_v9  ;;  %171 = vst [vmem:[%s808_s26 + $0x50] sm:$0xff] %v170_v10  ;;  %v178_v14 = vld [vmem:[%s800_s25 + $0x2b0] sm:$0xff]  ;;  %v180_v15 = vld [vmem:[%s800_s25 + $0x2b8] sm:$0xff] }
  0x18   : > { %173 = vst [vmem:[%s808_s26 + $0x58] sm:$0xff] %v172_v11  ;;  %175 = vst [vmem:[%s808_s26 + $0x60] sm:$0xff] %v174_v12  ;;  %v182_v16 = vld [vmem:[%s800_s25 + $0x380] sm:$0xff]  ;;  %v184_v17 = vld [vmem:[%s800_s25 + $0x388] sm:$0xff] }
  0x19   : > { %177 = vst [vmem:[%s808_s26 + $0x68] sm:$0xff] %v176_v13  ;;  %179 = vst [vmem:[%s808_s26 + $0x70] sm:$0xff] %v178_v14  ;;  %v186_v18 = vld [vmem:[%s800_s25 + $0x390] sm:$0xff]  ;;  %v188_v19 = vld [vmem:[%s800_s25 + $0x398] sm:$0xff] }
  0x1a   : > { %181 = vst [vmem:[%s808_s26 + $0x78] sm:$0xff] %v180_v15  ;;  %183 = vst [vmem:[%s808_s26 + $0x80] sm:$0xff] %v182_v16  ;;  %v190_v20 = vld [vmem:[%s800_s25 + $0x460] sm:$0xff]  ;;  %v192_v21 = vld [vmem:[%s800_s25 + $0x468] sm:$0xff] }
  0x1b   : > { %185 = vst [vmem:[%s808_s26 + $0x88] sm:$0xff] %v184_v17  ;;  %187 = vst [vmem:[%s808_s26 + $0x90] sm:$0xff] %v186_v18  ;;  %v194_v22 = vld [vmem:[%s800_s25 + $0x470] sm:$0xff]  ;;  %v196_v23 = vld [vmem:[%s800_s25 + $0x478] sm:$0xff] }
  0x1c   : > { %189 = vst [vmem:[%s808_s26 + $0x98] sm:$0xff] %v188_v19  ;;  %191 = vst [vmem:[%s808_s26 + $0xa0] sm:$0xff] %v190_v20 }
  0x1d   : > { %193 = vst [vmem:[%s808_s26 + $0xa8] sm:$0xff] %v192_v21  ;;  %195 = vst [vmem:[%s808_s26 + $0xb0] sm:$0xff] %v194_v22 }
  0x1e   : > { %197 = vst [vmem:[%s808_s26 + $0xb8] sm:$0xff] %v196_v23 }
  0x1f PF: > { %p659_p5 = scmp.ge.s32.totalorder %s743_s14, 1  ;;  %p202_p6 = scmp.lt.s32.totalorder %s743_s14, 8 }
  0x21   : > { %p203_p7 = pnand %p659_p5, %p202_p6 }
  0x22   : > { %s209_s27 = sand.u32 (!%p203_p7), 1, %s735_s12   ;;  %v265_v24 = vld [vmem:[%s923_s2] sm:$0xff] (!%p203_p7)  ;;  %v745_v25 = vmov (!%p203_p7), 0   ;;  %vm391_vm0 = vcmask (!%p203_p7), 392192   ;;  %s660_s7 = sshll.u32 (!%p203_p7), %s653_s15, 3 }
  0x23   : > { %206 = sbr.rel (%p203_p7) target bundleno = 287 (0x11f), region = 51  ;;  %427 = vmatprep.mubr.bf16.mxu0 (!%p203_p7), %v745_v25  ;;  %468 = vmatprep.mubr.bf16.mxu1 (!%p203_p7), %v745_v25  ;;  %v240_v60 = vld [vmem:[%s921_s0] sm:$0xf] (!%p203_p7)  ;;  %p234_p8 = scmp.lt.s32.totalorder (!%p203_p7), %s660_s7, 55 }
  0x24   : > { %s694_s30 = smul.u32 (!%p203_p7), 192, %s209_s27  ;;  %720 = vset.pattern.permute.xlu0 (!%p203_p7), %v745_v25 }
  0x25   : > { %268 = vperm.xlu0 (!%p203_p7), %720, %v265_v24  }
  0x26   : > { %s861_s4 = scalar_lea.vmem (!%p203_p7), [#allocation2], %s694_s30 }
  0x27   : > { %v241_v26 = vld [vmem:[%s861_s4] sm:$0xff] (!%p203_p7)  ;;  %v242_v28 = vld [vmem:[%s861_s4 + $0x8] sm:$0xff] (!%p203_p7)  ;;  %v243_v48 = vld [vmem:[%s861_s4 + $0x10] sm:$0xff] (!%p203_p7) }
  0x28   : > { %v245_v27 = vld [vmem:[%s861_s4 + $0x20] sm:$0xff] (!%p203_p7)  ;;  %v246_v30 = vld [vmem:[%s861_s4 + $0x28] sm:$0xff] (!%p203_p7)  ;;  %v247_v49 = vld [vmem:[%s861_s4 + $0x30] sm:$0xff] (!%p203_p7) }
  0x29   : > { %v663_v29 = vcombine.high (!%p203_p7), %v241_v26, %v245_v27  ;;  %v662_v31 = vcombine.low (!%p203_p7), %v241_v26, %v245_v27  ;;  %v249_v32 = vld [vmem:[%s861_s4 + $0x40] sm:$0xff] (!%p203_p7)  ;;  %v665_v34 = vcombine.high (!%p203_p7), %v242_v28, %v246_v30  ;;  %v664_v35 = vcombine.low (!%p203_p7), %v242_v28, %v246_v30  ;;  %v250_v37 = vld [vmem:[%s861_s4 + $0x48] sm:$0xff] (!%p203_p7)  ;;  %v244_v50 = vld [vmem:[%s861_s4 + $0x18] sm:$0xff] (!%p203_p7) }
  0x2a   : > { %v253_v33 = vld [vmem:[%s861_s4 + $0x60] sm:$0xff]  ;;  %v254_v38 = vld [vmem:[%s861_s4 + $0x68] sm:$0xff]  ;;  %v248_v51 = vld [vmem:[%s861_s4 + $0x38] sm:$0xff]  ;;  %v667_v54 = vcombine.high %v243_v48, %v247_v49  ;;  %v666_v61 = vcombine.low %v243_v48, %v247_v49  ;;  %s929_s7 = smov (!%p234_p8, %s660_s7), 55 }
  0x2b   : > { %v671_v36 = vcombine.high %v249_v32, %v253_v33  ;;  %v257_v39 = vld [vmem:[%s861_s4 + $0x80] sm:$0xff]  ;;  %395 = vmatprep.subr.bf16.mxu0 %v663_v29  ;;  %v673_v40 = vcombine.high %v250_v37, %v254_v38  ;;  %v258_v42 = vld [vmem:[%s861_s4 + $0x88] sm:$0xff]  ;;  %436 = vmatprep.subr.bf16.mxu1 %v665_v34  ;;  %v670_v44 = vcombine.low %v249_v32, %v253_v33  ;;  %v251_v56 = vld [vmem:[%s861_s4 + $0x50] sm:$0xff]  ;;  %s661_s8 = sshll.u32 %s929_s7, 3 }
  0x2c   : > { %v261_v41 = vld [vmem:[%s861_s4 + $0xa0] sm:$0xff]  ;;  %v262_v43 = vld [vmem:[%s861_s4 + $0xa8] sm:$0xff]  ;;  %396 = vmatpush1.bf16.msra.mxu0 %v662_v31  ;;  %437 = vmatpush1.bf16.msra.mxu1 %v664_v35  ;;  %v672_v45 = vcombine.low %v250_v37, %v254_v38  ;;  %v669_v55 = vcombine.high %v244_v50, %v248_v51  ;;  %v255_v57 = vld [vmem:[%s861_s4 + $0x70] sm:$0xff]  ;;  %v668_v62 = vcombine.low %v244_v50, %v248_v51  ;;  %s901_s11 = scalar_lea.vmem %s924_s3, %s661_s8 }
  0x2d   : > { %397 = vmatprep.subr.bf16.mxu0 %v671_v36  ;;  %v679_v46 = vcombine.high %v257_v39, %v261_v41  ;;  %438 = vmatprep.subr.bf16.mxu1 %v673_v40  ;;  %v681_v47 = vcombine.high %v258_v42, %v262_v43  ;;  %v678_v52 = vcombine.low %v257_v39, %v261_v41  ;;  %v252_v58 = vld [vmem:[%s861_s4 + $0x58] sm:$0xff]  ;;  %v259_v1 = vld [vmem:[%s861_s4 + $0x90] sm:$0xff] }
  0x2e   : > { %v680_v53 = vcombine.low %v258_v42, %v262_v43  ;;  %v256_v59 = vld [vmem:[%s861_s4 + $0x78] sm:$0xff]  ;;  %v675_v63 = vcombine.high %v251_v56, %v255_v57  ;;  %v263_v2 = vld [vmem:[%s861_s4 + $0xb0] sm:$0xff]  ;;  %v674_v5 = vcombine.low %v251_v56, %v255_v57 }
  0x2f   : > { %v677_v0 = vcombine.high %v252_v58, %v256_v59  ;;  %v260_v3 = vld [vmem:[%s861_s4 + $0x98] sm:$0xff]  ;;  %v676_v6 = vcombine.low %v252_v58, %v256_v59  ;;  %v683_v7 = vcombine.high %v259_v1, %v263_v2  ;;  %v682_v9 = vcombine.low %v259_v1, %v263_v2 }
  0x30   : > { %398 = vmatpush1.bf16.msra.mxu0 %v670_v44  ;;  %439 = vmatpush1.bf16.msra.mxu1 %v672_v45  ;;  %v264_v4 = vld [vmem:[%s861_s4 + $0xb8] sm:$0xff] }
  0x31   : > { %399 = vmatprep.subr.bf16.mxu0 %v679_v46  ;;  %440 = vmatprep.subr.bf16.mxu1 %v681_v47  ;;  %v685_v8 = vcombine.high %v260_v3, %v264_v4  ;;  %v684_v10 = vcombine.low %v260_v3, %v264_v4 }
  0x34   : > { %400 = vmatpush1.bf16.msra.mxu0 %v678_v52  ;;  %441 = vmatpush1.bf16.msra.mxu1 %v680_v53 }
  0x35   : > { %477 = vmatprep.subr.bf16.mxu0 %v667_v54  ;;  %518 = vmatprep.subr.bf16.mxu1 %v669_v55 }
  0x37   : > { %686 = vmatmul.mubr.msk.bf16.vlgmr.msra.gmra.mrb[0].mxu0 %vm391_vm0, %v240_v60  ;;  %687 = vmatmul.mubr.msk.bf16.vlgmr.msra.gmra.mrb[0].mxu1 %vm391_vm0, %v240_v60 }
  0x38   : > { %478 = vmatpush1.bf16.msra.mxu0 %v666_v61  ;;  %519 = vmatpush1.bf16.msra.mxu1 %v668_v62 }
  0x39   : > { %479 = vmatprep.subr.bf16.mxu0 %v675_v63  ;;  %520 = vmatprep.subr.bf16.mxu1 %v677_v0 }
  0x3a   : > { %509 = vmatprep.mubr.bf16.mxu0 %v745_v25  ;;  %550 = vmatprep.mubr.bf16.mxu1 %v745_v25 }
  0x3c   : > { %480 = vmatpush1.bf16.msra.mxu0 %v674_v5  ;;  %521 = vmatpush1.bf16.msra.mxu1 %v676_v6 }
  0x3d   : > { %481 = vmatprep.subr.bf16.mxu0 %v683_v7  ;;  %522 = vmatprep.subr.bf16.mxu1 %v685_v8 }
  0x40   : > { %482 = vmatpush1.bf16.msra.mxu0 %v682_v9  ;;  %523 = vmatpush1.bf16.msra.mxu1 %v684_v10 }
  0x43   : > { %688 = vmatmul.mubr.msk.bf16.vlgmr.msra.gmra.mrb[4].mxu0 %vm391_vm0, %v240_v60  ;;  %689 = vmatmul.mubr.msk.bf16.vlgmr.msra.gmra.mrb[4].mxu1 %vm391_vm0, %v240_v60 }
  0xa4   : > { %v269_v11 = vpop.permute.xlu0 %268 }
 0x10a   : > { %v429_v12 = vpop.f32.mrb[0].mxu0  ;;  %v470_v14 = vpop.f32.mrb[0].mxu1 }
 0x10b   : > { %v430_v13 = vadd.f32 %v429_v12, %v269_v11  ;;  %v431_v15 = vpop.f32.mrb[1].mxu0  ;;  %v471_v16 = vadd.f32 %v470_v14, %v269_v11  ;;  %v472_v18 = vpop.f32.mrb[1].mxu1 }
 0x10c   : > { %v432_v17 = vadd.f32 %v431_v15, %v269_v11  ;;  %v433_v19 = vpop.f32.mrb[2].mxu0  ;;  %v473_v21 = vadd.f32 %v472_v18, %v269_v11  ;;  %v474_v22 = vpop.f32.mrb[2].mxu1 }
 0x10d   : > { %vm559_vm1 = vcmp.gt.f32.partialorder %v430_v13, 0.0  ;;  %v567_v20 = vmul.f32 0.01, %v430_v13  ;;  %v434_v23 = vpop.f32.mrb[3].mxu0  ;;  %vm561_vm2 = vcmp.gt.f32.partialorder %v471_v16, 0.0  ;;  %v475_v28 = vpop.f32.mrb[3].mxu1 }
 0x10e   : > { %v569_v24 = vmul.f32 0.01, %v471_v16  ;;  %vm560_vm3 = vcmp.gt.f32.partialorder %v432_v17, 0.0  ;;  %v568_v25 = vmul.f32 0.01, %v432_v17  ;;  %vm562_vm4 = vcmp.gt.f32.partialorder %v473_v21, 0.0 }
 0x10f   : > { %v575_v26 = vsel %vm559_vm1, %v430_v13, %v567_v20  ;;  %v570_v27 = vmul.f32 0.01, %v473_v21 }
 0x110   : > { %583 = vst [vmem:[%s901_s11] sm:$0xff] %v575_v26  ;;  %v577_v29 = vsel %vm561_vm2, %v471_v16, %v569_v24  ;;  %v576_v30 = vsel %vm560_vm3, %v432_v17, %v568_v25 }
 0x111   : > { %585 = vst [vmem:[%s901_s11 + $0x10] sm:$0xff] %v577_v29  ;;  %584 = vst [vmem:[%s901_s11 + $0x8] sm:$0xff] %v576_v30  ;;  %v578_v31 = vsel %vm562_vm4, %v473_v21, %v570_v27 }
 0x112   : > { %586 = vst [vmem:[%s901_s11 + $0x18] sm:$0xff] %v578_v31 }
 0x116   : > { %v511_v32 = vpop.f32.mrb[4].mxu0  ;;  %v552_v34 = vpop.f32.mrb[4].mxu1 }
 0x117   : > { %v512_v33 = vadd.f32 %v511_v32, %v269_v11  ;;  %v513_v35 = vpop.f32.mrb[5].mxu0  ;;  %v553_v36 = vadd.f32 %v552_v34, %v269_v11  ;;  %v554_v38 = vpop.f32.mrb[5].mxu1 }
 0x118   : > { %v514_v37 = vadd.f32 %v513_v35, %v269_v11  ;;  %v515_v39 = vpop.f32.mrb[6].mxu0  ;;  %v555_v41 = vadd.f32 %v554_v38, %v269_v11  ;;  %v556_v42 = vpop.f32.mrb[6].mxu1 }
 0x119   : > { %vm563_vm5 = vcmp.gt.f32.partialorder %v512_v33, 0.0  ;;  %v571_v40 = vmul.f32 0.01, %v512_v33  ;;  %v516_v43 = vpop.f32.mrb[7].mxu0  ;;  %vm565_vm6 = vcmp.gt.f32.partialorder %v553_v36, 0.0  ;;  %v557_v48 = vpop.f32.mrb[7].mxu1 }
 0x11a   : > { %v573_v44 = vmul.f32 0.01, %v553_v36  ;;  %vm564_vm7 = vcmp.gt.f32.partialorder %v514_v37, 0.0  ;;  %v572_v45 = vmul.f32 0.01, %v514_v37  ;;  %vm566_vm8 = vcmp.gt.f32.partialorder %v555_v41, 0.0 }
 0x11b   : > { %v579_v46 = vsel %vm563_vm5, %v512_v33, %v571_v40  ;;  %v574_v47 = vmul.f32 0.01, %v555_v41 }
 0x11c   : > { %587 = vst [vmem:[%s901_s11 + $0x20] sm:$0xff] %v579_v46  ;;  %v581_v49 = vsel %vm565_vm6, %v553_v36, %v573_v44  ;;  %v580_v50 = vsel %vm564_vm7, %v514_v37, %v572_v45 }
 0x11d   : > { %589 = vst [vmem:[%s901_s11 + $0x30] sm:$0xff] %v581_v49  ;;  %588 = vst [vmem:[%s901_s11 + $0x28] sm:$0xff] %v580_v50  ;;  %v582_v51 = vsel %vm566_vm8, %v555_v41, %v574_v47 }
 0x11e   : > { %590 = vst [vmem:[%s901_s11 + $0x38] sm:$0xff] %v582_v51 }
 0x11f PF: > { %p10_p9 = scmp.ge.s32.totalorder %s783_s16, 9   ;;  %s925_s12 = smov %s739_s13 }
 0x120   : > { %s926_s13 = smov %s792_s19  ;;  %s927_s14 = smov %s783_s16 }
 0x121   :  { %12 = sbr.rel (!%p10_p9) target bundleno = 2 (0x2), region = 90 }

// kernel: landsat2viirs_forward.9
= control target key start
LH: loop header
LB: loop body
LE: loop exit
PB: predicated region body
PF: predicated region fallthrough
CT: control target
= control target key end

     0   :  { %v789_v1 = vmov 0   ;;  %v790_v37 = vmov 0.0   ;;  %vm791_vm0 = vmmov 0   ;;  %vm605_vm9 = vcmask 261120   ;;  %s1052_s1 = inlined_call_operand.vmem [shape: bf16[128,800], index: 1, kind: input, shape index: {}]   ;;  %s1053_s0 = inlined_call_operand.vmem [shape: bf16[16,128], index: 0, kind: input, shape index: {}]   ;;  %s1054_s2 = inlined_call_operand.vmem [shape: f32[16,1], index: 2, kind: input, shape index: {}]   ;;  %s1055_s3 = inlined_call_operand.vmem [shape: f32[16,800], index: 3, kind: output, shape index: {}]  }
   0x1   :  { %v708_v0 = vld [vmem:[%s1052_s1 + $0x4] ss:$28 sps:$4 sm:$0xff]   ;;  %419 = vmatprep.mubr.bf16.mxu0 %v789_v1  ;;  %462 = vmatprep.mubr.bf16.mxu1 %v789_v1  ;;  %v710_v2 = vld [vmem:[%s1052_s1 + $0xc] ss:$28 sps:$4 sm:$0xff]   ;;  %v714_v5 = vld [vmem:[%s1052_s1 + $0x3c] ss:$28 sps:$4 sm:$0xff]  }
   0x2   :  { %707 = vset.pattern.permute.xlu0 %v789_v1  ;;  %387 = vmatprep.subr.bf16.mxu0 %v708_v0  ;;  %v712_v3 = vld [vmem:[%s1052_s1] ss:$28 sps:$4 sm:$0xff]   ;;  %v713_v4 = vld [vmem:[%s1052_s1 + $0x8] ss:$28 sps:$4 sm:$0xff]   ;;  %v718_v7 = vld [vmem:[%s1052_s1 + $0x38] ss:$28 sps:$4 sm:$0xff]  }
   0x3   :  { %430 = vmatprep.subr.bf16.mxu1 %v710_v2  ;;  %388 = vmatpush1.bf16.msra.mxu0 %v712_v3  ;;  %v716_v6 = vld [vmem:[%s1052_s1 + $0x44] ss:$28 sps:$4 sm:$0xff]   ;;  %v720_v9 = vld [vmem:[%s1052_s1 + $0x74] ss:$28 sps:$4 sm:$0xff]   ;;  %v722_v10 = vld [vmem:[%s1052_s1 + $0x7c] ss:$28 sps:$4 sm:$0xff]  }
   0x4   :  { %431 = vmatpush1.bf16.msra.mxu1 %v713_v4  ;;  %389 = vmatprep.subr.bf16.mxu0 %v714_v5  ;;  %v719_v8 = vld [vmem:[%s1052_s1 + $0x40] ss:$28 sps:$4 sm:$0xff]   ;;  %v724_v11 = vld [vmem:[%s1052_s1 + $0x70] ss:$28 sps:$4 sm:$0xff]   ;;  %v725_v12 = vld [vmem:[%s1052_s1 + $0x78] ss:$28 sps:$4 sm:$0xff]  }
   0x5   :  { %432 = vmatprep.subr.bf16.mxu1 %v716_v6  ;;  %v726_v13 = vld [vmem:[%s1052_s1 + $0xac] ss:$28 sps:$4 sm:$0xff]   ;;  %v728_v14 = vld [vmem:[%s1052_s1 + $0xb4] ss:$28 sps:$4 sm:$0xff]   ;;  %v732_v17 = vld [vmem:[%s1052_s1 + $0xe4] ss:$28 sps:$4 sm:$0xff]  }
   0x6   :  { %v730_v15 = vld [vmem:[%s1052_s1 + $0xa8] ss:$28 sps:$4 sm:$0xff]   ;;  %v731_v16 = vld [vmem:[%s1052_s1 + $0xb0] ss:$28 sps:$4 sm:$0xff]   ;;  %v736_v19 = vld [vmem:[%s1052_s1 + $0xe0] ss:$28 sps:$4 sm:$0xff]  }
   0x7   :  { %390 = vmatpush1.bf16.msra.mxu0 %v718_v7  ;;  %v734_v18 = vld [vmem:[%s1052_s1 + $0xec] ss:$28 sps:$4 sm:$0xff]   ;;  %v738_v21 = vld [vmem:[%s1052_s1 + $0x11c] ss:$28 sps:$4 sm:$0xff]   ;;  %v740_v22 = vld [vmem:[%s1052_s1 + $0x124] ss:$28 sps:$4 sm:$0xff]  }
   0x8   :  { %433 = vmatpush1.bf16.msra.mxu1 %v719_v8  ;;  %391 = vmatprep.subr.bf16.mxu0 %v720_v9  ;;  %v737_v20 = vld [vmem:[%s1052_s1 + $0xe8] ss:$28 sps:$4 sm:$0xff]   ;;  %v742_v23 = vld [vmem:[%s1052_s1 + $0x118] ss:$28 sps:$4 sm:$0xff]   ;;  %v743_v24 = vld [vmem:[%s1052_s1 + $0x120] ss:$28 sps:$4 sm:$0xff]  }
   0x9   :  { %434 = vmatprep.subr.bf16.mxu1 %v722_v10  ;;  %v744_v25 = vld [vmem:[%s1052_s1 + $0x154] ss:$28 sps:$4 sm:$0xff]   ;;  %v746_v26 = vld [vmem:[%s1052_s1 + $0x15c] ss:$28 sps:$4 sm:$0xff]   ;;  %v750_v29 = vld [vmem:[%s1052_s1 + $0x18c] ss:$28 sps:$4 sm:$0xff]  }
   0xa   :  { %v748_v27 = vld [vmem:[%s1052_s1 + $0x150] ss:$28 sps:$4 sm:$0xff]   ;;  %v749_v28 = vld [vmem:[%s1052_s1 + $0x158] ss:$28 sps:$4 sm:$0xff]   ;;  %v754_v31 = vld [vmem:[%s1052_s1 + $0x188] ss:$28 sps:$4 sm:$0xff]  }
   0xb   :  { %392 = vmatpush1.bf16.msra.mxu0 %v724_v11  ;;  %v752_v30 = vld [vmem:[%s1052_s1 + $0x194] ss:$28 sps:$4 sm:$0xff]   ;;  %v917_v34 = vld [vmem:[%s1053_s0] sm:$0xff]   ;;  %v763_v38 = vld [vmem:[%s1052_s1 + $0x4c] ss:$28 sps:$4 sm:$0xff]  }
   0xc   :  { %435 = vmatpush1.bf16.msra.mxu1 %v725_v12  ;;  %393 = vmatprep.subr.bf16.mxu0 %v726_v13  ;;  %v755_v32 = vld [vmem:[%s1052_s1 + $0x190] ss:$28 sps:$4 sm:$0xff]   ;;  %v760_v36 = vld [vmem:[%s1052_s1 + $0x18] ss:$28 sps:$4 sm:$0xff]   ;;  %v761_v39 = vld [vmem:[%s1052_s1 + $0x48] ss:$28 sps:$4 sm:$0xff]  }
   0xd   :  { %436 = vmatprep.subr.bf16.mxu1 %v728_v14  ;;  %v759_v33 = vld [vmem:[%s1052_s1 + $0x14] ss:$28 sps:$4 sm:$0xff]   ;;  %v767_v41 = vld [vmem:[%s1052_s1 + $0x84] ss:$28 sps:$4 sm:$0xff]   ;;  %v771_v44 = vld [vmem:[%s1052_s1 + $0xbc] ss:$28 sps:$4 sm:$0xff]  }
   0xe   :  { %v757_v35 = vld [vmem:[%s1052_s1 + $0x10] ss:$28 sps:$4 sm:$0xff]   ;;  %v765_v42 = vld [vmem:[%s1052_s1 + $0x80] ss:$28 sps:$4 sm:$0xff]   ;;  %v768_v43 = vld [vmem:[%s1052_s1 + $0x88] ss:$28 sps:$4 sm:$0xff]  }
   0xf   :  { %394 = vmatpush1.bf16.msra.mxu0 %v730_v15  ;;  %v764_v40 = vld [vmem:[%s1052_s1 + $0x50] ss:$28 sps:$4 sm:$0xff]   ;;  %v81_v45 = vld [vmem:[%s1054_s2] sm:$0xff]  ;;  %v769_v47 = vld [vmem:[%s1052_s1 + $0xb8] ss:$28 sps:$4 sm:$0xff]  }
  0x10   :  { %437 = vmatpush1.bf16.msra.mxu1 %v731_v16  ;;  %395 = vmatprep.subr.bf16.mxu0 %v732_v17  ;;  %v82_v46 = vld [vmem:[%s1054_s2 + $0x8] sm:$0xff]  ;;  %v772_v48 = vld [vmem:[%s1052_s1 + $0xc0] ss:$28 sps:$4 sm:$0xff]   ;;  %v775_v49 = vld [vmem:[%s1052_s1 + $0xf4] ss:$28 sps:$4 sm:$0xff]  }
  0x11   :  { %438 = vmatprep.subr.bf16.mxu1 %v734_v18  ;;  %85 = vperm.xlu0 %707, %v81_v45   ;;  %v773_v50 = vld [vmem:[%s1052_s1 + $0xf0] ss:$28 sps:$4 sm:$0xff]   ;;  %v776_v51 = vld [vmem:[%s1052_s1 + $0xf8] ss:$28 sps:$4 sm:$0xff]   ;;  %v777_v53 = vld [vmem:[%s1052_s1 + $0x128] ss:$28 sps:$4 sm:$0xff]  }
  0x12   :  { %v779_v52 = vld [vmem:[%s1052_s1 + $0x12c] ss:$28 sps:$4 sm:$0xff]   ;;  %v783_v55 = vld [vmem:[%s1052_s1 + $0x164] ss:$28 sps:$4 sm:$0xff]   ;;  %v787_v58 = vld [vmem:[%s1052_s1 + $0x19c] ss:$28 sps:$4 sm:$0xff]  }
  0x13   :  { %396 = vmatpush1.bf16.msra.mxu0 %v736_v19  ;;  %v780_v54 = vld [vmem:[%s1052_s1 + $0x130] ss:$28 sps:$4 sm:$0xff]   ;;  %v781_v56 = vld [vmem:[%s1052_s1 + $0x160] ss:$28 sps:$4 sm:$0xff]   ;;  %v784_v57 = vld [vmem:[%s1052_s1 + $0x168] ss:$28 sps:$4 sm:$0xff]  }
  0x14   :  { %439 = vmatpush1.bf16.msra.mxu1 %v737_v20  ;;  %397 = vmatprep.subr.bf16.mxu0 %v738_v21  ;;  %v785_v59 = vld [vmem:[%s1052_s1 + $0x198] ss:$28 sps:$4 sm:$0xff]   ;;  %v788_v60 = vld [vmem:[%s1052_s1 + $0x1a0] ss:$28 sps:$4 sm:$0xff]  }
  0x15   :  { %440 = vmatprep.subr.bf16.mxu1 %v740_v22  ;;  %90 = vperm.xlu0 %707, %v82_v46  }
  0x17   :  { %398 = vmatpush1.bf16.msra.mxu0 %v742_v23 }
  0x18   :  { %441 = vmatpush1.bf16.msra.mxu1 %v743_v24  ;;  %399 = vmatprep.subr.bf16.mxu0 %v744_v25 }
  0x19   :  { %442 = vmatprep.subr.bf16.mxu1 %v746_v26 }
  0x1b   :  { %400 = vmatpush1.bf16.msra.mxu0 %v748_v27 }
  0x1c   :  { %443 = vmatpush1.bf16.msra.mxu1 %v749_v28  ;;  %401 = vmatprep.subr.bf16.mxu0 %v750_v29 }
  0x1d   :  { %444 = vmatprep.subr.bf16.mxu1 %v752_v30 }
  0x1f   :  { %402 = vmatpush1.bf16.msra.mxu0 %v754_v31 }
  0x20   :  { %445 = vmatpush1.bf16.msra.mxu1 %v755_v32  ;;  %473 = vmatprep.subr.bf16.mxu0 %v759_v33 }
  0x21   :  { %684 = vmatprep.subr.bf16.mxu1 %v790_v37 }
  0x22   :  { %420 = vmatmul.mubr.bf16.vlgmr.msra.gmra.mrb[0].mxu0 %v917_v34 }
  0x23   :  { %463 = vmatmul.mubr.bf16.vlgmr.msra.gmra.mrb[0].mxu1 %v917_v34  ;;  %474 = vmatpush1.bf16.msra.mxu0 %v757_v35 }
  0x24   :  { %685 = vmatpush3.bf16.msra.mxu1 %v760_v36  ;;  %475 = vmatprep.subr.bf16.mxu0 %v763_v38 }
  0x25   :  { %686 = vmatprep.subr.bf16.mxu1 %v790_v37  ;;  %505 = vmatprep.mubr.bf16.mxu0 %v789_v1 }
  0x26   :  { %700 = vmatprep.mubr.msk.bf16.mxu1 %vm791_vm0, %v790_v37 }
  0x27   :  { %476 = vmatpush1.bf16.msra.mxu0 %v761_v39 }
  0x28   :  { %687 = vmatpush3.bf16.msra.mxu1 %v764_v40  ;;  %477 = vmatprep.subr.bf16.mxu0 %v767_v41 }
  0x29   :  { %688 = vmatprep.subr.bf16.mxu1 %v790_v37 }
  0x2b   :  { %478 = vmatpush1.bf16.msra.mxu0 %v765_v42 }
  0x2c   :  { %689 = vmatpush3.bf16.msra.mxu1 %v768_v43  ;;  %479 = vmatprep.subr.bf16.mxu0 %v771_v44 }
  0x2d   :  { %690 = vmatprep.subr.bf16.mxu1 %v790_v37 }
  0x2f   :  { %480 = vmatpush1.bf16.msra.mxu0 %v769_v47 }
  0x30   :  { %691 = vmatpush3.bf16.msra.mxu1 %v772_v48  ;;  %481 = vmatprep.subr.bf16.mxu0 %v775_v49 }
  0x31   :  { %692 = vmatprep.subr.bf16.mxu1 %v790_v37 }
  0x33   :  { %482 = vmatpush1.bf16.msra.mxu0 %v773_v50 }
  0x34   :  { %693 = vmatpush3.bf16.msra.mxu1 %v776_v51  ;;  %483 = vmatprep.subr.bf16.mxu0 %v779_v52 }
  0x35   :  { %694 = vmatprep.subr.bf16.mxu1 %v790_v37 }
  0x37   :  { %484 = vmatpush1.bf16.msra.mxu0 %v777_v53 }
  0x38   :  { %695 = vmatpush3.bf16.msra.mxu1 %v780_v54  ;;  %485 = vmatprep.subr.bf16.mxu0 %v783_v55 }
  0x39   :  { %696 = vmatprep.subr.bf16.mxu1 %v790_v37 }
  0x3b   :  { %486 = vmatpush1.bf16.msra.mxu0 %v781_v56 }
  0x3c   :  { %697 = vmatpush3.bf16.msra.mxu1 %v784_v57  ;;  %487 = vmatprep.subr.bf16.mxu0 %v787_v58 }
  0x3d   :  { %698 = vmatprep.subr.bf16.mxu1 %v790_v37 }
  0x3f   :  { %488 = vmatpush1.bf16.msra.mxu0 %v785_v59 }
  0x40   :  { %699 = vmatpush3.bf16.msra.mxu1 %v788_v60 }
  0x42   :  { %506 = vmatmul.mubr.bf16.vlgmr.msra.gmra.mrb[4].mxu0 %v917_v34 }
  0x43   :  { %701 = vmatmul.mubr.bf16.vlgmr.msra.gmra.mrb[4].mxu1 %v917_v34 }
  0x90   :  { %v86_v61 = vpop.permute.xlu0 %85 }
  0x94   :  { %v999_v62 = vpop.permute.xlu0 %90 }
  0xf5   :  { %v421_v63 = vpop.f32.mrb[0].mxu0 }
  0xf6   :  { %v464_v0 = vpop.f32.mrb[0].mxu1  ;;  %v422_v1 = vadd.f32 %v421_v63, %v86_v61  ;;  %v423_v3 = vpop.f32.mrb[1].mxu0 }
  0xf7   :  { %v465_v2 = vadd.f32 %v464_v0, %v86_v61  ;;  %v466_v4 = vpop.f32.mrb[1].mxu1  ;;  %v424_v5 = vadd.f32 %v423_v3, %v86_v61  ;;  %v425_v7 = vpop.f32.mrb[2].mxu0 }
  0xf8   :  { %v467_v6 = vadd.f32 %v466_v4, %v86_v61  ;;  %v468_v8 = vpop.f32.mrb[2].mxu1  ;;  %vm557_vm1 = vcmp.gt.f32.partialorder %v422_v1, 0.0  ;;  %v571_v9 = vmul.f32 0.01, %v422_v1  ;;  %v426_v15 = vadd.f32 %v425_v7, %v999_v62  ;;  %v427_v17 = vpop.f32.mrb[3].mxu0 }
  0xf9   :  { %vm559_vm2 = vcmp.gt.f32.partialorder %v465_v2, 0.0  ;;  %v573_v10 = vmul.f32 0.01, %v465_v2  ;;  %vm558_vm3 = vcmp.gt.f32.partialorder %v424_v5, 0.0  ;;  %v572_v11 = vmul.f32 0.01, %v424_v5 }
  0xfa   :  { %vm560_vm4 = vcmp.gt.f32.partialorder %v467_v6, 0.0  ;;  %v574_v12 = vmul.f32 0.01, %v467_v6  ;;  %v585_v13 = vsel %vm557_vm1, %v422_v1, %v571_v9  ;;  %v469_v16 = vadd.f32 %v468_v8, %v999_v62  ;;  %v470_v18 = vpop.f32.mrb[3].mxu1 }
  0xfb   :  { %v587_v14 = vsel %vm559_vm2, %v465_v2, %v573_v10  ;;  %599 = vst [vmem:[%s1055_s3] sm:$0xff] %v585_v13  ;;  %v586_v19 = vsel %vm558_vm3, %v424_v5, %v572_v11  ;;  %v428_v21 = vadd.f32 %v427_v17, %v999_v62  ;;  %v471_v22 = vadd.f32 %v470_v18, %v999_v62 }
  0xfc   :  { %601 = vst [vmem:[%s1055_s3 + $0x10] sm:$0xff] %v587_v14  ;;  %v588_v20 = vsel %vm560_vm4, %v467_v6, %v574_v12  ;;  %600 = vst [vmem:[%s1055_s3 + $0x8] sm:$0xff] %v586_v19  ;;  %vm564_vm5 = vcmp.gt.f32.partialorder %v426_v15, 0.0  ;;  %v578_v23 = vmul.f32 0.01, %v426_v15  ;;  %vm566_vm6 = vcmp.gt.f32.partialorder %v469_v16, 0.0 }
  0xfd   :  { %602 = vst [vmem:[%s1055_s3 + $0x18] sm:$0xff] %v588_v20  ;;  %v580_v24 = vmul.f32 0.01, %v469_v16  ;;  %vm565_vm7 = vcmp.gt.f32.partialorder %v428_v21, 0.0  ;;  %v579_v25 = vmul.f32 0.01, %v428_v21 }
  0xfe   :  { %vm567_vm8 = vcmp.gt.f32.partialorder %v471_v22, 0.0  ;;  %v581_v26 = vmul.f32 0.01, %v471_v22  ;;  %v592_v27 = vsel %vm564_vm5, %v426_v15, %v578_v23 }
  0xff   :  { %v594_v28 = vsel %vm566_vm6, %v469_v16, %v580_v24  ;;  %607 = vst [vmem:[%s1055_s3 + $0x38] sm:$0xff] %v592_v27  ;;  %v593_v29 = vsel %vm565_vm7, %v428_v21, %v579_v25 }
 0x100   :  { %609 = vst [vmem:[%s1055_s3 + $0x48] sm:$0xff] %v594_v28  ;;  %v595_v30 = vsel %vm567_vm8, %v471_v22, %v581_v26  ;;  %608 = vst [vmem:[%s1055_s3 + $0x40] sm:$0xff] %v593_v29 }
 0x101   :  { %610 = vst [vmem:[%s1055_s3 + $0x50] sm:$0xff] %v595_v30 }
 0x115   :  { %v507_v31 = vpop.f32.mrb[4].mxu0 }
 0x116   :  { %v550_v32 = vpop.f32.mrb[4].mxu1  ;;  %v508_v33 = vadd.f32 %v507_v31, %v86_v61  ;;  %v509_v35 = vpop.f32.mrb[5].mxu0 }
 0x117   :  { %v551_v34 = vadd.f32 %v550_v32, %v86_v61  ;;  %v702_v36 = vpop.f32.mrb[5].mxu1  ;;  %v510_v37 = vadd.f32 %v509_v35, %v86_v61  ;;  %v511_v38 = vpop.f32.mrb[6].mxu0 }
 0x118   :  { %v553_v39 = vpop.f32.mrb[6].mxu1  ;;  %vm561_vm10 = vcmp.gt.f32.partialorder %v508_v33, 0.0  ;;  %v575_v40 = vmul.f32 0.01, %v508_v33  ;;  %v512_v43 = vadd.f32 %v511_v38, %v999_v62  ;;  %v513_v45 = vpop.f32.mrb[7].mxu0 }
 0x119   :  { %vm563_vm11 = vcmp.gt.f32.partialorder %v551_v34, 0.0  ;;  %v577_v41 = vmul.f32 0.01, %v551_v34  ;;  %vm562_vm12 = vcmp.gt.f32.partialorder %v510_v37, 0.0  ;;  %v576_v42 = vmul.f32 0.01, %v510_v37 }
 0x11a   :  { %v554_v44 = vadd.f32 %v553_v39, %v999_v62  ;;  %v703_v46 = vpop.f32.mrb[7].mxu1  ;;  %v589_v47 = vsel %vm561_vm10, %v508_v33, %v575_v40  ;;  %v514_v49 = vadd.f32 %v513_v45, %v999_v62  ;;  %vm568_vm13 = vcmp.gt.f32.partialorder %v512_v43, 0.0 }
 0x11b   :  { %v591_v48 = vsel %vm563_vm11, %v551_v34, %v577_v41  ;;  %603 = vst [vmem:[%s1055_s3 + $0x20] sm:$0xff] %v589_v47  ;;  %v590_v50 = vsel %vm562_vm12, %v510_v37, %v576_v42  ;;  %v582_v51 = vmul.f32 0.01, %v512_v43 }
 0x11c   :  { %606 = vst.msk [vmem:[%s1055_s3 + $0x30] sm:$0xff] %vm605_vm9, %v591_v48  ;;  %vm570_vm14 = vcmp.gt.f32.partialorder %v554_v44, 0.0  ;;  %604 = vst [vmem:[%s1055_s3 + $0x28] sm:$0xff] %v590_v50  ;;  %v584_v52 = vmul.f32 0.01, %v554_v44  ;;  %vm569_vm15 = vcmp.gt.f32.partialorder %v514_v49, 0.0 }
 0x11d   :  { %v583_v53 = vmul.f32 0.01, %v514_v49  ;;  %v596_v54 = vsel %vm568_vm13, %v512_v43, %v582_v51 }
 0x11e   :  { %611 = vst [vmem:[%s1055_s3 + $0x58] sm:$0xff] %v596_v54  ;;  %v598_v55 = vsel %vm570_vm14, %v554_v44, %v584_v52 }
 0x11f   :  { %v597_v56 = vsel %vm569_vm15, %v514_v49, %v583_v53  ;;  %613 = vst.msk [vmem:[%s1055_s3 + $0x68] sm:$0xff] %vm605_vm9, %v598_v55 }
 0x120   :  { %612 = vst [vmem:[%s1055_s3 + $0x60] sm:$0xff] %v597_v56 }

// kernel: landsat2viirs_forward.10
= control target key start
LH: loop header
LB: loop body
LE: loop exit
PB: predicated region body
PF: predicated region fallthrough
CT: control target
= control target key end

     0   :  { %v350_v1 = vmov 0   ;;  %vm252_vm0 = vcmask 801792   ;;  %s459_s1 = inlined_call_operand.vmem [shape: bf16[256,98], index: 1, kind: input, shape index: {}]   ;;  %s460_s0 = inlined_call_operand.vmem [shape: bf16[32,256], index: 0, kind: input, shape index: {}]   ;;  %s461_s2 = inlined_call_operand.vmem [shape: f32[32,1], index: 2, kind: input, shape index: {}]   ;;  %s462_s3 = inlined_call_operand.vmem [shape: f32[32,98], index: 3, kind: output, shape index: {}]  }
   0x1   :  { %v328_v0 = vld [vmem:[%s459_s1 + $0x40] sm:$0xff]   ;;  %327 = vset.pattern.permute.xlu1 %v350_v1  ;;  %326 = vset.pattern.permute.xlu0 %v350_v1  ;;  %v330_v3 = vld [vmem:[%s459_s1 + $0x48] sm:$0xff]   ;;  %v332_v5 = vld [vmem:[%s459_s1 + $0x50] sm:$0xff]  }
   0x2   :  { %v329_v2 = vld [vmem:[%s459_s1] sm:$0xff]   ;;  %281 = vmatprep.subr.bf16.mxu0 %v328_v0  ;;  %309 = vmatprep.subr.bf16.mxu1 %v328_v0  ;;  %v331_v4 = vld [vmem:[%s459_s1 + $0x8] sm:$0xff]   ;;  %v333_v6 = vld [vmem:[%s459_s1 + $0x10] sm:$0xff]  }
   0x3   :  { %282 = vmatpush3.bf16.msra.mxu0 %v329_v2  ;;  %317 = vmatpush3.bf16.msra.mxu1 %v329_v2  ;;  %v334_v7 = vld [vmem:[%s459_s1 + $0x58] sm:$0xff]   ;;  %v336_v9 = vld [vmem:[%s459_s1 + $0x60] sm:$0xff]   ;;  %v338_v11 = vld [vmem:[%s459_s1 + $0x68] sm:$0xff]  }
   0x4   :  { %283 = vmatprep.subr.bf16.mxu0 %v330_v3  ;;  %310 = vmatprep.subr.bf16.mxu1 %v330_v3  ;;  %v335_v8 = vld [vmem:[%s459_s1 + $0x18] sm:$0xff]   ;;  %v337_v10 = vld [vmem:[%s459_s1 + $0x20] sm:$0xff]   ;;  %v339_v14 = vld [vmem:[%s459_s1 + $0x28] sm:$0xff]  }
   0x5   :  { %v346_v12 = vld [vmem:[%s460_s0 + $0x4] ss:$8 sps:$4 sm:$0xff]   ;;  %v349_v13 = vld [vmem:[%s460_s0 + $0x14] ss:$8 sps:$4 sm:$0xff]   ;;  %v344_v23 = vld [vmem:[%s460_s0] ss:$8 sps:$4 sm:$0xff]  }
   0x6   :  { %v53_v15 = vld [vmem:[%s461_s2 + $0x10] sm:$0xff]  ;;  %v51_v16 = vld [vmem:[%s461_s2] sm:$0xff]  ;;  %223 = vmatprep.mubr.bf16.mxu0 %v346_v12  ;;  %231 = vmatprep.mubr.bf16.mxu1 %v349_v13  ;;  %v54_v19 = vld [vmem:[%s461_s2 + $0x18] sm:$0xff] }
   0x7   :  { %284 = vmatpush3.bf16.msra.mxu0 %v331_v4  ;;  %318 = vmatpush3.bf16.msra.mxu1 %v331_v4  ;;  %v340_v17 = vld [vmem:[%s459_s1 + $0x70] sm:$0xff]   ;;  %v52_v20 = vld [vmem:[%s461_s2 + $0x8] sm:$0xff]  ;;  %v342_v21 = vld [vmem:[%s459_s1 + $0x78] sm:$0xff]  }
   0x8   :  { %285 = vmatprep.subr.bf16.mxu0 %v332_v5  ;;  %311 = vmatprep.subr.bf16.mxu1 %v332_v5  ;;  %v341_v18 = vld [vmem:[%s459_s1 + $0x30] sm:$0xff]   ;;  %v343_v22 = vld [vmem:[%s459_s1 + $0x38] sm:$0xff]  }
   0x9   :  { %67 = vperm.xlu1 %327, %v53_v15   ;;  %57 = vperm.xlu0 %326, %v51_v16   ;;  %v347_v24 = vld [vmem:[%s460_s0 + $0x10] ss:$8 sps:$4 sm:$0xff]  }
   0xb   :  { %286 = vmatpush3.bf16.msra.mxu0 %v333_v6  ;;  %319 = vmatpush3.bf16.msra.mxu1 %v333_v6 }
   0xc   :  { %287 = vmatprep.subr.bf16.mxu0 %v334_v7  ;;  %312 = vmatprep.subr.bf16.mxu1 %v334_v7 }
   0xd   :  { %72 = vperm.xlu1 %327, %v54_v19   ;;  %62 = vperm.xlu0 %326, %v52_v20  }
   0xf   :  { %288 = vmatpush3.bf16.msra.mxu0 %v335_v8  ;;  %320 = vmatpush3.bf16.msra.mxu1 %v335_v8 }
  0x10   :  { %289 = vmatprep.subr.bf16.mxu0 %v336_v9  ;;  %313 = vmatprep.subr.bf16.mxu1 %v336_v9 }
  0x13   :  { %290 = vmatpush3.bf16.msra.mxu0 %v337_v10  ;;  %321 = vmatpush3.bf16.msra.mxu1 %v337_v10 }
  0x14   :  { %291 = vmatprep.subr.bf16.mxu0 %v338_v11  ;;  %314 = vmatprep.subr.bf16.mxu1 %v338_v11 }
  0x17   :  { %292 = vmatpush3.bf16.msra.mxu0 %v339_v14  ;;  %322 = vmatpush3.bf16.msra.mxu1 %v339_v14 }
  0x18   :  { %293 = vmatprep.subr.bf16.mxu0 %v340_v17  ;;  %315 = vmatprep.subr.bf16.mxu1 %v340_v17 }
  0x1b   :  { %294 = vmatpush3.bf16.msra.mxu0 %v341_v18  ;;  %323 = vmatpush3.bf16.msra.mxu1 %v341_v18 }
  0x1c   :  { %295 = vmatprep.subr.bf16.mxu0 %v342_v21  ;;  %316 = vmatprep.subr.bf16.mxu1 %v342_v21 }
  0x1f   :  { %296 = vmatpush3.bf16.msra.mxu0 %v343_v22  ;;  %324 = vmatpush3.bf16.msra.mxu1 %v343_v22 }
  0x22   :  { %224 = vmatmul.mubr.bf16.vlgmr.msra.gmra.mrb[0].mxu0 %v344_v23  ;;  %232 = vmatmul.mubr.bf16.vlgmr.msra.gmra.mrb[0].mxu1 %v347_v24 }
  0x88   :  { %v68_v25 = vpop.permute.xlu1 %67  ;;  %v58_v26 = vpop.permute.xlu0 %57 }
  0x8c   :  { %v73_v41 = vpop.permute.xlu1 %72  ;;  %v63_v42 = vpop.permute.xlu0 %62 }
  0xf5   :  { %v297_v27 = vpop.f32.mrb[0].mxu0  ;;  %v303_v28 = vpop.f32.mrb[0].mxu1 }
  0xf6   :  { %v298_v29 = vpop.f32.mrb[1].mxu0  ;;  %v304_v30 = vpop.f32.mrb[1].mxu1 }
  0xf7   :  { %v299_v31 = vadd.f32 %v298_v29, %v297_v27  ;;  %v305_v32 = vadd.f32 %v304_v30, %v303_v28  ;;  %v300_v33 = vpop.f32.mrb[2].mxu0  ;;  %v306_v34 = vpop.f32.mrb[2].mxu1 }
  0xf8   :  { %v301_v35 = vpop.f32.mrb[3].mxu0  ;;  %v307_v36 = vpop.f32.mrb[3].mxu1 }
  0xf9   :  { %v226_v37 = vadd.f32 %v299_v31, %v58_v26  ;;  %v234_v38 = vadd.f32 %v305_v32, %v68_v25  ;;  %v302_v39 = vadd.f32 %v301_v35, %v300_v33  ;;  %v308_v40 = vadd.f32 %v307_v36, %v306_v34 }
  0xfb   :  { %vm240_vm1 = vcmp.gt.f32.partialorder %v226_v37, 0.0  ;;  %v244_v43 = vmul.f32 0.01, %v226_v37  ;;  %vm242_vm2 = vcmp.gt.f32.partialorder %v234_v38, 0.0  ;;  %v246_v44 = vmul.f32 0.01, %v234_v38 }
  0xfc   :  { %v229_v45 = vadd.f32 %v302_v39, %v63_v42  ;;  %v237_v46 = vadd.f32 %v308_v40, %v73_v41 }
  0xfd   :  { %v248_v47 = vsel %vm240_vm1, %v226_v37, %v244_v43  ;;  %v250_v48 = vsel %vm242_vm2, %v234_v38, %v246_v44 }
  0xfe   :  { %253 = vst.msk [vmem:[%s462_s3] sm:$0xff] %vm252_vm0, %v248_v47  ;;  %255 = vst.msk [vmem:[%s462_s3 + $0x10] sm:$0xff] %vm252_vm0, %v250_v48  ;;  %vm241_vm3 = vcmp.gt.f32.partialorder %v229_v45, 0.0  ;;  %v245_v49 = vmul.f32 0.01, %v229_v45  ;;  %vm243_vm4 = vcmp.gt.f32.partialorder %v237_v46, 0.0 }
  0xff   :  { %v247_v50 = vmul.f32 0.01, %v237_v46 }
 0x100   :  { %v249_v51 = vsel %vm241_vm3, %v229_v45, %v245_v49 }
 0x101   :  { %v251_v52 = vsel %vm243_vm4, %v237_v46, %v247_v50  ;;  %254 = vst.msk [vmem:[%s462_s3 + $0x8] sm:$0xff] %vm252_vm0, %v249_v51 }
 0x102   :  { %256 = vst.msk [vmem:[%s462_s3 + $0x18] sm:$0xff] %vm252_vm0, %v251_v52 }

// kernel: landsat2viirs_forward.12
= control target key start
LH: loop header
LB: loop body
LE: loop exit
PB: predicated region body
PF: predicated region fallthrough
CT: control target
= control target key end

     0   :  { %vm152_vm0 = vcmask 523264   ;;  %v1176_v3 = vmov 0   ;;  %vm836_vm1 = vcmask 15360   ;;  %s1681_s0 = inlined_call_operand.vmem [shape: f32[64,2], index: 0, kind: input, shape index: {}]   ;;  %s1682_s1 = inlined_call_operand.vmem [shape: f32[128,64], index: 1, kind: input, shape index: {}]   ;;  %s1683_s2 = inlined_call_operand.vmem [shape: f32[128,1], index: 2, kind: input, shape index: {}]   ;;  %s1684_s4 = inlined_call_operand.vmem [shape: f32[128,1], index: 4, kind: input, shape index: {}]   ;;  %s1685_s7 = inlined_call_operand.vmem [shape: f32[64,1], index: 7, kind: input, shape index: {}]   ;;  %s1686_s3 = inlined_call_operand.vmem [shape: f32[128,128], index: 3, kind: input, shape index: {}]   ;;  %s1687_s6 = inlined_call_operand.vmem [shape: f32[64,64], index: 6, kind: input, shape index: {}]   ;;  %s1688_s8 = inlined_call_operand.vmem [shape: f32[64,2], index: 8, kind: output, shape index: {0}]   ;;  %s1689_s9 = inlined_call_operand.vmem [shape: f32[64,2], index: 9, kind: output, shape index: {1}]   ;;  %s1690_s5 = inlined_call_operand.vmem [shape: f32[64,2], index: 5, kind: input, shape index: {}]   ;;  %s1691_s10 = inlined_call_operand.vmem [shape: f32[64,2], index: 10, kind: output, shape index: {2}]  }
   0x1   :  { %v48_v0 = vld [vmem:[%s1681_s0] sm:$0xff]  ;;  %v49_v1 = vld [vmem:[%s1681_s0 + $0x8] sm:$0xff]  ;;  %v50_v2 = vld [vmem:[%s1681_s0 + $0x10] sm:$0xff]  ;;  %1158 = vset.pattern.permute.xlu0 %v1176_v3  ;;  %1159 = vset.pattern.permute.xlu1 %v1176_v3 }
   0x2   :  { %v1093_v4 = vpack.c.bf16 %v49_v1, %v48_v0  ;;  %v51_v5 = vld [vmem:[%s1681_s0 + $0x18] sm:$0xff]  ;;  %v52_v7 = vld [vmem:[%s1681_s0 + $0x20] sm:$0xff]  ;;  %v53_v8 = vld [vmem:[%s1681_s0 + $0x28] sm:$0xff] }
   0x3   :  { %v1097_v6 = vpack.c.bf16 %v51_v5, %v50_v2  ;;  %v32_v9 = vld [vmem:[%s1682_s1] sm:$0xff]  ;;  %v1101_v11 = vpack.c.bf16 %v53_v8, %v52_v7  ;;  %v58_v12 = vld [vmem:[%s1683_s2 + $0x10] sm:$0xff]  ;;  %v55_v14 = vld [vmem:[%s1681_s0 + $0x38] sm:$0xff] }
   0x4   :  { %1094 = vmatprep.subr.bf16.mxu0 %v1093_v4  ;;  %985 = vmatprep.mubr.msk.f32.mxu0 %vm152_vm0, %v32_v9  ;;  %v56_v10 = vld [vmem:[%s1683_s2] sm:$0xff]  ;;  %v54_v13 = vld [vmem:[%s1681_s0 + $0x30] sm:$0xff]  ;;  %v57_v15 = vld [vmem:[%s1683_s2 + $0x8] sm:$0xff] }
   0x5   :  { %1096 = vmatpush3.bf16.msra.mxu0 %v1093_v4  ;;  %74 = vperm.xlu0 %1158, %v56_v10   ;;  %v59_v16 = vld [vmem:[%s1683_s2 + $0x18] sm:$0xff]  ;;  %v1105_v17 = vpack.c.bf16 %v55_v14, %v54_v13  ;;  %v60_v18 = vld [vmem:[%s1683_s2 + $0x20] sm:$0xff]  ;;  %v61_v19 = vld [vmem:[%s1683_s2 + $0x28] sm:$0xff] }
   0x6   :  { %1098 = vmatprep.subr.bf16.mxu0 %v1097_v6  ;;  %84 = vperm.xlu1 %1159, %v58_v12   ;;  %v62_v20 = vld [vmem:[%s1683_s2 + $0x30] sm:$0xff]  ;;  %v63_v21 = vld [vmem:[%s1683_s2 + $0x38] sm:$0xff]  ;;  %v33_v22 = vld [vmem:[%s1682_s1 + $0x8] sm:$0xff] }
   0x7   :  { %v34_v23 = vld [vmem:[%s1682_s1 + $0x10] sm:$0xff]  ;;  %v64_v24 = vld [vmem:[%s1683_s2 + $0x40] sm:$0xff]  ;;  %v65_v25 = vld [vmem:[%s1683_s2 + $0x48] sm:$0xff] }
   0x8   :  { %v35_v26 = vld [vmem:[%s1682_s1 + $0x18] sm:$0xff]  ;;  %v36_v27 = vld [vmem:[%s1682_s1 + $0x20] sm:$0xff]  ;;  %v66_v28 = vld [vmem:[%s1683_s2 + $0x50] sm:$0xff] }
   0x9   :  { %1100 = vmatpush3.bf16.msra.mxu0 %v1097_v6  ;;  %79 = vperm.xlu0 %1158, %v57_v15   ;;  %v67_v29 = vld [vmem:[%s1683_s2 + $0x58] sm:$0xff]  ;;  %v37_v30 = vld [vmem:[%s1682_s1 + $0x28] sm:$0xff]  ;;  %v38_v31 = vld [vmem:[%s1682_s1 + $0x30] sm:$0xff] }
   0xa   :  { %1102 = vmatprep.subr.bf16.mxu0 %v1101_v11  ;;  %89 = vperm.xlu1 %1159, %v59_v16   ;;  %v68_v32 = vld [vmem:[%s1683_s2 + $0x60] sm:$0xff]  ;;  %v69_v33 = vld [vmem:[%s1683_s2 + $0x68] sm:$0xff]  ;;  %v39_v34 = vld [vmem:[%s1682_s1 + $0x38] sm:$0xff] }
   0xb   :  { %v40_v35 = vld [vmem:[%s1682_s1 + $0x40] sm:$0xff]  ;;  %v70_v36 = vld [vmem:[%s1683_s2 + $0x70] sm:$0xff]  ;;  %v71_v37 = vld [vmem:[%s1683_s2 + $0x78] sm:$0xff] }
   0xc   :  { %v41_v38 = vld [vmem:[%s1682_s1 + $0x48] sm:$0xff]  ;;  %v42_v39 = vld [vmem:[%s1682_s1 + $0x50] sm:$0xff]  ;;  %v370_v40 = vld [vmem:[%s1684_s4 + $0x40] sm:$0xff] }
   0xd   :  { %1104 = vmatpush3.bf16.msra.mxu0 %v1101_v11  ;;  %94 = vperm.xlu0 %1158, %v60_v18   ;;  %v371_v41 = vld [vmem:[%s1684_s4 + $0x48] sm:$0xff]  ;;  %v43_v42 = vld [vmem:[%s1682_s1 + $0x58] sm:$0xff]  ;;  %v44_v43 = vld [vmem:[%s1682_s1 + $0x60] sm:$0xff] }
   0xe   :  { %1106 = vmatprep.subr.bf16.mxu0 %v1105_v17  ;;  %99 = vperm.xlu1 %1159, %v61_v19   ;;  %v372_v44 = vld [vmem:[%s1684_s4 + $0x50] sm:$0xff]  ;;  %v373_v45 = vld [vmem:[%s1684_s4 + $0x58] sm:$0xff]  ;;  %v45_v46 = vld [vmem:[%s1682_s1 + $0x68] sm:$0xff] }
   0xf   :  { %v46_v47 = vld [vmem:[%s1682_s1 + $0x70] sm:$0xff]  ;;  %v374_v48 = vld [vmem:[%s1684_s4 + $0x60] sm:$0xff]  ;;  %v375_v49 = vld [vmem:[%s1684_s4 + $0x68] sm:$0xff] }
  0x10   :  { %v47_v50 = vld [vmem:[%s1682_s1 + $0x78] sm:$0xff]  ;;  %v376_v51 = vld [vmem:[%s1684_s4 + $0x70] sm:$0xff]  ;;  %v362_v53 = vld [vmem:[%s1684_s4] sm:$0xff] }
  0x11   :  { %1108 = vmatpush3.bf16.msra.mxu0 %v1105_v17  ;;  %104 = vperm.xlu0 %1158, %v62_v20   ;;  %v377_v52 = vld [vmem:[%s1684_s4 + $0x78] sm:$0xff]  ;;  %v363_v54 = vld [vmem:[%s1684_s4 + $0x8] sm:$0xff]  ;;  %v364_v55 = vld [vmem:[%s1684_s4 + $0x10] sm:$0xff] }
  0x12   :  { %109 = vperm.xlu1 %1159, %v63_v21   ;;  %v365_v56 = vld [vmem:[%s1684_s4 + $0x18] sm:$0xff]  ;;  %v366_v57 = vld [vmem:[%s1684_s4 + $0x20] sm:$0xff]  ;;  %v367_v58 = vld [vmem:[%s1684_s4 + $0x28] sm:$0xff] }
  0x13   :  { %v368_v59 = vld [vmem:[%s1684_s4 + $0x30] sm:$0xff]  ;;  %v369_v60 = vld [vmem:[%s1684_s4 + $0x38] sm:$0xff]  ;;  %v659_v61 = vld [vmem:[%s1685_s7] sm:$0xff] }
  0x14   :  { %986 = vmatmul.mubr.msk.f32.vlgmr.msra.gmra.mrb[0].mxu0 %vm152_vm0, %v33_v22  ;;  %v660_v62 = vld [vmem:[%s1685_s7 + $0x8] sm:$0xff]  ;;  %v661_v63 = vld [vmem:[%s1685_s7 + $0x10] sm:$0xff]  ;;  %v662_v0 = vld [vmem:[%s1685_s7 + $0x18] sm:$0xff] }
  0x15   :  { %988 = vmatprep.mubr.msk.f32.mxu0 %vm152_vm0, %v34_v23  ;;  %114 = vperm.xlu0 %1158, %v64_v24   ;;  %v663_v1 = vld [vmem:[%s1685_s7 + $0x20] sm:$0xff]  ;;  %v664_v2 = vld [vmem:[%s1685_s7 + $0x28] sm:$0xff]  ;;  %v665_v3 = vld [vmem:[%s1685_s7 + $0x30] sm:$0xff] }
  0x16   :  { %119 = vperm.xlu1 %1159, %v65_v25   ;;  %v666_v4 = vld [vmem:[%s1685_s7 + $0x38] sm:$0xff]  ;;  %v346_v5 = vld [vmem:[%s1686_s3] sm:$0xff] }
  0x17   :  { %1041 = vmatprep.mubr.f32.mxu1 %v346_v5  ;;  %v354_v5 = vld [vmem:[%s1686_s3 + $0x40] sm:$0xff] }
  0x18   :  { %989 = vmatmul.mubr.msk.f32.gmra.mrb[2].mxu0 %vm152_vm0, %v35_v26 }
  0x19   :  { %991 = vmatprep.mubr.msk.f32.mxu0 %vm152_vm0, %v36_v27  ;;  %124 = vperm.xlu0 %1158, %v66_v28  }
  0x1a   :  { %129 = vperm.xlu1 %1159, %v67_v29  }
  0x1c   :  { %992 = vmatmul.mubr.msk.f32.gmra.mrb[4].mxu0 %vm152_vm0, %v37_v30 }
  0x1d   :  { %994 = vmatprep.mubr.msk.f32.mxu0 %vm152_vm0, %v38_v31  ;;  %134 = vperm.xlu0 %1158, %v68_v32  }
  0x1e   :  { %139 = vperm.xlu1 %1159, %v69_v33  }
  0x20   :  { %995 = vmatmul.mubr.msk.f32.gmra.mrb[6].mxu0 %vm152_vm0, %v39_v34 }
  0x21   :  { %997 = vmatprep.mubr.msk.f32.mxu0 %vm152_vm0, %v40_v35  ;;  %144 = vperm.xlu0 %1158, %v70_v36  }
  0x22   :  { %149 = vperm.xlu1 %1159, %v71_v37  }
  0x24   :  { %998 = vmatmul.mubr.msk.f32.gmra.mrb[8].mxu0 %vm152_vm0, %v41_v38 }
  0x25   :  { %1000 = vmatprep.mubr.msk.f32.mxu0 %vm152_vm0, %v42_v39  ;;  %420 = vperm.xlu0 %1158, %v370_v40  }
  0x26   :  { %425 = vperm.xlu1 %1159, %v371_v41  }
  0x28   :  { %1001 = vmatmul.mubr.msk.f32.gmra.mrb[10].mxu0 %vm152_vm0, %v43_v42 }
  0x29   :  { %1003 = vmatprep.mubr.msk.f32.mxu0 %vm152_vm0, %v44_v43  ;;  %430 = vperm.xlu0 %1158, %v372_v44  }
  0x2a   :  { %435 = vperm.xlu1 %1159, %v373_v45  }
  0x2c   :  { %1004 = vmatmul.mubr.msk.f32.gmra.mrb[12].mxu0 %vm152_vm0, %v45_v46 }
  0x2d   :  { %1006 = vmatprep.mubr.msk.f32.mxu0 %vm152_vm0, %v46_v47  ;;  %440 = vperm.xlu0 %1158, %v374_v48  }
  0x2e   :  { %445 = vperm.xlu1 %1159, %v375_v49  }
  0x30   :  { %1007 = vmatmul.mubr.msk.f32.gmra.mrb[14].mxu0 %vm152_vm0, %v47_v50 }
  0x31   :  { %450 = vperm.xlu0 %1158, %v376_v51  }
  0x32   :  { %455 = vperm.xlu1 %1159, %v377_v52  }
  0x35   :  { %380 = vperm.xlu0 %1158, %v362_v53  }
  0x36   :  { %385 = vperm.xlu1 %1159, %v363_v54  }
  0x39   :  { %390 = vperm.xlu0 %1158, %v364_v55  }
  0x3a   :  { %395 = vperm.xlu1 %1159, %v365_v56  }
  0x3d   :  { %400 = vperm.xlu0 %1158, %v366_v57  }
  0x3e   :  { %405 = vperm.xlu1 %1159, %v367_v58  }
  0x41   :  { %410 = vperm.xlu0 %1158, %v368_v59  }
  0x42   :  { %415 = vperm.xlu1 %1159, %v369_v60  }
  0x45   :  { %669 = vperm.xlu0 %1158, %v659_v61  }
  0x46   :  { %674 = vperm.xlu1 %1159, %v660_v62   ;;  %v347_v62 = vld [vmem:[%s1686_s3 + $0x8] sm:$0xff] }
  0x49   :  { %679 = vperm.xlu0 %1158, %v661_v63   ;;  %v348_v63 = vld [vmem:[%s1686_s3 + $0x10] sm:$0xff] }
  0x4a   :  { %684 = vperm.xlu1 %1159, %v662_v0   ;;  %v349_v0 = vld [vmem:[%s1686_s3 + $0x18] sm:$0xff] }
  0x4d   :  { %689 = vperm.xlu0 %1158, %v663_v1   ;;  %v350_v1 = vld [vmem:[%s1686_s3 + $0x20] sm:$0xff] }
  0x4e   :  { %694 = vperm.xlu1 %1159, %v664_v2   ;;  %v351_v2 = vld [vmem:[%s1686_s3 + $0x28] sm:$0xff] }
  0x51   :  { %699 = vperm.xlu0 %1158, %v665_v3   ;;  %v352_v3 = vld [vmem:[%s1686_s3 + $0x30] sm:$0xff] }
  0x52   :  { %704 = vperm.xlu1 %1159, %v666_v4   ;;  %v353_v4 = vld [vmem:[%s1686_s3 + $0x38] sm:$0xff] }
  0x84   :  { %v75_v7 = vpop.permute.xlu0 %74 }
  0x85   :  { %v85_v6 = vpop.permute.xlu1 %84 }
  0x88   :  { %v80_v9 = vpop.permute.xlu0 %79 }
  0x89   :  { %v90_v8 = vpop.permute.xlu1 %89 }
  0x8c   :  { %v95_v11 = vpop.permute.xlu0 %94 }
  0x8d   :  { %v100_v10 = vpop.permute.xlu1 %99 }
  0x90   :  { %v105_v19 = vpop.permute.xlu0 %104 }
  0x91   :  { %v110_v16 = vpop.permute.xlu1 %109 }
  0x94   :  { %v115_v29 = vpop.permute.xlu0 %114 }
  0x95   :  { %v120_v27 = vpop.permute.xlu1 %119 }
  0x98   :  { %v125_v38 = vpop.permute.xlu0 %124 }
  0x99   :  { %v130_v35 = vpop.permute.xlu1 %129 }
  0x9c   :  { %v135_v48 = vpop.permute.xlu0 %134 }
  0x9d   :  { %v140_v46 = vpop.permute.xlu1 %139 }
  0xa0   :  { %v145_v57 = vpop.permute.xlu0 %144 }
  0xa1   :  { %v150_v54 = vpop.permute.xlu1 %149 }
  0xe7   :  { %v987_v12 = vpop.f32.mrb[0].mxu0 }
  0xe8   :  { %v273_v13 = vadd.f32 %v987_v12, %v80_v9  ;;  %v267_v14 = vpop.f32.mrb[1].mxu0  ;;  %v358_v9 = vld [vmem:[%s1686_s3 + $0x60] sm:$0xff]  ;;  %v361_v12 = vld [vmem:[%s1686_s3 + $0x78] sm:$0xff] }
  0xe9   :  { %v268_v15 = vadd.f32 %v267_v14, %v75_v7  ;;  %v356_v7 = vld [vmem:[%s1686_s3 + $0x50] sm:$0xff]  ;;  %v426_v14 = vpop.permute.xlu1 %425 }
  0xeb   :  { %v990_v17 = vpop.f32.mrb[2].mxu0  ;;  %v1109_v18 = vpack.c.bf16 %v273_v13, %v268_v15  ;;  %v651_v13 = vld [vmem:[%s1687_s6] sm:$0xff]  ;;  %v421_v15 = vpop.permute.xlu0 %420 }
  0xec   :  { %v283_v20 = vadd.f32 %v990_v17, %v90_v8  ;;  %v277_v21 = vpop.f32.mrb[3].mxu0  ;;  %v357_v8 = vld [vmem:[%s1686_s3 + $0x58] sm:$0xff]  ;;  %1081 = vmatprep.mubr.msk.f32.mxu0 %vm152_vm0, %v651_v13  ;;  %v627_v13 = vld [vmem:[%s1690_s5] sm:$0xff] }
  0xed   :  { %v278_v22 = vadd.f32 %v277_v21, %v85_v6  ;;  %1110 = vmatprep.subr.bf16.mxu1 %v1109_v18  ;;  %v355_v6 = vld [vmem:[%s1686_s3 + $0x48] sm:$0xff] }
  0xee   :  { %1112 = vmatpush3.bf16.msra.mxu1 %v1109_v18 }
  0xef   :  { %v1113_v23 = vpack.c.bf16 %v283_v20, %v278_v22  ;;  %v993_v24 = vpop.f32.mrb[4].mxu0  ;;  %v431_v17 = vpop.permute.xlu0 %430 }
  0xf0   :  { %v293_v25 = vadd.f32 %v993_v24, %v100_v10  ;;  %v287_v26 = vpop.f32.mrb[5].mxu0  ;;  %v359_v10 = vld [vmem:[%s1686_s3 + $0x68] sm:$0xff] }
  0xf1   :  { %v288_v28 = vadd.f32 %v287_v26, %v95_v11  ;;  %1114 = vmatprep.subr.bf16.mxu1 %v1113_v23  ;;  %v360_v11 = vld [vmem:[%s1686_s3 + $0x70] sm:$0xff] }
  0xf2   :  { %1116 = vmatpush3.bf16.msra.mxu1 %v1113_v23 }
  0xf3   :  { %v1117_v30 = vpack.c.bf16 %v293_v25, %v288_v28  ;;  %v996_v31 = vpop.f32.mrb[6].mxu0 }
  0xf4   :  { %v303_v32 = vadd.f32 %v996_v31, %v110_v16  ;;  %v297_v33 = vpop.f32.mrb[7].mxu0  ;;  %v436_v16 = vpop.permute.xlu1 %435 }
  0xf5   :  { %v298_v34 = vadd.f32 %v297_v33, %v105_v19  ;;  %1118 = vmatprep.subr.bf16.mxu1 %v1117_v30  ;;  %v1492_v19 = vpop.permute.xlu0 %440 }
  0xf6   :  { %1120 = vmatpush3.bf16.msra.mxu1 %v1117_v30 }
  0xf7   :  { %v1121_v36 = vpack.c.bf16 %v303_v32, %v298_v34  ;;  %v999_v37 = vpop.f32.mrb[8].mxu0 }
  0xf8   :  { %v313_v39 = vadd.f32 %v999_v37, %v120_v27  ;;  %v307_v40 = vpop.f32.mrb[9].mxu0  ;;  %v446_v18 = vpop.permute.xlu1 %445 }
  0xf9   :  { %v308_v41 = vadd.f32 %v307_v40, %v115_v29  ;;  %1122 = vmatprep.subr.bf16.mxu1 %v1121_v36  ;;  %v1496_v21 = vpop.permute.xlu0 %450 }
  0xfa   :  { %1124 = vmatpush3.bf16.msra.mxu1 %v1121_v36 }
  0xfb   :  { %v1125_v42 = vpack.c.bf16 %v313_v39, %v308_v41  ;;  %v1002_v43 = vpop.f32.mrb[10].mxu0 }
  0xfc   :  { %v323_v44 = vadd.f32 %v1002_v43, %v130_v35  ;;  %v317_v45 = vpop.f32.mrb[11].mxu0  ;;  %v1494_v20 = vpop.permute.xlu1 %455 }
  0xfd   :  { %v318_v47 = vadd.f32 %v317_v45, %v125_v38  ;;  %1126 = vmatprep.subr.bf16.mxu1 %v1125_v42  ;;  %v381_v23 = vpop.permute.xlu0 %380 }
  0xfe   :  { %1128 = vmatpush3.bf16.msra.mxu1 %v1125_v42 }
  0xff   :  { %v1129_v49 = vpack.c.bf16 %v323_v44, %v318_v47  ;;  %v1005_v50 = vpop.f32.mrb[12].mxu0 }
 0x100   :  { %v333_v51 = vadd.f32 %v1005_v50, %v140_v46  ;;  %v327_v52 = vpop.f32.mrb[13].mxu0  ;;  %v386_v22 = vpop.permute.xlu1 %385 }
 0x101   :  { %v328_v53 = vadd.f32 %v327_v52, %v135_v48  ;;  %1130 = vmatprep.subr.bf16.mxu1 %v1129_v49  ;;  %v391_v26 = vpop.permute.xlu0 %390 }
 0x102   :  { %1132 = vmatpush3.bf16.msra.mxu1 %v1129_v49 }
 0x103   :  { %v1133_v55 = vpack.c.bf16 %v333_v51, %v328_v53  ;;  %v1008_v56 = vpop.f32.mrb[14].mxu0 }
 0x104   :  { %v343_v58 = vadd.f32 %v1008_v56, %v150_v54  ;;  %v337_v59 = vpop.f32.mrb[15].mxu0  ;;  %v396_v24 = vpop.permute.xlu1 %395 }
 0x105   :  { %v338_v60 = vadd.f32 %v337_v59, %v145_v57  ;;  %1134 = vmatprep.subr.bf16.mxu1 %v1133_v55  ;;  %v401_v35 = vpop.permute.xlu0 %400 }
 0x106   :  { %1136 = vmatpush3.bf16.msra.mxu1 %v1133_v55 }
 0x107   :  { %v1137_v61 = vpack.c.bf16 %v343_v58, %v338_v60 }
 0x108   :  { %v406_v33 = vpop.permute.xlu1 %405 }
 0x109   :  { %1138 = vmatprep.subr.bf16.mxu1 %v1137_v61  ;;  %v411_v42 = vpop.permute.xlu0 %410 }
 0x10a   :  { %1140 = vmatpush3.bf16.msra.mxu1 %v1137_v61 }
 0x10c   :  { %v416_v40 = vpop.permute.xlu1 %415 }
 0x10d   :  { %1042 = vmatmul.mubr.f32.vlgmr.msra.gmra.mrb[0].mxu1 %v347_v62 }
 0x10e   :  { %1044 = vmatprep.mubr.f32.mxu1 %v348_v63 }
 0x111   :  { %1045 = vmatmul.mubr.f32.gmra.mrb[2].mxu1 %v349_v0 }
 0x112   :  { %1047 = vmatprep.mubr.f32.mxu1 %v350_v1 }
 0x115   :  { %1048 = vmatmul.mubr.f32.gmra.mrb[4].mxu1 %v351_v2 }
 0x116   :  { %1050 = vmatprep.mubr.f32.mxu1 %v352_v3 }
 0x119   :  { %1051 = vmatmul.mubr.f32.gmra.mrb[6].mxu1 %v353_v4 }
 0x11a   :  { %1053 = vmatprep.mubr.f32.mxu1 %v354_v5 }
 0x11d   :  { %1054 = vmatmul.mubr.f32.gmra.mrb[8].mxu1 %v355_v6 }
 0x11e   :  { %1056 = vmatprep.mubr.f32.mxu1 %v356_v7 }
 0x121   :  { %1057 = vmatmul.mubr.f32.gmra.mrb[10].mxu1 %v357_v8 }
 0x122   :  { %1059 = vmatprep.mubr.f32.mxu1 %v358_v9 }
 0x125   :  { %1060 = vmatmul.mubr.f32.gmra.mrb[12].mxu1 %v359_v10 }
 0x126   :  { %1062 = vmatprep.mubr.f32.mxu1 %v360_v11  ;;  %v628_v11 = vld [vmem:[%s1690_s5 + $0x8] sm:$0xff] }
 0x129   :  { %1063 = vmatmul.mubr.f32.gmra.mrb[14].mxu1 %v361_v12 }
 0x1e0   :  { %v1043_v25 = vpop.f32.mrb[0].mxu1 }
 0x1e1   :  { %v1498_v27 = vadd.f32 %v1043_v25, %v386_v22  ;;  %v524_v28 = vpop.f32.mrb[1].mxu1  ;;  %v629_v22 = vld [vmem:[%s1690_s5 + $0x10] sm:$0xff] }
 0x1e2   :  { %v1500_v29 = vadd.f32 %v524_v28, %v381_v23 }
 0x1e3   :  { %838 = vst.msk [vmem:[%s1688_s8 + $0x8] sm:$0xff] %vm836_vm1, %v1498_v27 }
 0x1e4   :  { %837 = vst.msk [vmem:[%s1688_s8] sm:$0xff] %vm836_vm1, %v1500_v29  ;;  %v1046_v30 = vpop.f32.mrb[2].mxu1 }
 0x1e5   :  { %v1512_v31 = vadd.f32 %v1046_v30, %v396_v24  ;;  %v534_v32 = vpop.f32.mrb[3].mxu1 }
 0x1e6   :  { %v1514_v34 = vadd.f32 %v534_v32, %v391_v26  ;;  %v632_v32 = vld [vmem:[%s1690_s5 + $0x28] sm:$0xff] }
 0x1e7   :  { %840 = vst.msk [vmem:[%s1688_s8 + $0x18] sm:$0xff] %vm836_vm1, %v1512_v31 }
 0x1e8   :  { %839 = vst.msk [vmem:[%s1688_s8 + $0x10] sm:$0xff] %vm836_vm1, %v1514_v34  ;;  %v1049_v36 = vpop.f32.mrb[4].mxu1 }
 0x1e9   :  { %v1526_v37 = vadd.f32 %v1049_v36, %v406_v33  ;;  %v544_v38 = vpop.f32.mrb[5].mxu1 }
 0x1ea   :  { %v1528_v39 = vadd.f32 %v544_v38, %v401_v35 }
 0x1eb   :  { %842 = vst.msk [vmem:[%s1688_s8 + $0x28] sm:$0xff] %vm836_vm1, %v1526_v37 }
 0x1ec   :  { %841 = vst.msk [vmem:[%s1688_s8 + $0x20] sm:$0xff] %vm836_vm1, %v1528_v39  ;;  %v1052_v41 = vpop.f32.mrb[6].mxu1 }
 0x1ed   :  { %v1540_v43 = vadd.f32 %v1052_v41, %v416_v40  ;;  %v554_v44 = vpop.f32.mrb[7].mxu1 }
 0x1ee   :  { %v1542_v45 = vadd.f32 %v554_v44, %v411_v42  ;;  %v634_v42 = vld [vmem:[%s1690_s5 + $0x38] sm:$0xff] }
 0x1ef   :  { %844 = vst.msk [vmem:[%s1688_s8 + $0x38] sm:$0xff] %vm836_vm1, %v1540_v43 }
 0x1f0   :  { %843 = vst.msk [vmem:[%s1688_s8 + $0x30] sm:$0xff] %vm836_vm1, %v1542_v45  ;;  %v1055_v46 = vpop.f32.mrb[8].mxu1 }
 0x1f1   :  { %v570_v47 = vadd.f32 %v1055_v46, %v426_v14  ;;  %v564_v48 = vpop.f32.mrb[9].mxu1 }
 0x1f2   :  { %v565_v49 = vadd.f32 %v564_v48, %v421_v15 }
 0x1f3   :  { %v604_v50 = vmul.f32 0.5, %v570_v47  ;;  %846 = vst.msk [vmem:[%s1689_s9 + $0x8] sm:$0xff] %vm836_vm1, %v570_v47 }
 0x1f4   :  { %v603_v51 = vmul.f32 0.5, %v565_v49  ;;  %845 = vst.msk [vmem:[%s1689_s9] sm:$0xff] %vm836_vm1, %v565_v49  ;;  %v1058_v52 = vpop.f32.mrb[10].mxu1 }
 0x1f5   :  { %v613_v53 = vmul.f32 1.442695, %v604_v50  ;;  %v580_v54 = vadd.f32 %v1058_v52, %v436_v16  ;;  %v574_v55 = vpop.f32.mrb[11].mxu1 }
 0x1f6   :  { %v611_v56 = vmul.f32 1.442695, %v603_v51  ;;  %v575_v57 = vadd.f32 %v574_v55, %v431_v17  ;;  %v657_v55 = vld [vmem:[%s1687_s6 + $0x30] sm:$0xff] }
 0x1f7   :  { %1160 = vpow2.f32 %v613_v53  ;;  %v606_v58 = vmul.f32 0.5, %v580_v54  ;;  %848 = vst.msk [vmem:[%s1689_s9 + $0x18] sm:$0xff] %vm836_vm1, %v580_v54  ;;  %v652_v53 = vld [vmem:[%s1687_s6 + $0x8] sm:$0xff] }
 0x1f8   :  { %1162 = vpow2.f32 %v611_v56  ;;  %v605_v59 = vmul.f32 0.5, %v575_v57  ;;  %847 = vst.msk [vmem:[%s1689_s9 + $0x10] sm:$0xff] %vm836_vm1, %v575_v57  ;;  %v1061_v60 = vpop.f32.mrb[12].mxu1  ;;  %v656_v54 = vld [vmem:[%s1687_s6 + $0x28] sm:$0xff]  ;;  %v658_v56 = vld [vmem:[%s1687_s6 + $0x38] sm:$0xff]  ;;  %v675_v57 = vpop.permute.xlu1 %674 }
 0x1f9   :  { %v617_v61 = vmul.f32 1.442695, %v606_v58  ;;  %v590_v62 = vadd.f32 %v1061_v60, %v446_v18  ;;  %v584_v63 = vpop.f32.mrb[13].mxu1  ;;  %v670_v58 = vpop.permute.xlu0 %669 }
 0x1fa   :  { %v615_v0 = vmul.f32 1.442695, %v605_v59  ;;  %v585_v1 = vadd.f32 %v584_v63, %v1492_v19 }
 0x1fb   :  { %1164 = vpow2.f32 %v617_v61  ;;  %v608_v2 = vmul.f32 0.5, %v590_v62  ;;  %850 = vst.msk [vmem:[%s1689_s9 + $0x28] sm:$0xff] %vm836_vm1, %v590_v62 }
 0x1fc   :  { %1166 = vpow2.f32 %v615_v0  ;;  %v607_v3 = vmul.f32 0.5, %v585_v1  ;;  %849 = vst.msk [vmem:[%s1689_s9 + $0x20] sm:$0xff] %vm836_vm1, %v585_v1  ;;  %v1064_v4 = vpop.f32.mrb[14].mxu1  ;;  %v685_v59 = vpop.permute.xlu1 %684 }
 0x1fd   :  { %v621_v5 = vmul.f32 1.442695, %v608_v2  ;;  %v600_v6 = vadd.f32 %v1064_v4, %v1494_v20  ;;  %v594_v7 = vpop.f32.mrb[15].mxu1  ;;  %v630_v20 = vld [vmem:[%s1690_s5 + $0x18] sm:$0xff]  ;;  %v680_v61 = vpop.permute.xlu0 %679 }
 0x1fe   :  { %v619_v8 = vmul.f32 1.442695, %v607_v3  ;;  %v595_v9 = vadd.f32 %v594_v7, %v1496_v21 }
 0x1ff   :  { %1168 = vpow2.f32 %v621_v5  ;;  %v610_v10 = vmul.f32 0.5, %v600_v6  ;;  %852 = vst.msk [vmem:[%s1689_s9 + $0x38] sm:$0xff] %vm836_vm1, %v600_v6 }
 0x200   :  { %1170 = vpow2.f32 %v619_v8  ;;  %v609_v12 = vmul.f32 0.5, %v595_v9  ;;  %851 = vst.msk [vmem:[%s1689_s9 + $0x30] sm:$0xff] %vm836_vm1, %v595_v9  ;;  %v695_v4 = vpop.permute.xlu1 %694 }
 0x201   :  { %v1161_v14 = vpop.eup %1160  ;;  %v625_v15 = vmul.f32 1.442695, %v610_v10  ;;  %v690_v6 = vpop.permute.xlu0 %689 }
 0x202   :  { %v1163_v16 = vpop.eup %1162  ;;  %v623_v17 = vmul.f32 1.442695, %v609_v12  ;;  %v636_v18 = vmul.f32 %v1161_v14, %v628_v11 }
 0x203   :  { %1172 = vpow2.f32 %v625_v15  ;;  %v635_v19 = vmul.f32 %v1163_v16, %v627_v13 }
 0x204   :  { %1174 = vpow2.f32 %v623_v17  ;;  %v644_v21 = vadd.f32 %v636_v18, %v1498_v27  ;;  %v631_v27 = vld [vmem:[%s1690_s5 + $0x20] sm:$0xff]  ;;  %v705_v11 = vpop.permute.xlu1 %704 }
 0x205   :  { %v1165_v23 = vpop.eup %1164  ;;  %v643_v24 = vadd.f32 %v635_v19, %v1500_v29  ;;  %v700_v13 = vpop.permute.xlu0 %699 }
 0x206   :  { %v1167_v25 = vpop.eup %1166  ;;  %v638_v26 = vmul.f32 %v1165_v23, %v630_v20 }
 0x207   :  { %v1141_v28 = vpack.c.bf16 %v644_v21, %v643_v24  ;;  %v637_v30 = vmul.f32 %v1167_v25, %v629_v22 }
 0x208   :  { %v646_v33 = vadd.f32 %v638_v26, %v1512_v31  ;;  %v633_v31 = vld [vmem:[%s1690_s5 + $0x30] sm:$0xff] }
 0x209   :  { %v1169_v35 = vpop.eup %1168  ;;  %1142 = vmatprep.subr.bf16.mxu0 %v1141_v28  ;;  %v645_v36 = vadd.f32 %v637_v30, %v1514_v34 }
 0x20a   :  { %v1171_v38 = vpop.eup %1170  ;;  %1144 = vmatpush3.bf16.msra.mxu0 %v1141_v28  ;;  %v640_v29 = vmul.f32 %v1169_v35, %v632_v32 }
 0x20b   :  { %v1145_v40 = vpack.c.bf16 %v646_v33, %v645_v36  ;;  %v639_v41 = vmul.f32 %v1171_v38, %v631_v27 }
 0x20c   :  { %v648_v44 = vadd.f32 %v640_v29, %v1526_v37 }
 0x20d   :  { %v1173_v46 = vpop.eup %1172  ;;  %1146 = vmatprep.subr.bf16.mxu0 %v1145_v40  ;;  %v647_v47 = vadd.f32 %v639_v41, %v1528_v39  ;;  %v653_v39 = vld [vmem:[%s1687_s6 + $0x10] sm:$0xff] }
 0x20e   :  { %v1175_v34 = vpop.eup %1174  ;;  %1148 = vmatpush3.bf16.msra.mxu0 %v1145_v40  ;;  %v642_v48 = vmul.f32 %v1173_v46, %v634_v42 }
 0x20f   :  { %v1149_v49 = vpack.c.bf16 %v648_v44, %v647_v47  ;;  %v641_v50 = vmul.f32 %v1175_v34, %v633_v31 }
 0x210   :  { %v650_v51 = vadd.f32 %v642_v48, %v1540_v43  ;;  %v654_v43 = vld [vmem:[%s1687_s6 + $0x18] sm:$0xff] }
 0x211   :  { %1150 = vmatprep.subr.bf16.mxu0 %v1149_v49  ;;  %v649_v52 = vadd.f32 %v641_v50, %v1542_v45  ;;  %v655_v45 = vld [vmem:[%s1687_s6 + $0x20] sm:$0xff] }
 0x212   :  { %1152 = vmatpush3.bf16.msra.mxu0 %v1149_v49 }
 0x213   :  { %v1153_v37 = vpack.c.bf16 %v650_v51, %v649_v52 }
 0x215   :  { %1154 = vmatprep.subr.bf16.mxu0 %v1153_v37 }
 0x216   :  { %1156 = vmatpush3.bf16.msra.mxu0 %v1153_v37 }
 0x219   :  { %1082 = vmatmul.mubr.msk.f32.vlgmr.msra.gmra.mrb[16].mxu0 %vm152_vm0, %v652_v53 }
 0x21a   :  { %1084 = vmatprep.mubr.msk.f32.mxu0 %vm152_vm0, %v653_v39 }
 0x21d   :  { %1085 = vmatmul.mubr.msk.f32.gmra.mrb[18].mxu0 %vm152_vm0, %v654_v43 }
 0x21e   :  { %1087 = vmatprep.mubr.msk.f32.mxu0 %vm152_vm0, %v655_v45 }
 0x221   :  { %1088 = vmatmul.mubr.msk.f32.gmra.mrb[20].mxu0 %vm152_vm0, %v656_v54 }
 0x222   :  { %1090 = vmatprep.mubr.msk.f32.mxu0 %vm152_vm0, %v657_v55 }
 0x225   :  { %1091 = vmatmul.mubr.msk.f32.gmra.mrb[22].mxu0 %vm152_vm0, %v658_v56 }
 0x2ec   :  { %v1083_v60 = vpop.f32.mrb[16].mxu0 }
 0x2ed   :  { %v803_v62 = vadd.f32 %v1083_v60, %v675_v57  ;;  %v797_v63 = vpop.f32.mrb[17].mxu0 }
 0x2ee   :  { %v798_v0 = vadd.f32 %v797_v63, %v670_v58 }
 0x2ef   :  { %854 = vst.msk [vmem:[%s1691_s10 + $0x8] sm:$0xff] %vm836_vm1, %v803_v62 }
 0x2f0   :  { %853 = vst.msk [vmem:[%s1691_s10] sm:$0xff] %vm836_vm1, %v798_v0  ;;  %v1086_v1 = vpop.f32.mrb[18].mxu0 }
 0x2f1   :  { %v813_v2 = vadd.f32 %v1086_v1, %v685_v59  ;;  %v807_v3 = vpop.f32.mrb[19].mxu0 }
 0x2f2   :  { %v808_v5 = vadd.f32 %v807_v3, %v680_v61 }
 0x2f3   :  { %856 = vst.msk [vmem:[%s1691_s10 + $0x18] sm:$0xff] %vm836_vm1, %v813_v2 }
 0x2f4   :  { %855 = vst.msk [vmem:[%s1691_s10 + $0x10] sm:$0xff] %vm836_vm1, %v808_v5  ;;  %v1089_v7 = vpop.f32.mrb[20].mxu0 }
 0x2f5   :  { %v823_v8 = vadd.f32 %v1089_v7, %v695_v4  ;;  %v817_v9 = vpop.f32.mrb[21].mxu0 }
 0x2f6   :  { %v818_v10 = vadd.f32 %v817_v9, %v690_v6 }
 0x2f7   :  { %858 = vst.msk [vmem:[%s1691_s10 + $0x28] sm:$0xff] %vm836_vm1, %v823_v8 }
 0x2f8   :  { %857 = vst.msk [vmem:[%s1691_s10 + $0x20] sm:$0xff] %vm836_vm1, %v818_v10  ;;  %v1092_v12 = vpop.f32.mrb[22].mxu0 }
 0x2f9   :  { %v833_v14 = vadd.f32 %v1092_v12, %v705_v11  ;;  %v827_v15 = vpop.f32.mrb[23].mxu0 }
 0x2fa   :  { %v828_v16 = vadd.f32 %v827_v15, %v700_v13 }
 0x2fb   :  { %860 = vst.msk [vmem:[%s1691_s10 + $0x38] sm:$0xff] %vm836_vm1, %v833_v14 }
 0x2fc   :  { %859 = vst.msk [vmem:[%s1691_s10 + $0x30] sm:$0xff] %vm836_vm1, %v828_v16 }

// kernel: landsat2viirs_forward.11
= control target key start
LH: loop header
LB: loop body
LE: loop exit
PB: predicated region body
PF: predicated region fallthrough
CT: control target
= control target key end

     0   :  { %v2261_v12 = vmov 0   ;;  %vm1163_vm0 = vcmask 261120   ;;  %vm1655_vm1 = vcmask 15360   ;;  %s2809_s1 = inlined_call_operand.vmem [shape: bf16[1568,2], index: 1, kind: input, shape index: {}]   ;;  %s2810_s0 = inlined_call_operand.vmem [shape: bf16[64,1568], index: 0, kind: input, shape index: {}]   ;;  %s2811_s2 = inlined_call_operand.vmem [shape: f32[64,1], index: 2, kind: input, shape index: {}]   ;;  %s2812_s3 = inlined_call_operand.vmem [shape: f32[64,2], index: 3, kind: output, shape index: {}]  }
   0x1   :  { %v2087_v0 = vld [vmem:[%s2809_s1 + $0x40] sm:$0xff]   ;;  %v2091_v4 = vld [vmem:[%s2809_s1 + $0x48] sm:$0xff]   ;;  %v2095_v8 = vld [vmem:[%s2809_s1 + $0x50] sm:$0xff]   ;;  %2085 = vset.pattern.permute.xlu0 %v2261_v12  ;;  %2086 = vset.pattern.permute.xlu1 %v2261_v12 }
   0x2   :  { %v2088_v1 = vld [vmem:[%s2809_s1 + $0xc0] sm:$0xff]   ;;  %1822 = vmatprep.subr.bf16.mxu0 %v2087_v0  ;;  %v2092_v5 = vld [vmem:[%s2809_s1 + $0xc8] sm:$0xff]   ;;  %v2096_v9 = vld [vmem:[%s2809_s1 + $0xd0] sm:$0xff]  }
   0x3   :  { %v2089_v2 = vld [vmem:[%s2809_s1] sm:$0xff]   ;;  %1862 = vmatprep.subr.bf16.mxu1 %v2088_v1  ;;  %v2093_v6 = vld [vmem:[%s2809_s1 + $0x8] sm:$0xff]   ;;  %v2097_v10 = vld [vmem:[%s2809_s1 + $0x10] sm:$0xff]  }
   0x4   :  { %v2090_v3 = vld [vmem:[%s2809_s1 + $0x80] sm:$0xff]   ;;  %1823 = vmatpush3.bf16.msra.mxu0 %v2089_v2  ;;  %v2094_v7 = vld [vmem:[%s2809_s1 + $0x88] sm:$0xff]   ;;  %v2098_v11 = vld [vmem:[%s2809_s1 + $0x90] sm:$0xff]  }
   0x5   :  { %1863 = vmatpush3.bf16.msra.mxu1 %v2090_v3  ;;  %1824 = vmatprep.subr.bf16.mxu0 %v2091_v4  ;;  %v2099_v13 = vld [vmem:[%s2809_s1 + $0x58] sm:$0xff]   ;;  %v2103_v17 = vld [vmem:[%s2809_s1 + $0x60] sm:$0xff]   ;;  %v2107_v21 = vld [vmem:[%s2809_s1 + $0x68] sm:$0xff]  }
   0x6   :  { %1864 = vmatprep.subr.bf16.mxu1 %v2092_v5  ;;  %v2100_v14 = vld [vmem:[%s2809_s1 + $0xd8] sm:$0xff]   ;;  %v2104_v18 = vld [vmem:[%s2809_s1 + $0xe0] sm:$0xff]   ;;  %v2108_v22 = vld [vmem:[%s2809_s1 + $0xe8] sm:$0xff]  }
   0x7   :  { %v2101_v15 = vld [vmem:[%s2809_s1 + $0x18] sm:$0xff]   ;;  %v2105_v19 = vld [vmem:[%s2809_s1 + $0x20] sm:$0xff]   ;;  %v2109_v23 = vld [vmem:[%s2809_s1 + $0x28] sm:$0xff]  }
   0x8   :  { %1825 = vmatpush3.bf16.msra.mxu0 %v2093_v6  ;;  %v2102_v16 = vld [vmem:[%s2809_s1 + $0x98] sm:$0xff]   ;;  %v2106_v20 = vld [vmem:[%s2809_s1 + $0xa0] sm:$0xff]   ;;  %v2110_v24 = vld [vmem:[%s2809_s1 + $0xa8] sm:$0xff]  }
   0x9   :  { %1865 = vmatpush3.bf16.msra.mxu1 %v2094_v7  ;;  %1826 = vmatprep.subr.bf16.mxu0 %v2095_v8  ;;  %v2111_v25 = vld [vmem:[%s2809_s1 + $0x70] sm:$0xff]   ;;  %v2115_v29 = vld [vmem:[%s2809_s1 + $0x78] sm:$0xff]   ;;  %v2124_v36 = vld [vmem:[%s2810_s0 + $0xc] ss:$52 sps:$4 sm:$0xff]  }
   0xa   :  { %1866 = vmatprep.subr.bf16.mxu1 %v2096_v9  ;;  %v2112_v26 = vld [vmem:[%s2809_s1 + $0xf0] sm:$0xff]   ;;  %v2116_v30 = vld [vmem:[%s2809_s1 + $0xf8] sm:$0xff]   ;;  %v2125_v37 = vld [vmem:[%s2809_s1 + $0x140] sm:$0xff]   ;;  %1273 = vmatprep.mubr.bf16.mxu1 %v2124_v36 }
   0xb   :  { %v2113_v27 = vld [vmem:[%s2809_s1 + $0x30] sm:$0xff]   ;;  %v2117_v31 = vld [vmem:[%s2809_s1 + $0x38] sm:$0xff]   ;;  %v2126_v38 = vld [vmem:[%s2809_s1 + $0x1c0] sm:$0xff]  }
   0xc   :  { %1827 = vmatpush3.bf16.msra.mxu0 %v2097_v10  ;;  %v2114_v28 = vld [vmem:[%s2809_s1 + $0xb0] sm:$0xff]   ;;  %v2118_v32 = vld [vmem:[%s2809_s1 + $0xb8] sm:$0xff]   ;;  %v2127_v39 = vld [vmem:[%s2809_s1 + $0x100] sm:$0xff]  }
   0xd   :  { %1867 = vmatpush3.bf16.msra.mxu1 %v2098_v11  ;;  %1828 = vmatprep.subr.bf16.mxu0 %v2099_v13  ;;  %v2119_v33 = vld [vmem:[%s2810_s0] ss:$52 sps:$4 sm:$0xff]   ;;  %v2121_v34 = vld [vmem:[%s2810_s0 + $0x4] ss:$52 sps:$4 sm:$0xff]   ;;  %v2122_v35 = vld [vmem:[%s2810_s0 + $0x8] ss:$52 sps:$4 sm:$0xff]  }
   0xe   :  { %1868 = vmatprep.subr.bf16.mxu1 %v2100_v14  ;;  %1208 = vmatprep.mubr.bf16.mxu0 %v2121_v34  ;;  %v2128_v40 = vld [vmem:[%s2809_s1 + $0x180] sm:$0xff]   ;;  %v2129_v41 = vld [vmem:[%s2809_s1 + $0x148] sm:$0xff]   ;;  %v2139_v49 = vld [vmem:[%s2809_s1 + $0x150] sm:$0xff]  }
   0xf   :  { %v2130_v42 = vld [vmem:[%s2809_s1 + $0x1c8] sm:$0xff]   ;;  %v2138_v48 = vld [vmem:[%s2810_s0 + $0x70] ss:$52 sps:$4 sm:$0xff]   ;;  %v2143_v53 = vld [vmem:[%s2809_s1 + $0x158] sm:$0xff]  }
  0x10   :  { %1829 = vmatpush3.bf16.msra.mxu0 %v2101_v15  ;;  %v2131_v43 = vld [vmem:[%s2809_s1 + $0x108] sm:$0xff]   ;;  %v2140_v50 = vld [vmem:[%s2809_s1 + $0x1d0] sm:$0xff]   ;;  %v2144_v54 = vld [vmem:[%s2809_s1 + $0x1d8] sm:$0xff]  }
  0x11   :  { %1869 = vmatpush3.bf16.msra.mxu1 %v2102_v16  ;;  %1830 = vmatprep.subr.bf16.mxu0 %v2103_v17  ;;  %v2132_v44 = vld [vmem:[%s2809_s1 + $0x188] sm:$0xff]   ;;  %v2141_v51 = vld [vmem:[%s2809_s1 + $0x110] sm:$0xff]   ;;  %v2145_v55 = vld [vmem:[%s2809_s1 + $0x118] sm:$0xff]  }
  0x12   :  { %1870 = vmatprep.subr.bf16.mxu1 %v2104_v18  ;;  %v2133_v45 = vld [vmem:[%s2810_s0 + $0x6c] ss:$52 sps:$4 sm:$0xff]   ;;  %v2135_v46 = vld [vmem:[%s2810_s0 + $0x74] ss:$52 sps:$4 sm:$0xff]   ;;  %v2146_v56 = vld [vmem:[%s2809_s1 + $0x198] sm:$0xff]  }
  0x13   :  { %v2137_v47 = vld [vmem:[%s2810_s0 + $0x68] ss:$52 sps:$4 sm:$0xff]   ;;  %v2142_v52 = vld [vmem:[%s2809_s1 + $0x190] sm:$0xff]   ;;  %v2152_v60 = vld [vmem:[%s2810_s0 + $0xd8] ss:$52 sps:$4 sm:$0xff]  }
  0x14   :  { %1831 = vmatpush3.bf16.msra.mxu0 %v2105_v19  ;;  %v2147_v57 = vld [vmem:[%s2810_s0 + $0xd4] ss:$52 sps:$4 sm:$0xff]   ;;  %v2149_v58 = vld [vmem:[%s2810_s0 + $0xdc] ss:$52 sps:$4 sm:$0xff]   ;;  %v2153_v61 = vld [vmem:[%s2809_s1 + $0x160] sm:$0xff]  }
  0x15   :  { %1871 = vmatpush3.bf16.msra.mxu1 %v2106_v20  ;;  %1832 = vmatprep.subr.bf16.mxu0 %v2107_v21  ;;  %v2151_v59 = vld [vmem:[%s2810_s0 + $0xd0] ss:$52 sps:$4 sm:$0xff]   ;;  %v2157_v1 = vld [vmem:[%s2809_s1 + $0x168] sm:$0xff]   ;;  %v2166_v8 = vld [vmem:[%s2810_s0 + $0x140] ss:$52 sps:$4 sm:$0xff]  }
  0x16   :  { %1872 = vmatprep.subr.bf16.mxu1 %v2108_v22  ;;  %v2154_v62 = vld [vmem:[%s2809_s1 + $0x1e0] sm:$0xff]   ;;  %v2158_v2 = vld [vmem:[%s2809_s1 + $0x1e8] sm:$0xff]   ;;  %v2161_v5 = vld [vmem:[%s2810_s0 + $0x13c] ss:$52 sps:$4 sm:$0xff]  }
  0x17   :  { %v2155_v63 = vld [vmem:[%s2809_s1 + $0x120] sm:$0xff]   ;;  %v2159_v3 = vld [vmem:[%s2809_s1 + $0x128] sm:$0xff]   ;;  %v2167_v9 = vld [vmem:[%s2809_s1 + $0x170] sm:$0xff]  }
  0x18   :  { %1833 = vmatpush3.bf16.msra.mxu0 %v2109_v23  ;;  %v2156_v0 = vld [vmem:[%s2809_s1 + $0x1a0] sm:$0xff]   ;;  %v2160_v4 = vld [vmem:[%s2809_s1 + $0x1a8] sm:$0xff]   ;;  %v2168_v10 = vld [vmem:[%s2809_s1 + $0x1f0] sm:$0xff]  }
  0x19   :  { %1873 = vmatpush3.bf16.msra.mxu1 %v2110_v24  ;;  %1834 = vmatprep.subr.bf16.mxu0 %v2111_v25  ;;  %v2163_v6 = vld [vmem:[%s2810_s0 + $0x144] ss:$52 sps:$4 sm:$0xff]   ;;  %v2169_v11 = vld [vmem:[%s2809_s1 + $0x130] sm:$0xff]   ;;  %v2185_v25 = vld [vmem:[%s2809_s1 + $0x248] sm:$0xff]  }
  0x1a   :  { %1874 = vmatprep.subr.bf16.mxu1 %v2112_v26  ;;  %v2165_v7 = vld [vmem:[%s2810_s0 + $0x138] ss:$52 sps:$4 sm:$0xff]   ;;  %v2170_v12 = vld [vmem:[%s2809_s1 + $0x1b0] sm:$0xff]   ;;  %v2181_v21 = vld [vmem:[%s2809_s1 + $0x240] sm:$0xff]  }
  0x1b   :  { %v2171_v13 = vld [vmem:[%s2809_s1 + $0x178] sm:$0xff]   ;;  %v2175_v17 = vld [vmem:[%s2810_s0 + $0x10] ss:$52 sps:$4 sm:$0xff]   ;;  %v2177_v18 = vld [vmem:[%s2810_s0 + $0x14] ss:$52 sps:$4 sm:$0xff]  }
  0x1c   :  { %1835 = vmatpush3.bf16.msra.mxu0 %v2113_v27  ;;  %v2172_v14 = vld [vmem:[%s2809_s1 + $0x1f8] sm:$0xff]   ;;  %v2182_v22 = vld [vmem:[%s2809_s1 + $0x2c0] sm:$0xff]   ;;  %v2186_v26 = vld [vmem:[%s2809_s1 + $0x2c8] sm:$0xff]  }
  0x1d   :  { %1875 = vmatpush3.bf16.msra.mxu1 %v2114_v28  ;;  %1836 = vmatprep.subr.bf16.mxu0 %v2115_v29  ;;  %v2173_v15 = vld [vmem:[%s2809_s1 + $0x138] sm:$0xff]   ;;  %v2183_v23 = vld [vmem:[%s2809_s1 + $0x200] sm:$0xff]   ;;  %v2187_v27 = vld [vmem:[%s2809_s1 + $0x208] sm:$0xff]  }
  0x1e   :  { %1876 = vmatprep.subr.bf16.mxu1 %v2116_v30  ;;  %v2174_v16 = vld [vmem:[%s2809_s1 + $0x1b8] sm:$0xff]   ;;  %v2184_v24 = vld [vmem:[%s2809_s1 + $0x280] sm:$0xff]   ;;  %v2188_v28 = vld [vmem:[%s2809_s1 + $0x288] sm:$0xff]  }
  0x1f   :  { %v2178_v19 = vld [vmem:[%s2810_s0 + $0x18] ss:$52 sps:$4 sm:$0xff]   ;;  %v2180_v20 = vld [vmem:[%s2810_s0 + $0x1c] ss:$52 sps:$4 sm:$0xff]  }
  0x20   :  { %1837 = vmatpush3.bf16.msra.mxu0 %v2117_v31  ;;  %v2189_v29 = vld [vmem:[%s2810_s0 + $0x7c] ss:$52 sps:$4 sm:$0xff]   ;;  %v2191_v30 = vld [vmem:[%s2810_s0 + $0x84] ss:$52 sps:$4 sm:$0xff]  }
  0x21   :  { %1877 = vmatpush3.bf16.msra.mxu1 %v2118_v32  ;;  %1902 = vmatprep.subr.bf16.mxu0 %v2125_v37  ;;  %v2193_v31 = vld [vmem:[%s2810_s0 + $0x78] ss:$52 sps:$4 sm:$0xff]   ;;  %v2194_v32 = vld [vmem:[%s2810_s0 + $0x80] ss:$52 sps:$4 sm:$0xff]  }
  0x22   :  { %1942 = vmatprep.subr.bf16.mxu1 %v2126_v38  ;;  %v2196_v34 = vld [vmem:[%s2809_s1 + $0x2d0] sm:$0xff]   ;;  %v2199_v37 = vld [vmem:[%s2809_s1 + $0x258] sm:$0xff]  }
  0x23   :  { %1209 = vmatmul.mubr.bf16.vlgmr.msra.gmra.mrb[0].mxu0 %v2119_v33  ;;  %v2195_v33 = vld [vmem:[%s2809_s1 + $0x250] sm:$0xff]   ;;  %v2200_v38 = vld [vmem:[%s2809_s1 + $0x2d8] sm:$0xff]  }
  0x24   :  { %1274 = vmatmul.mubr.bf16.vlgmr.msra.gmra.mrb[0].mxu1 %v2122_v35  ;;  %1903 = vmatpush3.bf16.msra.mxu0 %v2127_v39  ;;  %v2197_v35 = vld [vmem:[%s2809_s1 + $0x210] sm:$0xff]   ;;  %v2201_v39 = vld [vmem:[%s2809_s1 + $0x218] sm:$0xff]  }
  0x25   :  { %1943 = vmatpush3.bf16.msra.mxu1 %v2128_v40  ;;  %1904 = vmatprep.subr.bf16.mxu0 %v2129_v41  ;;  %v2198_v36 = vld [vmem:[%s2809_s1 + $0x290] sm:$0xff]   ;;  %v2202_v40 = vld [vmem:[%s2809_s1 + $0x298] sm:$0xff]  }
  0x26   :  { %1944 = vmatprep.subr.bf16.mxu1 %v2130_v42  ;;  %1216 = vmatprep.mubr.bf16.mxu0 %v2133_v45  ;;  %v2203_v41 = vld [vmem:[%s2810_s0 + $0xe4] ss:$52 sps:$4 sm:$0xff]   ;;  %v2205_v42 = vld [vmem:[%s2810_s0 + $0xec] ss:$52 sps:$4 sm:$0xff]  }
  0x27   :  { %1281 = vmatprep.mubr.bf16.mxu1 %v2135_v46  ;;  %v2209_v45 = vld [vmem:[%s2809_s1 + $0x260] sm:$0xff]  }
  0x28   :  { %1905 = vmatpush3.bf16.msra.mxu0 %v2131_v43  ;;  %v2207_v43 = vld [vmem:[%s2810_s0 + $0xe0] ss:$52 sps:$4 sm:$0xff]  }
  0x29   :  { %1945 = vmatpush3.bf16.msra.mxu1 %v2132_v44  ;;  %1906 = vmatprep.subr.bf16.mxu0 %v2139_v49  ;;  %v2208_v44 = vld [vmem:[%s2810_s0 + $0xe8] ss:$52 sps:$4 sm:$0xff]   ;;  %v2210_v46 = vld [vmem:[%s2809_s1 + $0x2e0] sm:$0xff]  }
  0x2a   :  { %1946 = vmatprep.subr.bf16.mxu1 %v2140_v50  ;;  %v2213_v49 = vld [vmem:[%s2809_s1 + $0x268] sm:$0xff]  }
  0x2b   :  { %1217 = vmatmul.mubr.bf16.gmra.mrb[4].mxu0 %v2137_v47  ;;  %v2211_v47 = vld [vmem:[%s2809_s1 + $0x220] sm:$0xff]   ;;  %v2214_v50 = vld [vmem:[%s2809_s1 + $0x2e8] sm:$0xff]  }
  0x2c   :  { %1282 = vmatmul.mubr.bf16.gmra.mrb[4].mxu1 %v2138_v48  ;;  %1907 = vmatpush3.bf16.msra.mxu0 %v2141_v51  ;;  %v2212_v48 = vld [vmem:[%s2809_s1 + $0x2a0] sm:$0xff]   ;;  %v2215_v51 = vld [vmem:[%s2809_s1 + $0x228] sm:$0xff]  }
  0x2d   :  { %1947 = vmatpush3.bf16.msra.mxu1 %v2142_v52  ;;  %1908 = vmatprep.subr.bf16.mxu0 %v2143_v53  ;;  %v2216_v52 = vld [vmem:[%s2809_s1 + $0x2a8] sm:$0xff]  }
  0x2e   :  { %1948 = vmatprep.subr.bf16.mxu1 %v2144_v54  ;;  %1224 = vmatprep.mubr.bf16.mxu0 %v2147_v57  ;;  %v2217_v53 = vld [vmem:[%s2810_s0 + $0x14c] ss:$52 sps:$4 sm:$0xff]   ;;  %v2219_v54 = vld [vmem:[%s2810_s0 + $0x154] ss:$52 sps:$4 sm:$0xff]  }
  0x2f   :  { %1289 = vmatprep.mubr.bf16.mxu1 %v2149_v58  ;;  %v2223_v57 = vld [vmem:[%s2809_s1 + $0x270] sm:$0xff]  }
  0x30   :  { %1909 = vmatpush3.bf16.msra.mxu0 %v2145_v55  ;;  %v2221_v55 = vld [vmem:[%s2810_s0 + $0x148] ss:$52 sps:$4 sm:$0xff]   ;;  %v2224_v58 = vld [vmem:[%s2809_s1 + $0x2f0] sm:$0xff]  }
  0x31   :  { %1949 = vmatpush3.bf16.msra.mxu1 %v2146_v56  ;;  %1910 = vmatprep.subr.bf16.mxu0 %v2153_v61  ;;  %v2222_v56 = vld [vmem:[%s2810_s0 + $0x150] ss:$52 sps:$4 sm:$0xff]   ;;  %v2227_v61 = vld [vmem:[%s2809_s1 + $0x278] sm:$0xff]  }
  0x32   :  { %1950 = vmatprep.subr.bf16.mxu1 %v2154_v62  ;;  %v2228_v62 = vld [vmem:[%s2809_s1 + $0x2f8] sm:$0xff]  }
  0x33   :  { %1225 = vmatmul.mubr.bf16.gmra.mrb[8].mxu0 %v2151_v59  ;;  %v2225_v59 = vld [vmem:[%s2809_s1 + $0x230] sm:$0xff]  }
  0x34   :  { %1290 = vmatmul.mubr.bf16.gmra.mrb[8].mxu1 %v2152_v60  ;;  %1911 = vmatpush3.bf16.msra.mxu0 %v2155_v63  ;;  %v2226_v60 = vld [vmem:[%s2809_s1 + $0x2b0] sm:$0xff]   ;;  %v2229_v63 = vld [vmem:[%s2809_s1 + $0x238] sm:$0xff]  }
  0x35   :  { %1951 = vmatpush3.bf16.msra.mxu1 %v2156_v0  ;;  %1912 = vmatprep.subr.bf16.mxu0 %v2157_v1  ;;  %v2230_v0 = vld [vmem:[%s2809_s1 + $0x2b8] sm:$0xff]   ;;  %v2231_v1 = vld [vmem:[%s2810_s0 + $0x20] ss:$52 sps:$4 sm:$0xff]  }
  0x36   :  { %1952 = vmatprep.subr.bf16.mxu1 %v2158_v2  ;;  %1232 = vmatprep.mubr.bf16.mxu0 %v2161_v5  ;;  %v2233_v2 = vld [vmem:[%s2810_s0 + $0x24] ss:$52 sps:$4 sm:$0xff]  }
  0x37   :  { %1297 = vmatprep.mubr.bf16.mxu1 %v2163_v6  ;;  %v2237_v5 = vld [vmem:[%s2809_s1 + $0x300] sm:$0xff]  }
  0x38   :  { %1913 = vmatpush3.bf16.msra.mxu0 %v2159_v3  ;;  %v2234_v3 = vld [vmem:[%s2810_s0 + $0x28] ss:$52 sps:$4 sm:$0xff]   ;;  %v2238_v6 = vld [vmem:[%s2810_s0 + $0x8c] ss:$52 sps:$4 sm:$0xff]  }
  0x39   :  { %1953 = vmatpush3.bf16.msra.mxu1 %v2160_v4  ;;  %1914 = vmatprep.subr.bf16.mxu0 %v2167_v9  ;;  %v2236_v4 = vld [vmem:[%s2810_s0 + $0x2c] ss:$52 sps:$4 sm:$0xff]   ;;  %v2243_v9 = vld [vmem:[%s2810_s0 + $0x90] ss:$52 sps:$4 sm:$0xff]  }
  0x3a   :  { %1954 = vmatprep.subr.bf16.mxu1 %v2168_v10  ;;  %v2244_v10 = vld [vmem:[%s2810_s0 + $0xf4] ss:$52 sps:$4 sm:$0xff]  }
  0x3b   :  { %1233 = vmatmul.mubr.bf16.gmra.mrb[12].mxu0 %v2165_v7  ;;  %v2240_v7 = vld [vmem:[%s2810_s0 + $0x94] ss:$52 sps:$4 sm:$0xff]  }
  0x3c   :  { %1298 = vmatmul.mubr.bf16.gmra.mrb[12].mxu1 %v2166_v8  ;;  %1915 = vmatpush3.bf16.msra.mxu0 %v2169_v11  ;;  %v2242_v8 = vld [vmem:[%s2810_s0 + $0x88] ss:$52 sps:$4 sm:$0xff]  }
  0x3d   :  { %1955 = vmatpush3.bf16.msra.mxu1 %v2170_v12  ;;  %1916 = vmatprep.subr.bf16.mxu0 %v2171_v13  ;;  %v2246_v11 = vld [vmem:[%s2810_s0 + $0xfc] ss:$52 sps:$4 sm:$0xff]   ;;  %v2250_v12 = vld [vmem:[%s2809_s1 + $0x308] sm:$0xff]   ;;  %v267_v13 = vld [vmem:[%s2811_s2] sm:$0xff] }
  0x3e   :  { %1956 = vmatprep.subr.bf16.mxu1 %v2172_v14  ;;  %1338 = vmatprep.mubr.bf16.mxu0 %v2177_v18  ;;  %v268_v14 = vld [vmem:[%s2811_s2 + $0x8] sm:$0xff]  ;;  %v2251_v18 = vld [vmem:[%s2810_s0 + $0x15c] ss:$52 sps:$4 sm:$0xff]  }
  0x3f   :  { %1403 = vmatprep.mubr.bf16.mxu1 %v2180_v20  ;;  %277 = vperm.xlu0 %2085, %v267_v13   ;;  %v270_v20 = vld [vmem:[%s2811_s2 + $0x18] sm:$0xff] }
  0x40   :  { %1917 = vmatpush3.bf16.msra.mxu0 %v2173_v15  ;;  %v269_v15 = vld [vmem:[%s2811_s2 + $0x10] sm:$0xff] }
  0x41   :  { %1957 = vmatpush3.bf16.msra.mxu1 %v2174_v16  ;;  %1982 = vmatprep.subr.bf16.mxu0 %v2181_v21  ;;  %v2248_v16 = vld [vmem:[%s2810_s0 + $0xf0] ss:$52 sps:$4 sm:$0xff]  }
  0x42   :  { %2022 = vmatprep.subr.bf16.mxu1 %v2182_v22  ;;  %287 = vperm.xlu1 %2086, %v269_v15   ;;  %v271_v21 = vld [vmem:[%s2811_s2 + $0x20] sm:$0xff]  ;;  %v272_v22 = vld [vmem:[%s2811_s2 + $0x28] sm:$0xff] }
  0x43   :  { %1339 = vmatmul.mubr.bf16.vlgmr.msra.gmra.mrb[16].mxu0 %v2175_v17  ;;  %v2249_v17 = vld [vmem:[%s2810_s0 + $0xf8] ss:$52 sps:$4 sm:$0xff]   ;;  %282 = vperm.xlu0 %2085, %v268_v14  }
  0x44   :  { %1404 = vmatmul.mubr.bf16.vlgmr.msra.gmra.mrb[16].mxu1 %v2178_v19  ;;  %1983 = vmatpush3.bf16.msra.mxu0 %v2183_v23  ;;  %v2253_v19 = vld [vmem:[%s2810_s0 + $0x164] ss:$52 sps:$4 sm:$0xff]   ;;  %v273_v23 = vld [vmem:[%s2811_s2 + $0x30] sm:$0xff] }
  0x45   :  { %2023 = vmatpush3.bf16.msra.mxu1 %v2184_v24  ;;  %1984 = vmatprep.subr.bf16.mxu0 %v2185_v25  ;;  %v2255_v24 = vld [vmem:[%s2810_s0 + $0x158] ss:$52 sps:$4 sm:$0xff]   ;;  %v2256_v25 = vld [vmem:[%s2810_s0 + $0x160] ss:$52 sps:$4 sm:$0xff]  }
  0x46   :  { %2024 = vmatprep.subr.bf16.mxu1 %v2186_v26  ;;  %1346 = vmatprep.mubr.bf16.mxu0 %v2189_v29  ;;  %v2257_v26 = vld [vmem:[%s2810_s0 + $0x30] ss:$52 sps:$4 sm:$0xff]   ;;  %v2259_v29 = vld [vmem:[%s2810_s0 + $0x98] ss:$52 sps:$4 sm:$0xff]  }
  0x47   :  { %1411 = vmatprep.mubr.bf16.mxu1 %v2191_v30  ;;  %292 = vperm.xlu1 %2086, %v270_v20   ;;  %v2260_v30 = vld [vmem:[%s2810_s0 + $0x168] ss:$52 sps:$4 sm:$0xff]  }
  0x48   :  { %1985 = vmatpush3.bf16.msra.mxu0 %v2187_v27  ;;  %297 = vperm.xlu0 %2085, %v271_v21   ;;  %v274_v27 = vld [vmem:[%s2811_s2 + $0x38] sm:$0xff] }
  0x49   :  { %2025 = vmatpush3.bf16.msra.mxu1 %v2188_v28  ;;  %1986 = vmatprep.subr.bf16.mxu0 %v2195_v33  ;;  %v2258_v28 = vld [vmem:[%s2810_s0 + $0x100] ss:$52 sps:$4 sm:$0xff]  }
  0x4a   :  { %2026 = vmatprep.subr.bf16.mxu1 %v2196_v34 }
  0x4b   :  { %1347 = vmatmul.mubr.bf16.gmra.mrb[20].mxu0 %v2193_v31  ;;  %302 = vperm.xlu1 %2086, %v272_v22  }
  0x4c   :  { %1412 = vmatmul.mubr.bf16.gmra.mrb[20].mxu1 %v2194_v32  ;;  %1987 = vmatpush3.bf16.msra.mxu0 %v2197_v35 }
  0x4d   :  { %2027 = vmatpush3.bf16.msra.mxu1 %v2198_v36  ;;  %1988 = vmatprep.subr.bf16.mxu0 %v2199_v37 }
  0x4e   :  { %2028 = vmatprep.subr.bf16.mxu1 %v2200_v38  ;;  %1354 = vmatprep.mubr.bf16.mxu0 %v2203_v41 }
  0x4f   :  { %1419 = vmatprep.mubr.bf16.mxu1 %v2205_v42  ;;  %307 = vperm.xlu0 %2085, %v273_v23  }
  0x50   :  { %1989 = vmatpush3.bf16.msra.mxu0 %v2201_v39  ;;  %312 = vperm.xlu1 %2086, %v274_v27  }
  0x51   :  { %2029 = vmatpush3.bf16.msra.mxu1 %v2202_v40  ;;  %1990 = vmatprep.subr.bf16.mxu0 %v2209_v45 }
  0x52   :  { %2030 = vmatprep.subr.bf16.mxu1 %v2210_v46 }
  0x53   :  { %1355 = vmatmul.mubr.bf16.gmra.mrb[24].mxu0 %v2207_v43 }
  0x54   :  { %1420 = vmatmul.mubr.bf16.gmra.mrb[24].mxu1 %v2208_v44  ;;  %1991 = vmatpush3.bf16.msra.mxu0 %v2211_v47 }
  0x55   :  { %2031 = vmatpush3.bf16.msra.mxu1 %v2212_v48  ;;  %1992 = vmatprep.subr.bf16.mxu0 %v2213_v49 }
  0x56   :  { %2032 = vmatprep.subr.bf16.mxu1 %v2214_v50  ;;  %1362 = vmatprep.mubr.bf16.mxu0 %v2217_v53 }
  0x57   :  { %1427 = vmatprep.mubr.bf16.mxu1 %v2219_v54 }
  0x58   :  { %1993 = vmatpush3.bf16.msra.mxu0 %v2215_v51 }
  0x59   :  { %2033 = vmatpush3.bf16.msra.mxu1 %v2216_v52  ;;  %1994 = vmatprep.subr.bf16.mxu0 %v2223_v57 }
  0x5a   :  { %2034 = vmatprep.subr.bf16.mxu1 %v2224_v58 }
  0x5b   :  { %1363 = vmatmul.mubr.bf16.gmra.mrb[28].mxu0 %v2221_v55 }
  0x5c   :  { %1428 = vmatmul.mubr.bf16.gmra.mrb[28].mxu1 %v2222_v56  ;;  %1995 = vmatpush3.bf16.msra.mxu0 %v2225_v59 }
  0x5d   :  { %2035 = vmatpush3.bf16.msra.mxu1 %v2226_v60  ;;  %1996 = vmatprep.subr.bf16.mxu0 %v2227_v61 }
  0x5e   :  { %2036 = vmatprep.subr.bf16.mxu1 %v2228_v62  ;;  %1468 = vmatprep.mubr.bf16.mxu0 %v2233_v2 }
  0x5f   :  { %1533 = vmatprep.mubr.bf16.mxu1 %v2236_v4 }
  0x60   :  { %1997 = vmatpush3.bf16.msra.mxu0 %v2229_v63 }
  0x61   :  { %2037 = vmatpush3.bf16.msra.mxu1 %v2230_v0  ;;  %2068 = vmatprep.subr.bf16.mxu0 %v2237_v5 }
  0x62   :  { %2080 = vmatprep.subr.bf16.mxu1 %v2237_v5 }
  0x63   :  { %1469 = vmatmul.mubr.bf16.vlgmr.msra.gmra.mrb[32].mxu0 %v2231_v1 }
  0x64   :  { %1534 = vmatmul.mubr.bf16.vlgmr.msra.gmra.mrb[32].mxu1 %v2234_v3  ;;  %2069 = vmatpush3.bf16.msra.mxu0 %v2237_v5 }
  0x65   :  { %2082 = vmatpush3.bf16.msra.mxu1 %v2237_v5  ;;  %1476 = vmatprep.mubr.bf16.mxu0 %v2238_v6 }
  0x66   :  { %1541 = vmatprep.mubr.bf16.mxu1 %v2240_v7  ;;  %2070 = vmatprep.subr.bf16.mxu0 %v2250_v12 }
  0x67   :  { %2081 = vmatprep.subr.bf16.mxu1 %v2250_v12 }
  0x68   :  { %2071 = vmatpush3.bf16.msra.mxu0 %v2250_v12 }
  0x69   :  { %2083 = vmatpush3.bf16.msra.mxu1 %v2250_v12 }
  0x6b   :  { %1477 = vmatmul.mubr.bf16.gmra.mrb[36].mxu0 %v2242_v8 }
  0x6c   :  { %1542 = vmatmul.mubr.bf16.gmra.mrb[36].mxu1 %v2243_v9  ;;  %1484 = vmatprep.mubr.bf16.mxu0 %v2244_v10 }
  0x6d   :  { %1549 = vmatprep.mubr.bf16.mxu1 %v2246_v11 }
  0x73   :  { %1485 = vmatmul.mubr.bf16.gmra.mrb[40].mxu0 %v2248_v16 }
  0x74   :  { %1550 = vmatmul.mubr.bf16.gmra.mrb[40].mxu1 %v2249_v17  ;;  %1492 = vmatprep.mubr.bf16.mxu0 %v2251_v18 }
  0x75   :  { %1557 = vmatprep.mubr.bf16.mxu1 %v2253_v19 }
  0x7b   :  { %1493 = vmatmul.mubr.bf16.gmra.mrb[44].mxu0 %v2255_v24 }
  0x7c   :  { %1558 = vmatmul.mubr.bf16.gmra.mrb[44].mxu1 %v2256_v25  ;;  %2072 = vmatprep.mubr.msk.bf16.mxu0 %vm1163_vm0, %v2257_v26 }
  0x7d   :  { %2076 = vmatprep.mubr.msk.bf16.mxu1 %vm1163_vm0, %v2258_v28 }
  0x83   :  { %2073 = vmatmul.mubr.msk.bf16.vlgmr.msra.gmra.mrb[48].mxu0 %vm1163_vm0, %v2259_v29 }
  0x84   :  { %2077 = vmatmul.mubr.msk.bf16.vlgmr.msra.gmra.mrb[48].mxu1 %vm1163_vm0, %v2260_v30 }
  0xbe   :  { %v278_v43 = vpop.permute.xlu0 %277 }
  0xc1   :  { %v288_v53 = vpop.permute.xlu1 %287 }
  0xc2   :  { %v283_v52 = vpop.permute.xlu0 %282 }
  0xc6   :  { %v293_v0 = vpop.permute.xlu1 %292 }
  0xc7   :  { %v298_v3 = vpop.permute.xlu0 %297 }
  0xca   :  { %v303_v5 = vpop.permute.xlu1 %302 }
  0xce   :  { %v308_v21 = vpop.permute.xlu0 %307 }
  0xcf   :  { %v313_v22 = vpop.permute.xlu1 %312 }
  0xf6   :  { %v1838_v31 = vpop.f32.mrb[0].mxu0 }
  0xf7   :  { %v1878_v32 = vpop.f32.mrb[0].mxu1  ;;  %v1839_v33 = vpop.f32.mrb[1].mxu0 }
  0xf8   :  { %v1840_v34 = vadd.f32 %v1839_v33, %v1838_v31  ;;  %v1879_v35 = vpop.f32.mrb[1].mxu1  ;;  %v1841_v36 = vpop.f32.mrb[2].mxu0 }
  0xf9   :  { %v1880_v37 = vadd.f32 %v1879_v35, %v1878_v32  ;;  %v1881_v38 = vpop.f32.mrb[2].mxu1  ;;  %v1842_v39 = vpop.f32.mrb[3].mxu0 }
  0xfa   :  { %v1843_v40 = vadd.f32 %v1842_v39, %v1841_v36  ;;  %v1882_v41 = vpop.f32.mrb[3].mxu1  ;;  %v1211_v44 = vadd.f32 %v1840_v34, %v278_v43 }
  0xfb   :  { %v1883_v42 = vadd.f32 %v1882_v41, %v1881_v38 }
  0xfc   :  { %v2756_v46 = vadd.f32 %v1880_v37, %v1211_v44  ;;  %v1214_v55 = vadd.f32 %v1843_v40, %v283_v52 }
  0xfe   :  { %v1844_v45 = vpop.f32.mrb[4].mxu0  ;;  %v1279_v61 = vadd.f32 %v1883_v42, %v1214_v55 }
  0xff   :  { %v1884_v47 = vpop.f32.mrb[4].mxu1  ;;  %v1845_v48 = vpop.f32.mrb[5].mxu0 }
 0x100   :  { %v1846_v49 = vadd.f32 %v1845_v48, %v1844_v45  ;;  %v1885_v50 = vpop.f32.mrb[5].mxu1  ;;  %v1847_v51 = vpop.f32.mrb[6].mxu0 }
 0x101   :  { %v1886_v54 = vadd.f32 %v1885_v50, %v1884_v47  ;;  %v1887_v57 = vpop.f32.mrb[6].mxu1  ;;  %v1848_v58 = vpop.f32.mrb[7].mxu0 }
 0x102   :  { %v1219_v56 = vadd.f32 %v1846_v49, %v288_v53  ;;  %v1849_v59 = vadd.f32 %v1848_v58, %v1847_v51  ;;  %v1888_v60 = vpop.f32.mrb[7].mxu1 }
 0x103   :  { %v1889_v63 = vadd.f32 %v1888_v60, %v1887_v57 }
 0x104   :  { %v2758_v62 = vadd.f32 %v1886_v54, %v1219_v56  ;;  %v1222_v1 = vadd.f32 %v1849_v59, %v293_v0 }
 0x106   :  { %v2760_v2 = vadd.f32 %v1889_v63, %v1222_v1  ;;  %v1850_v4 = vpop.f32.mrb[8].mxu0 }
 0x107   :  { %v1890_v6 = vpop.f32.mrb[8].mxu1  ;;  %v1851_v7 = vpop.f32.mrb[9].mxu0 }
 0x108   :  { %v1852_v8 = vadd.f32 %v1851_v7, %v1850_v4  ;;  %v1891_v9 = vpop.f32.mrb[9].mxu1  ;;  %v1853_v10 = vpop.f32.mrb[10].mxu0 }
 0x109   :  { %v1892_v11 = vadd.f32 %v1891_v9, %v1890_v6  ;;  %v1893_v12 = vpop.f32.mrb[10].mxu1  ;;  %v1854_v13 = vpop.f32.mrb[11].mxu0 }
 0x10a   :  { %v1227_v14 = vadd.f32 %v1852_v8, %v298_v3  ;;  %v1855_v15 = vadd.f32 %v1854_v13, %v1853_v10  ;;  %v1894_v16 = vpop.f32.mrb[11].mxu1 }
 0x10b   :  { %v1895_v17 = vadd.f32 %v1894_v16, %v1893_v12 }
 0x10c   :  { %v2762_v18 = vadd.f32 %v1892_v11, %v1227_v14  ;;  %v1230_v19 = vadd.f32 %v1855_v15, %v303_v5 }
 0x10e   :  { %v2764_v20 = vadd.f32 %v1895_v17, %v1230_v19  ;;  %v1856_v23 = vpop.f32.mrb[12].mxu0 }
 0x10f   :  { %v1896_v24 = vpop.f32.mrb[12].mxu1  ;;  %v1857_v25 = vpop.f32.mrb[13].mxu0 }
 0x110   :  { %v1897_v26 = vpop.f32.mrb[13].mxu1  ;;  %v1858_v27 = vadd.f32 %v1857_v25, %v1856_v23  ;;  %v1859_v29 = vpop.f32.mrb[14].mxu0 }
 0x111   :  { %v1898_v28 = vadd.f32 %v1897_v26, %v1896_v24  ;;  %v1899_v30 = vpop.f32.mrb[14].mxu1  ;;  %v1860_v31 = vpop.f32.mrb[15].mxu0 }
 0x112   :  { %v1900_v32 = vpop.f32.mrb[15].mxu1  ;;  %v1235_v33 = vadd.f32 %v1858_v27, %v308_v21  ;;  %v1861_v34 = vadd.f32 %v1860_v31, %v1859_v29 }
 0x113   :  { %v1901_v35 = vadd.f32 %v1900_v32, %v1899_v30 }
 0x114   :  { %v1300_v36 = vadd.f32 %v1898_v28, %v1235_v33  ;;  %v1238_v37 = vadd.f32 %v1861_v34, %v313_v22 }
 0x116   :  { %v2766_v38 = vadd.f32 %v1901_v35, %v1238_v37  ;;  %v1918_v39 = vpop.f32.mrb[16].mxu0 }
 0x117   :  { %v1919_v40 = vpop.f32.mrb[17].mxu0  ;;  %v1958_v41 = vpop.f32.mrb[16].mxu1 }
 0x118   :  { %v1920_v42 = vadd.f32 %v1919_v40, %v1918_v39  ;;  %v1921_v43 = vpop.f32.mrb[18].mxu0  ;;  %v1959_v44 = vpop.f32.mrb[17].mxu1 }
 0x119   :  { %v1922_v45 = vpop.f32.mrb[19].mxu0  ;;  %v1960_v48 = vadd.f32 %v1959_v44, %v1958_v41  ;;  %v1961_v49 = vpop.f32.mrb[18].mxu1 }
 0x11a   :  { %v1341_v47 = vadd.f32 %v1920_v42, %v2756_v46  ;;  %v1923_v50 = vadd.f32 %v1922_v45, %v1921_v43  ;;  %v1962_v51 = vpop.f32.mrb[19].mxu1 }
 0x11b   :  { %v1963_v54 = vadd.f32 %v1962_v51, %v1961_v49 }
 0x11c   :  { %v1406_v52 = vadd.f32 %v1960_v48, %v1341_v47  ;;  %v1344_v53 = vadd.f32 %v1923_v50, %v1279_v61 }
 0x11e   :  { %v1409_v55 = vadd.f32 %v1963_v54, %v1344_v53  ;;  %v1924_v56 = vpop.f32.mrb[20].mxu0 }
 0x11f   :  { %v1964_v57 = vpop.f32.mrb[20].mxu1  ;;  %v1925_v58 = vpop.f32.mrb[21].mxu0 }
 0x120   :  { %v1926_v59 = vadd.f32 %v1925_v58, %v1924_v56  ;;  %v1965_v60 = vpop.f32.mrb[21].mxu1  ;;  %v1927_v63 = vpop.f32.mrb[22].mxu0 }
 0x121   :  { %v1966_v0 = vadd.f32 %v1965_v60, %v1964_v57  ;;  %v1967_v1 = vpop.f32.mrb[22].mxu1  ;;  %v1928_v3 = vpop.f32.mrb[23].mxu0 }
 0x122   :  { %v1349_v4 = vadd.f32 %v1926_v59, %v2758_v62  ;;  %v1929_v46 = vadd.f32 %v1928_v3, %v1927_v63  ;;  %v1968_v5 = vpop.f32.mrb[23].mxu1 }
 0x123   :  { %v1969_v6 = vadd.f32 %v1968_v5, %v1967_v1 }
 0x124   :  { %v1414_v7 = vadd.f32 %v1966_v0, %v1349_v4  ;;  %v1352_v8 = vadd.f32 %v1929_v46, %v2760_v2 }
 0x126   :  { %v1417_v61 = vadd.f32 %v1969_v6, %v1352_v8  ;;  %v1930_v9 = vpop.f32.mrb[24].mxu0 }
 0x127   :  { %v1970_v10 = vpop.f32.mrb[24].mxu1  ;;  %v1931_v11 = vpop.f32.mrb[25].mxu0 }
 0x128   :  { %v1971_v12 = vpop.f32.mrb[25].mxu1  ;;  %v1932_v13 = vadd.f32 %v1931_v11, %v1930_v9  ;;  %v1933_v15 = vpop.f32.mrb[26].mxu0 }
 0x129   :  { %v1972_v14 = vadd.f32 %v1971_v12, %v1970_v10  ;;  %v1973_v16 = vpop.f32.mrb[26].mxu1  ;;  %v1934_v17 = vpop.f32.mrb[27].mxu0 }
 0x12a   :  { %v1974_v19 = vpop.f32.mrb[27].mxu1  ;;  %v1357_v21 = vadd.f32 %v1932_v13, %v2762_v18  ;;  %v1935_v62 = vadd.f32 %v1934_v17, %v1933_v15 }
 0x12b   :  { %v1975_v22 = vadd.f32 %v1974_v19, %v1973_v16 }
 0x12c   :  { %v1422_v23 = vadd.f32 %v1972_v14, %v1357_v21  ;;  %v1360_v24 = vadd.f32 %v1935_v62, %v2764_v20 }
 0x12e   :  { %v1425_v25 = vadd.f32 %v1975_v22, %v1360_v24  ;;  %v1936_v2 = vpop.f32.mrb[28].mxu0 }
 0x12f   :  { %v1976_v26 = vpop.f32.mrb[28].mxu1  ;;  %v1937_v27 = vpop.f32.mrb[29].mxu0 }
 0x130   :  { %v1938_v28 = vadd.f32 %v1937_v27, %v1936_v2  ;;  %v1977_v29 = vpop.f32.mrb[29].mxu1  ;;  %v1939_v30 = vpop.f32.mrb[30].mxu0 }
 0x131   :  { %v1978_v31 = vadd.f32 %v1977_v29, %v1976_v26  ;;  %v1979_v32 = vpop.f32.mrb[30].mxu1  ;;  %v1940_v33 = vpop.f32.mrb[31].mxu0 }
 0x132   :  { %v1365_v34 = vadd.f32 %v1938_v28, %v1300_v36  ;;  %v1941_v35 = vadd.f32 %v1940_v33, %v1939_v30  ;;  %v1980_v37 = vpop.f32.mrb[31].mxu1 }
 0x133   :  { %v1981_v39 = vadd.f32 %v1980_v37, %v1979_v32 }
 0x134   :  { %v1430_v18 = vadd.f32 %v1978_v31, %v1365_v34  ;;  %v1368_v40 = vadd.f32 %v1941_v35, %v2766_v38 }
 0x136   :  { %v1433_v41 = vadd.f32 %v1981_v39, %v1368_v40  ;;  %v1998_v42 = vpop.f32.mrb[32].mxu0 }
 0x137   :  { %v2038_v20 = vpop.f32.mrb[32].mxu1  ;;  %v1999_v43 = vpop.f32.mrb[33].mxu0 }
 0x138   :  { %v2000_v44 = vadd.f32 %v1999_v43, %v1998_v42  ;;  %v2039_v45 = vpop.f32.mrb[33].mxu1  ;;  %v2001_v47 = vpop.f32.mrb[34].mxu0 }
 0x139   :  { %v2040_v48 = vadd.f32 %v2039_v45, %v2038_v20  ;;  %v2041_v49 = vpop.f32.mrb[34].mxu1  ;;  %v2002_v50 = vpop.f32.mrb[35].mxu0 }
 0x13a   :  { %v1471_v51 = vadd.f32 %v2000_v44, %v1406_v52  ;;  %v2003_v53 = vadd.f32 %v2002_v50, %v2001_v47  ;;  %v2042_v54 = vpop.f32.mrb[35].mxu1 }
 0x13b   :  { %v2043_v36 = vadd.f32 %v2042_v54, %v2041_v49 }
 0x13c   :  { %v1474_v56 = vadd.f32 %v2003_v53, %v1409_v55  ;;  %v1536_v57 = vadd.f32 %v2040_v48, %v1471_v51 }
 0x13e   :  { %v2004_v58 = vpop.f32.mrb[36].mxu0  ;;  %v2774_v59 = vadd.f32 %v2043_v36, %v1474_v56 }
 0x13f   :  { %v2044_v38 = vpop.f32.mrb[36].mxu1  ;;  %v2005_v60 = vpop.f32.mrb[37].mxu0 }
 0x140   :  { %v2006_v63 = vadd.f32 %v2005_v60, %v2004_v58  ;;  %v2045_v0 = vpop.f32.mrb[37].mxu1  ;;  %v2007_v1 = vpop.f32.mrb[38].mxu0 }
 0x141   :  { %v2046_v3 = vadd.f32 %v2045_v0, %v2044_v38  ;;  %v2047_v4 = vpop.f32.mrb[38].mxu1  ;;  %v2008_v46 = vpop.f32.mrb[39].mxu0 }
 0x142   :  { %v1479_v5 = vadd.f32 %v2006_v63, %v1414_v7  ;;  %v2009_v6 = vadd.f32 %v2008_v46, %v2007_v1  ;;  %v2048_v8 = vpop.f32.mrb[39].mxu1 }
 0x143   :  { %v2049_v52 = vadd.f32 %v2048_v8, %v2047_v4 }
 0x144   :  { %v1482_v9 = vadd.f32 %v2009_v6, %v1417_v61  ;;  %v1544_v10 = vadd.f32 %v2046_v3, %v1479_v5 }
 0x146   :  { %v2010_v11 = vpop.f32.mrb[40].mxu0  ;;  %v1547_v55 = vadd.f32 %v2049_v52, %v1482_v9 }
 0x147   :  { %v2050_v12 = vpop.f32.mrb[40].mxu1  ;;  %v2011_v13 = vpop.f32.mrb[41].mxu0 }
 0x148   :  { %v2012_v14 = vadd.f32 %v2011_v13, %v2010_v11  ;;  %v2051_v15 = vpop.f32.mrb[41].mxu1  ;;  %v2013_v16 = vpop.f32.mrb[42].mxu0 }
 0x149   :  { %v2052_v17 = vadd.f32 %v2051_v15, %v2050_v12  ;;  %v2053_v19 = vpop.f32.mrb[42].mxu1  ;;  %v2014_v21 = vpop.f32.mrb[43].mxu0 }
 0x14a   :  { %v1487_v62 = vadd.f32 %v2012_v14, %v1422_v23  ;;  %v2015_v22 = vadd.f32 %v2014_v21, %v2013_v16  ;;  %v2054_v24 = vpop.f32.mrb[43].mxu1 }
 0x14b   :  { %v2055_v2 = vadd.f32 %v2054_v24, %v2053_v19 }
 0x14c   :  { %v1490_v7 = vadd.f32 %v2015_v22, %v1425_v25  ;;  %v1552_v26 = vadd.f32 %v2052_v17, %v1487_v62 }
 0x14e   :  { %v2016_v27 = vpop.f32.mrb[44].mxu0  ;;  %v1555_v28 = vadd.f32 %v2055_v2, %v1490_v7 }
 0x14f   :  { %v2056_v61 = vpop.f32.mrb[44].mxu1  ;;  %v2017_v29 = vpop.f32.mrb[45].mxu0 }
 0x150   :  { %v2018_v30 = vadd.f32 %v2017_v29, %v2016_v27  ;;  %v2057_v31 = vpop.f32.mrb[45].mxu1  ;;  %v2019_v32 = vpop.f32.mrb[46].mxu0 }
 0x151   :  { %v2058_v33 = vadd.f32 %v2057_v31, %v2056_v61  ;;  %v2059_v34 = vpop.f32.mrb[46].mxu1  ;;  %v2020_v35 = vpop.f32.mrb[47].mxu0 }
 0x152   :  { %v1495_v37 = vadd.f32 %v2018_v30, %v1430_v18  ;;  %v2021_v39 = vadd.f32 %v2020_v35, %v2019_v32  ;;  %v2060_v40 = vpop.f32.mrb[47].mxu1 }
 0x153   :  { %v2061_v42 = vadd.f32 %v2060_v40, %v2059_v34 }
 0x154   :  { %v1498_v23 = vadd.f32 %v2021_v39, %v1433_v41  ;;  %v1560_v20 = vadd.f32 %v2058_v33, %v1495_v37 }
 0x156   :  { %v2074_v43 = vpop.f32.mrb[48].mxu0  ;;  %v1563_v44 = vadd.f32 %v2061_v42, %v1498_v23 }
 0x157   :  { %v1609_v25 = vadd.f32 %v2074_v43, %v1544_v10  ;;  %v2078_v45 = vpop.f32.mrb[48].mxu1  ;;  %v1600_v47 = vpop.f32.mrb[49].mxu0 }
 0x158   :  { %v1625_v48 = vadd.f32 %v2078_v45, %v1560_v20  ;;  %v1601_v49 = vadd.f32 %v1600_v47, %v1536_v57  ;;  %v1616_v50 = vpop.f32.mrb[49].mxu1  ;;  %v2075_v51 = vpop.f32.mrb[50].mxu0 }
 0x159   :  { %vm1633_vm2 = vcmp.gt.f32.partialorder %v1609_v25, 0.0  ;;  %v1641_v53 = vmul.f32 0.01, %v1609_v25  ;;  %v1617_v54 = vadd.f32 %v1616_v50, %v1552_v26  ;;  %v1612_v36 = vadd.f32 %v2075_v51, %v1547_v55  ;;  %v2079_v18 = vpop.f32.mrb[50].mxu1  ;;  %v1603_v56 = vpop.f32.mrb[51].mxu0 }
 0x15a   :  { %vm1637_vm3 = vcmp.gt.f32.partialorder %v1625_v48, 0.0  ;;  %v1645_v58 = vmul.f32 0.01, %v1625_v48  ;;  %vm1631_vm4 = vcmp.gt.f32.partialorder %v1601_v49, 0.0  ;;  %v1639_v41 = vmul.f32 0.01, %v1601_v49 }
 0x15b   :  { %v1649_v38 = vsel %vm1633_vm2, %v1609_v25, %v1641_v53  ;;  %vm1635_vm5 = vcmp.gt.f32.partialorder %v1617_v54, 0.0  ;;  %v1643_v60 = vmul.f32 0.01, %v1617_v54  ;;  %vm1634_vm6 = vcmp.gt.f32.partialorder %v1612_v36, 0.0  ;;  %v1619_v63 = vpop.f32.mrb[51].mxu1 }
 0x15c   :  { %1658 = vst.msk [vmem:[%s2812_s3 + $0x10] sm:$0xff] %vm1655_vm1, %v1649_v38  ;;  %v1653_v57 = vsel %vm1637_vm3, %v1625_v48, %v1645_v58  ;;  %v1647_v0 = vsel %vm1631_vm4, %v1601_v49, %v1639_v41  ;;  %v1642_v1 = vmul.f32 0.01, %v1612_v36  ;;  %v1628_v3 = vadd.f32 %v2079_v18, %v1563_v44 }
 0x15d   :  { %1662 = vst.msk [vmem:[%s2812_s3 + $0x30] sm:$0xff] %vm1655_vm1, %v1653_v57  ;;  %1656 = vst.msk [vmem:[%s2812_s3] sm:$0xff] %vm1655_vm1, %v1647_v0  ;;  %v1651_v4 = vsel %vm1635_vm5, %v1617_v54, %v1643_v60  ;;  %v1604_v46 = vadd.f32 %v1603_v56, %v2774_v59  ;;  %v1620_v5 = vadd.f32 %v1619_v63, %v1555_v28 }
 0x15e   :  { %1660 = vst.msk [vmem:[%s2812_s3 + $0x20] sm:$0xff] %vm1655_vm1, %v1651_v4  ;;  %v1650_v6 = vsel %vm1634_vm6, %v1612_v36, %v1642_v1  ;;  %vm1638_vm7 = vcmp.gt.f32.partialorder %v1628_v3, 0.0  ;;  %v1646_v8 = vmul.f32 0.01, %v1628_v3 }
 0x15f   :  { %1659 = vst.msk [vmem:[%s2812_s3 + $0x18] sm:$0xff] %vm1655_vm1, %v1650_v6  ;;  %vm1632_vm8 = vcmp.gt.f32.partialorder %v1604_v46, 0.0  ;;  %v1640_v52 = vmul.f32 0.01, %v1604_v46  ;;  %vm1636_vm9 = vcmp.gt.f32.partialorder %v1620_v5, 0.0 }
 0x160   :  { %v1644_v9 = vmul.f32 0.01, %v1620_v5  ;;  %v1654_v10 = vsel %vm1638_vm7, %v1628_v3, %v1646_v8 }
 0x161   :  { %1663 = vst.msk [vmem:[%s2812_s3 + $0x38] sm:$0xff] %vm1655_vm1, %v1654_v10  ;;  %v1648_v59 = vsel %vm1632_vm8, %v1604_v46, %v1640_v52 }
 0x162   :  { %v1652_v11 = vsel %vm1636_vm9, %v1620_v5, %v1644_v9  ;;  %1657 = vst.msk [vmem:[%s2812_s3 + $0x8] sm:$0xff] %vm1655_vm1, %v1648_v59 }
 0x163   :  { %1661 = vst.msk [vmem:[%s2812_s3 + $0x28] sm:$0xff] %vm1655_vm1, %v1652_v11 }

// kernel: landsat2viirs_forward.13
= control target key start
LH: loop header
LB: loop body
LE: loop exit
PB: predicated region body
PF: predicated region fallthrough
CT: control target
= control target key end

     0   :  { %v1123_v1 = vmov 0   ;;  %vm855_vm1 = vcmask 261120   ;;  %s1412_s1 = inlined_call_operand.vmem [shape: bf16[1024,32], index: 1, kind: input, shape index: {}]   ;;  %s1413_s0 = inlined_call_operand.vmem [shape: bf16[32,1024], index: 0, kind: input, shape index: {}]   ;;  %s1414_s2 = inlined_call_operand.vmem [shape: f32[32,1], index: 2, kind: input, shape index: {}]   ;;  %s1415_s3 = inlined_call_operand.vmem [shape: f32[32,32], index: 3, kind: output, shape index: {}]  }
   0x1   :  { %v1059_v0 = vld [vmem:[%s1412_s1 + $0x40] sm:$0xff]   ;;  %1057 = vset.pattern.permute.xlu0 %v1123_v1  ;;  %1058 = vset.pattern.permute.xlu1 %v1123_v1  ;;  %v1063_v5 = vld [vmem:[%s1412_s1 + $0x48] sm:$0xff]   ;;  %v1067_v9 = vld [vmem:[%s1412_s1 + $0x50] sm:$0xff]  }
   0x2   :  { %v1060_v2 = vld [vmem:[%s1412_s1 + $0xc0] sm:$0xff]   ;;  %944 = vmatprep.subr.bf16.mxu0 %v1059_v0  ;;  %v1064_v6 = vld [vmem:[%s1412_s1 + $0xc8] sm:$0xff]   ;;  %v1068_v10 = vld [vmem:[%s1412_s1 + $0xd0] sm:$0xff]  }
   0x3   :  { %v1061_v3 = vld [vmem:[%s1412_s1] sm:$0xff]   ;;  %972 = vmatprep.subr.bf16.mxu1 %v1060_v2  ;;  %v1065_v7 = vld [vmem:[%s1412_s1 + $0x8] sm:$0xff]   ;;  %v1069_v11 = vld [vmem:[%s1412_s1 + $0x10] sm:$0xff]  }
   0x4   :  { %v1062_v4 = vld [vmem:[%s1412_s1 + $0x80] sm:$0xff]   ;;  %945 = vmatpush3.bf16.msra.mxu0 %v1061_v3  ;;  %v1066_v8 = vld [vmem:[%s1412_s1 + $0x88] sm:$0xff]   ;;  %v1070_v12 = vld [vmem:[%s1412_s1 + $0x90] sm:$0xff]  }
   0x5   :  { %973 = vmatpush3.bf16.msra.mxu1 %v1062_v4  ;;  %946 = vmatprep.subr.bf16.mxu0 %v1063_v5  ;;  %v1071_v13 = vld [vmem:[%s1412_s1 + $0x58] sm:$0xff]   ;;  %v1075_v17 = vld [vmem:[%s1412_s1 + $0x60] sm:$0xff]   ;;  %v1079_v21 = vld [vmem:[%s1412_s1 + $0x68] sm:$0xff]  }
   0x6   :  { %974 = vmatprep.subr.bf16.mxu1 %v1064_v6  ;;  %v1072_v14 = vld [vmem:[%s1412_s1 + $0xd8] sm:$0xff]   ;;  %v1076_v18 = vld [vmem:[%s1412_s1 + $0xe0] sm:$0xff]   ;;  %v1080_v22 = vld [vmem:[%s1412_s1 + $0xe8] sm:$0xff]  }
   0x7   :  { %v1073_v15 = vld [vmem:[%s1412_s1 + $0x18] sm:$0xff]   ;;  %v1077_v19 = vld [vmem:[%s1412_s1 + $0x20] sm:$0xff]   ;;  %v1081_v23 = vld [vmem:[%s1412_s1 + $0x28] sm:$0xff]  }
   0x8   :  { %947 = vmatpush3.bf16.msra.mxu0 %v1065_v7  ;;  %v1074_v16 = vld [vmem:[%s1412_s1 + $0x98] sm:$0xff]   ;;  %v1078_v20 = vld [vmem:[%s1412_s1 + $0xa0] sm:$0xff]   ;;  %v1082_v24 = vld [vmem:[%s1412_s1 + $0xa8] sm:$0xff]  }
   0x9   :  { %975 = vmatpush3.bf16.msra.mxu1 %v1066_v8  ;;  %948 = vmatprep.subr.bf16.mxu0 %v1067_v9  ;;  %v1083_v25 = vld [vmem:[%s1412_s1 + $0x70] sm:$0xff]   ;;  %v1087_v29 = vld [vmem:[%s1412_s1 + $0x78] sm:$0xff]   ;;  %v15_v33 = vld [vmem:[%s1413_s0] sm:$0xff] }
   0xa   :  { %976 = vmatprep.subr.bf16.mxu1 %v1068_v10  ;;  %v1084_v26 = vld [vmem:[%s1412_s1 + $0xf0] sm:$0xff]   ;;  %v1088_v30 = vld [vmem:[%s1412_s1 + $0xf8] sm:$0xff]   ;;  %v19_v34 = vld [vmem:[%s1413_s0 + $0x20] sm:$0xff] }
   0xb   :  { %v1085_v27 = vld [vmem:[%s1412_s1 + $0x30] sm:$0xff]   ;;  %v1089_v31 = vld [vmem:[%s1412_s1 + $0x38] sm:$0xff]   ;;  %v16_v35 = vld [vmem:[%s1413_s0 + $0x8] sm:$0xff]  ;;  %v864_v36 = vcombine.low %v15_v33, %v19_v34  ;;  %v865_v37 = vcombine.high %v15_v33, %v19_v34 }
   0xc   :  { %949 = vmatpush3.bf16.msra.mxu0 %v1069_v11  ;;  %v1086_v28 = vld [vmem:[%s1412_s1 + $0xb0] sm:$0xff]   ;;  %v1090_v32 = vld [vmem:[%s1412_s1 + $0xb8] sm:$0xff]   ;;  %v20_v38 = vld [vmem:[%s1413_s0 + $0x28] sm:$0xff] }
   0xd   :  { %977 = vmatpush3.bf16.msra.mxu1 %v1070_v12  ;;  %950 = vmatprep.subr.bf16.mxu0 %v1071_v13  ;;  %v866_v39 = vcombine.low %v16_v35, %v20_v38  ;;  %v867_v40 = vcombine.high %v16_v35, %v20_v38  ;;  %v1091_v41 = vld [vmem:[%s1412_s1 + $0x140] sm:$0xff]   ;;  %v1095_v45 = vld [vmem:[%s1412_s1 + $0x148] sm:$0xff]   ;;  %v1099_v49 = vld [vmem:[%s1412_s1 + $0x150] sm:$0xff]  }
   0xe   :  { %978 = vmatprep.subr.bf16.mxu1 %v1072_v14  ;;  %679 = vmatprep.mubr.bf16.mxu0 %v865_v37  ;;  %v1092_v42 = vld [vmem:[%s1412_s1 + $0x1c0] sm:$0xff]   ;;  %v1096_v46 = vld [vmem:[%s1412_s1 + $0x1c8] sm:$0xff]   ;;  %v1100_v50 = vld [vmem:[%s1412_s1 + $0x1d0] sm:$0xff]  }
   0xf   :  { %728 = vmatprep.mubr.bf16.mxu1 %v867_v40  ;;  %v1093_v43 = vld [vmem:[%s1412_s1 + $0x100] sm:$0xff]   ;;  %v1097_v47 = vld [vmem:[%s1412_s1 + $0x108] sm:$0xff]   ;;  %v1101_v51 = vld [vmem:[%s1412_s1 + $0x110] sm:$0xff]  }
  0x10   :  { %951 = vmatpush3.bf16.msra.mxu0 %v1073_v15  ;;  %v1094_v44 = vld [vmem:[%s1412_s1 + $0x180] sm:$0xff]   ;;  %v1098_v48 = vld [vmem:[%s1412_s1 + $0x188] sm:$0xff]   ;;  %v1102_v52 = vld [vmem:[%s1412_s1 + $0x190] sm:$0xff]  }
  0x11   :  { %979 = vmatpush3.bf16.msra.mxu1 %v1074_v16  ;;  %952 = vmatprep.subr.bf16.mxu0 %v1075_v17  ;;  %v1103_v53 = vld [vmem:[%s1412_s1 + $0x158] sm:$0xff]   ;;  %v1107_v57 = vld [vmem:[%s1412_s1 + $0x160] sm:$0xff]   ;;  %v1111_v0 = vld [vmem:[%s1412_s1 + $0x168] sm:$0xff]  }
  0x12   :  { %980 = vmatprep.subr.bf16.mxu1 %v1076_v18  ;;  %v1104_v54 = vld [vmem:[%s1412_s1 + $0x1d8] sm:$0xff]   ;;  %v1108_v58 = vld [vmem:[%s1412_s1 + $0x1e0] sm:$0xff]   ;;  %v1112_v2 = vld [vmem:[%s1412_s1 + $0x1e8] sm:$0xff]  }
  0x13   :  { %v1105_v55 = vld [vmem:[%s1412_s1 + $0x118] sm:$0xff]   ;;  %v1109_v59 = vld [vmem:[%s1412_s1 + $0x120] sm:$0xff]   ;;  %v1113_v3 = vld [vmem:[%s1412_s1 + $0x128] sm:$0xff]  }
  0x14   :  { %953 = vmatpush3.bf16.msra.mxu0 %v1077_v19  ;;  %v1106_v56 = vld [vmem:[%s1412_s1 + $0x198] sm:$0xff]   ;;  %v1110_v60 = vld [vmem:[%s1412_s1 + $0x1a0] sm:$0xff]   ;;  %v1114_v4 = vld [vmem:[%s1412_s1 + $0x1a8] sm:$0xff]  }
  0x15   :  { %981 = vmatpush3.bf16.msra.mxu1 %v1078_v20  ;;  %954 = vmatprep.subr.bf16.mxu0 %v1079_v21  ;;  %v23_v61 = vld [vmem:[%s1413_s0 + $0x40] sm:$0xff]  ;;  %v24_v5 = vld [vmem:[%s1413_s0 + $0x48] sm:$0xff]  ;;  %v1115_v9 = vld [vmem:[%s1412_s1 + $0x170] sm:$0xff]  }
  0x16   :  { %982 = vmatprep.subr.bf16.mxu1 %v1080_v22  ;;  %v27_v62 = vld [vmem:[%s1413_s0 + $0x60] sm:$0xff]  ;;  %v28_v6 = vld [vmem:[%s1413_s0 + $0x68] sm:$0xff]  ;;  %v1116_v10 = vld [vmem:[%s1412_s1 + $0x1f0] sm:$0xff]  }
  0x17   :  { %v873_v63 = vcombine.high %v23_v61, %v27_v62  ;;  %v872_v1 = vcombine.low %v23_v61, %v27_v62  ;;  %v875_v7 = vcombine.high %v24_v5, %v28_v6  ;;  %v874_v8 = vcombine.low %v24_v5, %v28_v6  ;;  %v1117_v11 = vld [vmem:[%s1412_s1 + $0x130] sm:$0xff]   ;;  %v1119_v13 = vld [vmem:[%s1412_s1 + $0x178] sm:$0xff]   ;;  %v160_v33 = vld [vmem:[%s1414_s2 + $0x8] sm:$0xff] }
  0x18   :  { %955 = vmatpush3.bf16.msra.mxu0 %v1081_v23  ;;  %v1118_v12 = vld [vmem:[%s1412_s1 + $0x1b0] sm:$0xff]   ;;  %v1120_v14 = vld [vmem:[%s1412_s1 + $0x1f8] sm:$0xff]  }
  0x19   :  { %983 = vmatpush3.bf16.msra.mxu1 %v1082_v24  ;;  %956 = vmatprep.subr.bf16.mxu0 %v1083_v25  ;;  %v1121_v15 = vld [vmem:[%s1412_s1 + $0x138] sm:$0xff]   ;;  %v17_v17 = vld [vmem:[%s1413_s0 + $0x10] sm:$0xff] }
  0x1a   :  { %984 = vmatprep.subr.bf16.mxu1 %v1084_v26  ;;  %v1122_v16 = vld [vmem:[%s1412_s1 + $0x1b8] sm:$0xff]   ;;  %v21_v18 = vld [vmem:[%s1413_s0 + $0x30] sm:$0xff] }
  0x1b   :  { %v18_v19 = vld [vmem:[%s1413_s0 + $0x18] sm:$0xff]  ;;  %v868_v21 = vcombine.low %v17_v17, %v21_v18  ;;  %v869_v22 = vcombine.high %v17_v17, %v21_v18  ;;  %v25_v25 = vld [vmem:[%s1413_s0 + $0x50] sm:$0xff] }
  0x1c   :  { %957 = vmatpush3.bf16.msra.mxu0 %v1085_v27  ;;  %v22_v20 = vld [vmem:[%s1413_s0 + $0x38] sm:$0xff]  ;;  %v29_v26 = vld [vmem:[%s1413_s0 + $0x70] sm:$0xff] }
  0x1d   :  { %985 = vmatpush3.bf16.msra.mxu1 %v1086_v28  ;;  %958 = vmatprep.subr.bf16.mxu0 %v1087_v29  ;;  %v870_v23 = vcombine.low %v18_v19, %v22_v20  ;;  %v871_v24 = vcombine.high %v18_v19, %v22_v20  ;;  %v26_v27 = vld [vmem:[%s1413_s0 + $0x58] sm:$0xff]  ;;  %v877_v28 = vcombine.high %v25_v25, %v29_v26 }
  0x1e   :  { %986 = vmatprep.subr.bf16.mxu1 %v1088_v30  ;;  %v30_v29 = vld [vmem:[%s1413_s0 + $0x78] sm:$0xff]  ;;  %v876_v35 = vcombine.low %v25_v25, %v29_v26 }
  0x1f   :  { %v879_v30 = vcombine.high %v26_v27, %v30_v29  ;;  %v162_v34 = vld [vmem:[%s1414_s2 + $0x18] sm:$0xff] }
  0x20   :  { %959 = vmatpush3.bf16.msra.mxu0 %v1089_v31  ;;  %v159_v31 = vld [vmem:[%s1414_s2] sm:$0xff] }
  0x21   :  { %987 = vmatpush3.bf16.msra.mxu1 %v1090_v32  ;;  %1000 = vmatprep.subr.bf16.mxu0 %v1091_v41  ;;  %v161_v32 = vld [vmem:[%s1414_s2 + $0x10] sm:$0xff] }
  0x22   :  { %1028 = vmatprep.subr.bf16.mxu1 %v1092_v42  ;;  %165 = vperm.xlu0 %1057, %v159_v31  }
  0x23   :  { %680 = vmatmul.mubr.bf16.vlgmr.msra.gmra.mrb[0].mxu0 %v864_v36  ;;  %175 = vperm.xlu1 %1058, %v161_v32   ;;  %v878_v36 = vcombine.low %v26_v27, %v30_v29 }
  0x24   :  { %729 = vmatmul.mubr.bf16.vlgmr.msra.gmra.mrb[0].mxu1 %v866_v39  ;;  %1001 = vmatpush3.bf16.msra.mxu0 %v1093_v43 }
  0x25   :  { %1029 = vmatpush3.bf16.msra.mxu1 %v1094_v44  ;;  %1002 = vmatprep.subr.bf16.mxu0 %v1095_v45 }
  0x26   :  { %1030 = vmatprep.subr.bf16.mxu1 %v1096_v46  ;;  %687 = vmatprep.mubr.bf16.mxu0 %v873_v63 }
  0x27   :  { %736 = vmatprep.mubr.bf16.mxu1 %v875_v7  ;;  %170 = vperm.xlu0 %1057, %v160_v33  }
  0x28   :  { %1003 = vmatpush3.bf16.msra.mxu0 %v1097_v47  ;;  %180 = vperm.xlu1 %1058, %v162_v34  }
  0x29   :  { %1031 = vmatpush3.bf16.msra.mxu1 %v1098_v48  ;;  %1004 = vmatprep.subr.bf16.mxu0 %v1099_v49 }
  0x2a   :  { %1032 = vmatprep.subr.bf16.mxu1 %v1100_v50 }
  0x2b   :  { %688 = vmatmul.mubr.bf16.gmra.mrb[4].mxu0 %v872_v1 }
  0x2c   :  { %1005 = vmatpush3.bf16.msra.mxu0 %v1101_v51  ;;  %737 = vmatmul.mubr.bf16.gmra.mrb[4].mxu1 %v874_v8 }
  0x2d   :  { %1033 = vmatpush3.bf16.msra.mxu1 %v1102_v52  ;;  %1006 = vmatprep.subr.bf16.mxu0 %v1103_v53 }
  0x2e   :  { %1034 = vmatprep.subr.bf16.mxu1 %v1104_v54  ;;  %777 = vmatprep.mubr.bf16.mxu0 %v869_v22 }
  0x2f   :  { %826 = vmatprep.mubr.bf16.mxu1 %v871_v24 }
  0x30   :  { %1007 = vmatpush3.bf16.msra.mxu0 %v1105_v55 }
  0x31   :  { %1035 = vmatpush3.bf16.msra.mxu1 %v1106_v56  ;;  %1008 = vmatprep.subr.bf16.mxu0 %v1107_v57 }
  0x32   :  { %1036 = vmatprep.subr.bf16.mxu1 %v1108_v58 }
  0x34   :  { %1009 = vmatpush3.bf16.msra.mxu0 %v1109_v59 }
  0x35   :  { %1037 = vmatpush3.bf16.msra.mxu1 %v1110_v60  ;;  %1010 = vmatprep.subr.bf16.mxu0 %v1111_v0 }
  0x36   :  { %1038 = vmatprep.subr.bf16.mxu1 %v1112_v2 }
  0x38   :  { %1011 = vmatpush3.bf16.msra.mxu0 %v1113_v3 }
  0x39   :  { %1039 = vmatpush3.bf16.msra.mxu1 %v1114_v4  ;;  %1012 = vmatprep.subr.bf16.mxu0 %v1115_v9 }
  0x3a   :  { %1040 = vmatprep.subr.bf16.mxu1 %v1116_v10 }
  0x3c   :  { %1013 = vmatpush3.bf16.msra.mxu0 %v1117_v11 }
  0x3d   :  { %1041 = vmatpush3.bf16.msra.mxu1 %v1118_v12  ;;  %1014 = vmatprep.subr.bf16.mxu0 %v1119_v13 }
  0x3e   :  { %1042 = vmatprep.subr.bf16.mxu1 %v1120_v14 }
  0x40   :  { %1015 = vmatpush3.bf16.msra.mxu0 %v1121_v15 }
  0x41   :  { %1043 = vmatpush3.bf16.msra.mxu1 %v1122_v16 }
  0x43   :  { %778 = vmatmul.mubr.bf16.vlgmr.msra.gmra.mrb[8].mxu0 %v868_v21 }
  0x44   :  { %827 = vmatmul.mubr.bf16.vlgmr.msra.gmra.mrb[8].mxu1 %v870_v23  ;;  %785 = vmatprep.mubr.bf16.mxu0 %v877_v28 }
  0x45   :  { %834 = vmatprep.mubr.bf16.mxu1 %v879_v30 }
  0x4b   :  { %786 = vmatmul.mubr.bf16.gmra.mrb[12].mxu0 %v876_v35 }
  0x4c   :  { %835 = vmatmul.mubr.bf16.gmra.mrb[12].mxu1 %v878_v36 }
  0xa1   :  { %v166_v37 = vpop.permute.xlu0 %165 }
  0xa2   :  { %v176_v55 = vpop.permute.xlu1 %175 }
  0xa6   :  { %v171_v39 = vpop.permute.xlu0 %170 }
  0xa7   :  { %v181_v62 = vpop.permute.xlu1 %180 }
  0xf6   :  { %v960_v38 = vpop.f32.mrb[0].mxu0 }
  0xf7   :  { %v988_v40 = vpop.f32.mrb[0].mxu1  ;;  %v961_v41 = vpop.f32.mrb[1].mxu0 }
  0xf8   :  { %v962_v42 = vadd.f32 %v961_v41, %v960_v38  ;;  %v989_v43 = vpop.f32.mrb[1].mxu1  ;;  %v963_v44 = vpop.f32.mrb[2].mxu0 }
  0xf9   :  { %v990_v45 = vadd.f32 %v989_v43, %v988_v40  ;;  %v991_v46 = vpop.f32.mrb[2].mxu1  ;;  %v964_v47 = vpop.f32.mrb[3].mxu0 }
  0xfa   :  { %v682_v48 = vadd.f32 %v962_v42, %v166_v37  ;;  %v965_v49 = vadd.f32 %v964_v47, %v963_v44  ;;  %v992_v50 = vpop.f32.mrb[3].mxu1 }
  0xfb   :  { %v993_v51 = vadd.f32 %v992_v50, %v991_v46 }
  0xfc   :  { %v731_v52 = vadd.f32 %v990_v45, %v682_v48  ;;  %v685_v53 = vadd.f32 %v965_v49, %v171_v39 }
  0xfe   :  { %v734_v54 = vadd.f32 %v993_v51, %v685_v53  ;;  %v966_v56 = vpop.f32.mrb[4].mxu0 }
  0xff   :  { %v967_v57 = vpop.f32.mrb[5].mxu0  ;;  %v994_v0 = vpop.f32.mrb[4].mxu1 }
 0x100   :  { %v968_v58 = vadd.f32 %v967_v57, %v966_v56  ;;  %v969_v59 = vpop.f32.mrb[6].mxu0  ;;  %v995_v1 = vpop.f32.mrb[5].mxu1 }
 0x101   :  { %v970_v60 = vpop.f32.mrb[7].mxu0  ;;  %v996_v2 = vadd.f32 %v995_v1, %v994_v0  ;;  %v997_v3 = vpop.f32.mrb[6].mxu1 }
 0x102   :  { %v971_v61 = vadd.f32 %v970_v60, %v969_v59  ;;  %v690_v63 = vadd.f32 %v968_v58, %v176_v55  ;;  %v998_v5 = vpop.f32.mrb[7].mxu1 }
 0x103   :  { %v999_v7 = vadd.f32 %v998_v5, %v997_v3 }
 0x104   :  { %v693_v4 = vadd.f32 %v971_v61, %v181_v62  ;;  %v739_v6 = vadd.f32 %v996_v2, %v690_v63 }
 0x106   :  { %v742_v8 = vadd.f32 %v999_v7, %v693_v4 }
 0x116   :  { %v1016_v9 = vpop.f32.mrb[8].mxu0 }
 0x117   :  { %v1044_v10 = vpop.f32.mrb[8].mxu1  ;;  %v1017_v11 = vpop.f32.mrb[9].mxu0 }
 0x118   :  { %v1045_v12 = vpop.f32.mrb[9].mxu1  ;;  %v1018_v13 = vadd.f32 %v1017_v11, %v1016_v9  ;;  %v1019_v15 = vpop.f32.mrb[10].mxu0 }
 0x119   :  { %v1046_v14 = vadd.f32 %v1045_v12, %v1044_v10  ;;  %v1047_v16 = vpop.f32.mrb[10].mxu1  ;;  %v1020_v17 = vpop.f32.mrb[11].mxu0 }
 0x11a   :  { %v1048_v18 = vpop.f32.mrb[11].mxu1  ;;  %v780_v19 = vadd.f32 %v1018_v13, %v731_v52  ;;  %v1021_v20 = vadd.f32 %v1020_v17, %v1019_v15 }
 0x11b   :  { %v1049_v21 = vadd.f32 %v1048_v18, %v1047_v16 }
 0x11c   :  { %v829_v22 = vadd.f32 %v1046_v14, %v780_v19  ;;  %v783_v23 = vadd.f32 %v1021_v20, %v734_v54 }
 0x11e   :  { %vm843_vm0 = vcmp.gt.f32.partialorder %v829_v22, 0.0  ;;  %v847_v24 = vmul.f32 0.01, %v829_v22  ;;  %v832_v25 = vadd.f32 %v1049_v21, %v783_v23  ;;  %v1022_v26 = vpop.f32.mrb[12].mxu0 }
 0x11f   :  { %v1050_v27 = vpop.f32.mrb[12].mxu1  ;;  %v1023_v28 = vpop.f32.mrb[13].mxu0 }
 0x120   :  { %v1051_v29 = vpop.f32.mrb[13].mxu1  ;;  %v851_v30 = vsel %vm843_vm0, %v829_v22, %v847_v24  ;;  %vm844_vm2 = vcmp.gt.f32.partialorder %v832_v25, 0.0  ;;  %v848_v31 = vmul.f32 0.01, %v832_v25  ;;  %v1024_v32 = vadd.f32 %v1023_v28, %v1022_v26  ;;  %v1025_v33 = vpop.f32.mrb[14].mxu0 }
 0x121   :  { %v1053_v34 = vpop.f32.mrb[14].mxu1  ;;  %856 = vst.msk [vmem:[%s1415_s3] sm:$0xff] %vm855_vm1, %v851_v30  ;;  %v1052_v35 = vadd.f32 %v1051_v29, %v1050_v27  ;;  %v1026_v36 = vpop.f32.mrb[15].mxu0 }
 0x122   :  { %v1054_v37 = vpop.f32.mrb[15].mxu1  ;;  %v852_v38 = vsel %vm844_vm2, %v832_v25, %v848_v31  ;;  %v788_v39 = vadd.f32 %v1024_v32, %v739_v6  ;;  %v1027_v40 = vadd.f32 %v1026_v36, %v1025_v33 }
 0x123   :  { %v1055_v41 = vadd.f32 %v1054_v37, %v1053_v34  ;;  %857 = vst.msk [vmem:[%s1415_s3 + $0x8] sm:$0xff] %vm855_vm1, %v852_v38 }
 0x124   :  { %v837_v42 = vadd.f32 %v1052_v35, %v788_v39  ;;  %v791_v43 = vadd.f32 %v1027_v40, %v742_v8 }
 0x126   :  { %vm845_vm3 = vcmp.gt.f32.partialorder %v837_v42, 0.0  ;;  %v849_v44 = vmul.f32 0.01, %v837_v42  ;;  %v840_v45 = vadd.f32 %v1055_v41, %v791_v43 }
 0x128   :  { %v853_v46 = vsel %vm845_vm3, %v837_v42, %v849_v44  ;;  %vm846_vm4 = vcmp.gt.f32.partialorder %v840_v45, 0.0  ;;  %v850_v47 = vmul.f32 0.01, %v840_v45 }
 0x129   :  { %858 = vst.msk [vmem:[%s1415_s3 + $0x10] sm:$0xff] %vm855_vm1, %v853_v46 }
 0x12a   :  { %v854_v48 = vsel %vm846_vm4, %v840_v45, %v850_v47 }
 0x12b   :  { %859 = vst.msk [vmem:[%s1415_s3 + $0x18] sm:$0xff] %vm855_vm1, %v854_v48 }

// kernel: landsat2viirs_forward.14
= control target key start
LH: loop header
LB: loop body
LE: loop exit
PB: predicated region body
PF: predicated region fallthrough
CT: control target
= control target key end

     0   :  { %v721_v1 = vmov 0   ;;  %vm533_vm2 = vcmask 588800   ;;  %s964_s1 = inlined_call_operand.vmem [shape: bf16[512,200], index: 1, kind: input, shape index: {}]   ;;  %s965_s0 = inlined_call_operand.vmem [shape: bf16[16,512], index: 0, kind: input, shape index: {}]   ;;  %s966_s2 = inlined_call_operand.vmem [shape: f32[16,1], index: 2, kind: input, shape index: {}]   ;;  %s967_s3 = inlined_call_operand.vmem [shape: f32[16,200], index: 3, kind: output, shape index: {}]  }
   0x1   :  { %v619_v0 = vld [vmem:[%s964_s1 + $0x4] ss:$8 sps:$4 sm:$0xff]   ;;  %618 = vset.pattern.permute.xlu0 %v721_v1  ;;  %v623_v3 = vld [vmem:[%s964_s1] ss:$8 sps:$4 sm:$0xff]   ;;  %v625_v5 = vld [vmem:[%s964_s1 + $0x14] ss:$8 sps:$4 sm:$0xff]  }
   0x2   :  { %v621_v2 = vld [vmem:[%s964_s1 + $0x104] ss:$8 sps:$4 sm:$0xff]   ;;  %434 = vmatprep.subr.bf16.mxu1 %v619_v0  ;;  %v624_v4 = vld [vmem:[%s964_s1 + $0x100] ss:$8 sps:$4 sm:$0xff]   ;;  %v627_v6 = vld [vmem:[%s964_s1 + $0x114] ss:$8 sps:$4 sm:$0xff]  }
   0x3   :  { %477 = vmatprep.subr.bf16.mxu0 %v621_v2  ;;  %435 = vmatpush1.bf16.msra.mxu1 %v623_v3  ;;  %v629_v7 = vld [vmem:[%s964_s1 + $0x10] ss:$8 sps:$4 sm:$0xff]   ;;  %v631_v9 = vld [vmem:[%s964_s1 + $0x24] ss:$8 sps:$4 sm:$0xff]   ;;  %v635_v11 = vld [vmem:[%s964_s1 + $0x20] ss:$8 sps:$4 sm:$0xff]  }
   0x4   :  { %478 = vmatpush1.bf16.msra.mxu0 %v624_v4  ;;  %436 = vmatprep.subr.bf16.mxu1 %v625_v5  ;;  %v630_v8 = vld [vmem:[%s964_s1 + $0x110] ss:$8 sps:$4 sm:$0xff]   ;;  %v633_v10 = vld [vmem:[%s964_s1 + $0x124] ss:$8 sps:$4 sm:$0xff]   ;;  %v636_v12 = vld [vmem:[%s964_s1 + $0x120] ss:$8 sps:$4 sm:$0xff]  }
   0x5   :  { %479 = vmatprep.subr.bf16.mxu0 %v627_v6  ;;  %v637_v13 = vld [vmem:[%s964_s1 + $0x34] ss:$8 sps:$4 sm:$0xff]   ;;  %v641_v15 = vld [vmem:[%s964_s1 + $0x30] ss:$8 sps:$4 sm:$0xff]   ;;  %v643_v17 = vld [vmem:[%s964_s1 + $0x44] ss:$8 sps:$4 sm:$0xff]  }
   0x6   :  { %v639_v14 = vld [vmem:[%s964_s1 + $0x134] ss:$8 sps:$4 sm:$0xff]   ;;  %v642_v16 = vld [vmem:[%s964_s1 + $0x130] ss:$8 sps:$4 sm:$0xff]   ;;  %v645_v18 = vld [vmem:[%s964_s1 + $0x144] ss:$8 sps:$4 sm:$0xff]  }
   0x7   :  { %437 = vmatpush1.bf16.msra.mxu1 %v629_v7  ;;  %v647_v19 = vld [vmem:[%s964_s1 + $0x40] ss:$8 sps:$4 sm:$0xff]   ;;  %v649_v21 = vld [vmem:[%s964_s1 + $0x54] ss:$8 sps:$4 sm:$0xff]   ;;  %v653_v23 = vld [vmem:[%s964_s1 + $0x50] ss:$8 sps:$4 sm:$0xff]  }
   0x8   :  { %480 = vmatpush1.bf16.msra.mxu0 %v630_v8  ;;  %438 = vmatprep.subr.bf16.mxu1 %v631_v9  ;;  %v648_v20 = vld [vmem:[%s964_s1 + $0x140] ss:$8 sps:$4 sm:$0xff]   ;;  %v651_v22 = vld [vmem:[%s964_s1 + $0x154] ss:$8 sps:$4 sm:$0xff]   ;;  %v654_v24 = vld [vmem:[%s964_s1 + $0x150] ss:$8 sps:$4 sm:$0xff]  }
   0x9   :  { %481 = vmatprep.subr.bf16.mxu0 %v633_v10  ;;  %v655_v25 = vld [vmem:[%s964_s1 + $0x64] ss:$8 sps:$4 sm:$0xff]   ;;  %v659_v27 = vld [vmem:[%s964_s1 + $0x60] ss:$8 sps:$4 sm:$0xff]   ;;  %v661_v29 = vld [vmem:[%s964_s1 + $0x74] ss:$8 sps:$4 sm:$0xff]  }
   0xa   :  { %v657_v26 = vld [vmem:[%s964_s1 + $0x164] ss:$8 sps:$4 sm:$0xff]   ;;  %v660_v28 = vld [vmem:[%s964_s1 + $0x160] ss:$8 sps:$4 sm:$0xff]   ;;  %v663_v30 = vld [vmem:[%s964_s1 + $0x174] ss:$8 sps:$4 sm:$0xff]  }
   0xb   :  { %439 = vmatpush1.bf16.msra.mxu1 %v635_v11  ;;  %v665_v31 = vld [vmem:[%s964_s1 + $0x70] ss:$8 sps:$4 sm:$0xff]   ;;  %v667_v33 = vld [vmem:[%s964_s1 + $0x84] ss:$8 sps:$4 sm:$0xff]   ;;  %v671_v35 = vld [vmem:[%s964_s1 + $0x80] ss:$8 sps:$4 sm:$0xff]  }
   0xc   :  { %482 = vmatpush1.bf16.msra.mxu0 %v636_v12  ;;  %440 = vmatprep.subr.bf16.mxu1 %v637_v13  ;;  %v666_v32 = vld [vmem:[%s964_s1 + $0x170] ss:$8 sps:$4 sm:$0xff]   ;;  %v669_v34 = vld [vmem:[%s964_s1 + $0x184] ss:$8 sps:$4 sm:$0xff]   ;;  %v672_v36 = vld [vmem:[%s964_s1 + $0x180] ss:$8 sps:$4 sm:$0xff]  }
   0xd   :  { %483 = vmatprep.subr.bf16.mxu0 %v639_v14  ;;  %v673_v37 = vld [vmem:[%s964_s1 + $0x94] ss:$8 sps:$4 sm:$0xff]   ;;  %v677_v39 = vld [vmem:[%s964_s1 + $0x90] ss:$8 sps:$4 sm:$0xff]   ;;  %v679_v41 = vld [vmem:[%s964_s1 + $0xa4] ss:$8 sps:$4 sm:$0xff]  }
   0xe   :  { %v675_v38 = vld [vmem:[%s964_s1 + $0x194] ss:$8 sps:$4 sm:$0xff]   ;;  %v678_v40 = vld [vmem:[%s964_s1 + $0x190] ss:$8 sps:$4 sm:$0xff]   ;;  %v681_v42 = vld [vmem:[%s964_s1 + $0x1a4] ss:$8 sps:$4 sm:$0xff]  }
   0xf   :  { %441 = vmatpush1.bf16.msra.mxu1 %v641_v15  ;;  %v683_v43 = vld [vmem:[%s964_s1 + $0xa0] ss:$8 sps:$4 sm:$0xff]   ;;  %v685_v45 = vld [vmem:[%s964_s1 + $0xb4] ss:$8 sps:$4 sm:$0xff]   ;;  %v689_v47 = vld [vmem:[%s964_s1 + $0xb0] ss:$8 sps:$4 sm:$0xff]  }
  0x10   :  { %484 = vmatpush1.bf16.msra.mxu0 %v642_v16  ;;  %442 = vmatprep.subr.bf16.mxu1 %v643_v17  ;;  %v684_v44 = vld [vmem:[%s964_s1 + $0x1a0] ss:$8 sps:$4 sm:$0xff]   ;;  %v687_v46 = vld [vmem:[%s964_s1 + $0x1b4] ss:$8 sps:$4 sm:$0xff]   ;;  %v690_v48 = vld [vmem:[%s964_s1 + $0x1b0] ss:$8 sps:$4 sm:$0xff]  }
  0x11   :  { %485 = vmatprep.subr.bf16.mxu0 %v645_v18  ;;  %v717_v49 = vld [vmem:[%s965_s0 + $0x4] ss:$16 sps:$4 sm:$0xff]   ;;  %v720_v52 = vld [vmem:[%s965_s0 + $0xc] ss:$16 sps:$4 sm:$0xff]   ;;  %v695_v55 = vld [vmem:[%s964_s1 + $0xc0] ss:$8 sps:$4 sm:$0xff]  }
  0x12   :  { %v691_v50 = vld [vmem:[%s964_s1 + $0xc4] ss:$8 sps:$4 sm:$0xff]   ;;  %466 = vmatprep.mubr.bf16.mxu1 %v717_v49  ;;  %509 = vmatprep.mubr.bf16.mxu0 %v720_v52  ;;  %v696_v56 = vld [vmem:[%s964_s1 + $0x1c0] ss:$8 sps:$4 sm:$0xff]   ;;  %v697_v57 = vld [vmem:[%s964_s1 + $0xd4] ss:$8 sps:$4 sm:$0xff]  }
  0x13   :  { %443 = vmatpush1.bf16.msra.mxu1 %v647_v19  ;;  %v693_v51 = vld [vmem:[%s964_s1 + $0x1c4] ss:$8 sps:$4 sm:$0xff]   ;;  %v699_v58 = vld [vmem:[%s964_s1 + $0x1d4] ss:$8 sps:$4 sm:$0xff]   ;;  %v701_v59 = vld [vmem:[%s964_s1 + $0xd0] ss:$8 sps:$4 sm:$0xff]  }
  0x14   :  { %486 = vmatpush1.bf16.msra.mxu0 %v648_v20  ;;  %444 = vmatprep.subr.bf16.mxu1 %v649_v21  ;;  %v82_v53 = vld [vmem:[%s966_s2] sm:$0xff]  ;;  %v83_v54 = vld [vmem:[%s966_s2 + $0x8] sm:$0xff]  ;;  %v702_v60 = vld [vmem:[%s964_s1 + $0x1d0] ss:$8 sps:$4 sm:$0xff]  }
  0x15   :  { %487 = vmatprep.subr.bf16.mxu0 %v651_v22  ;;  %86 = vperm.xlu0 %618, %v82_v53   ;;  %v703_v61 = vld [vmem:[%s964_s1 + $0xe4] ss:$8 sps:$4 sm:$0xff]   ;;  %v707_v63 = vld [vmem:[%s964_s1 + $0xe0] ss:$8 sps:$4 sm:$0xff]   ;;  %v709_v1 = vld [vmem:[%s964_s1 + $0xf4] ss:$8 sps:$4 sm:$0xff]  }
  0x16   :  { %v705_v62 = vld [vmem:[%s964_s1 + $0x1e4] ss:$8 sps:$4 sm:$0xff]   ;;  %v708_v0 = vld [vmem:[%s964_s1 + $0x1e0] ss:$8 sps:$4 sm:$0xff]   ;;  %v711_v2 = vld [vmem:[%s964_s1 + $0x1f4] ss:$8 sps:$4 sm:$0xff]  }
  0x17   :  { %445 = vmatpush1.bf16.msra.mxu1 %v653_v23  ;;  %v713_v3 = vld [vmem:[%s964_s1 + $0xf0] ss:$8 sps:$4 sm:$0xff]  }
  0x18   :  { %488 = vmatpush1.bf16.msra.mxu0 %v654_v24  ;;  %446 = vmatprep.subr.bf16.mxu1 %v655_v25  ;;  %v714_v4 = vld [vmem:[%s964_s1 + $0x1f0] ss:$8 sps:$4 sm:$0xff]  }
  0x19   :  { %489 = vmatprep.subr.bf16.mxu0 %v657_v26  ;;  %91 = vperm.xlu0 %618, %v83_v54   ;;  %v715_v5 = vld [vmem:[%s965_s0] ss:$16 sps:$4 sm:$0xff]   ;;  %v718_v6 = vld [vmem:[%s965_s0 + $0x8] ss:$16 sps:$4 sm:$0xff]  }
  0x1b   :  { %447 = vmatpush1.bf16.msra.mxu1 %v659_v27 }
  0x1c   :  { %490 = vmatpush1.bf16.msra.mxu0 %v660_v28  ;;  %448 = vmatprep.subr.bf16.mxu1 %v661_v29 }
  0x1d   :  { %491 = vmatprep.subr.bf16.mxu0 %v663_v30 }
  0x1f   :  { %449 = vmatpush1.bf16.msra.mxu1 %v665_v31 }
  0x20   :  { %492 = vmatpush1.bf16.msra.mxu0 %v666_v32  ;;  %450 = vmatprep.subr.bf16.mxu1 %v667_v33 }
  0x21   :  { %493 = vmatprep.subr.bf16.mxu0 %v669_v34 }
  0x23   :  { %451 = vmatpush1.bf16.msra.mxu1 %v671_v35 }
  0x24   :  { %494 = vmatpush1.bf16.msra.mxu0 %v672_v36  ;;  %452 = vmatprep.subr.bf16.mxu1 %v673_v37 }
  0x25   :  { %495 = vmatprep.subr.bf16.mxu0 %v675_v38 }
  0x27   :  { %453 = vmatpush1.bf16.msra.mxu1 %v677_v39 }
  0x28   :  { %496 = vmatpush1.bf16.msra.mxu0 %v678_v40  ;;  %454 = vmatprep.subr.bf16.mxu1 %v679_v41 }
  0x29   :  { %497 = vmatprep.subr.bf16.mxu0 %v681_v42 }
  0x2b   :  { %455 = vmatpush1.bf16.msra.mxu1 %v683_v43 }
  0x2c   :  { %498 = vmatpush1.bf16.msra.mxu0 %v684_v44  ;;  %456 = vmatprep.subr.bf16.mxu1 %v685_v45 }
  0x2d   :  { %499 = vmatprep.subr.bf16.mxu0 %v687_v46 }
  0x2f   :  { %457 = vmatpush1.bf16.msra.mxu1 %v689_v47 }
  0x30   :  { %500 = vmatpush1.bf16.msra.mxu0 %v690_v48  ;;  %458 = vmatprep.subr.bf16.mxu1 %v691_v50 }
  0x31   :  { %501 = vmatprep.subr.bf16.mxu0 %v693_v51 }
  0x33   :  { %459 = vmatpush1.bf16.msra.mxu1 %v695_v55 }
  0x34   :  { %502 = vmatpush1.bf16.msra.mxu0 %v696_v56  ;;  %460 = vmatprep.subr.bf16.mxu1 %v697_v57 }
  0x35   :  { %503 = vmatprep.subr.bf16.mxu0 %v699_v58 }
  0x37   :  { %461 = vmatpush1.bf16.msra.mxu1 %v701_v59 }
  0x38   :  { %504 = vmatpush1.bf16.msra.mxu0 %v702_v60  ;;  %462 = vmatprep.subr.bf16.mxu1 %v703_v61 }
  0x39   :  { %505 = vmatprep.subr.bf16.mxu0 %v705_v62 }
  0x3b   :  { %463 = vmatpush1.bf16.msra.mxu1 %v707_v63 }
  0x3c   :  { %506 = vmatpush1.bf16.msra.mxu0 %v708_v0  ;;  %464 = vmatprep.subr.bf16.mxu1 %v709_v1 }
  0x3d   :  { %507 = vmatprep.subr.bf16.mxu0 %v711_v2 }
  0x3f   :  { %465 = vmatpush1.bf16.msra.mxu1 %v713_v3 }
  0x40   :  { %508 = vmatpush1.bf16.msra.mxu0 %v714_v4 }
  0x42   :  { %467 = vmatmul.mubr.bf16.vlgmr.msra.gmra.mrb[0].mxu1 %v715_v5 }
  0x43   :  { %510 = vmatmul.mubr.bf16.vlgmr.msra.gmra.mrb[0].mxu0 %v718_v6 }
  0x94   :  { %v87_v7 = vpop.permute.xlu0 %86 }
  0x98   :  { %v92_v8 = vpop.permute.xlu0 %91 }
 0x115   :  { %v468_v9 = vpop.f32.mrb[0].mxu1 }
 0x116   :  { %v511_v10 = vpop.f32.mrb[0].mxu0  ;;  %v469_v11 = vadd.f32 %v468_v9, %v87_v7  ;;  %v470_v12 = vpop.f32.mrb[1].mxu1 }
 0x117   :  { %v513_v13 = vpop.f32.mrb[1].mxu0  ;;  %v471_v14 = vadd.f32 %v470_v12, %v87_v7  ;;  %v472_v15 = vpop.f32.mrb[2].mxu1 }
 0x118   :  { %v515_v16 = vpop.f32.mrb[2].mxu0  ;;  %v512_v17 = vadd.f32 %v511_v10, %v469_v11  ;;  %v473_v18 = vadd.f32 %v472_v15, %v92_v8  ;;  %v474_v19 = vpop.f32.mrb[3].mxu1 }
 0x119   :  { %v517_v20 = vpop.f32.mrb[3].mxu0  ;;  %v514_v21 = vadd.f32 %v513_v13, %v471_v14  ;;  %v475_v22 = vadd.f32 %v474_v19, %v92_v8 }
 0x11a   :  { %vm520_vm0 = vcmp.gt.f32.partialorder %v512_v17, 0.0  ;;  %v524_v23 = vmul.f32 0.01, %v512_v17  ;;  %v516_v24 = vadd.f32 %v515_v16, %v473_v18 }
 0x11b   :  { %vm521_vm1 = vcmp.gt.f32.partialorder %v514_v21, 0.0  ;;  %v525_v25 = vmul.f32 0.01, %v514_v21  ;;  %v518_v26 = vadd.f32 %v517_v20, %v475_v22 }
 0x11c   :  { %v528_v27 = vsel %vm520_vm0, %v512_v17, %v524_v23  ;;  %vm522_vm3 = vcmp.gt.f32.partialorder %v516_v24, 0.0  ;;  %v526_v28 = vmul.f32 0.01, %v516_v24 }
 0x11d   :  { %532 = vst [vmem:[%s967_s3] sm:$0xff] %v528_v27  ;;  %v529_v29 = vsel %vm521_vm1, %v514_v21, %v525_v25  ;;  %vm523_vm4 = vcmp.gt.f32.partialorder %v518_v26, 0.0  ;;  %v527_v30 = vmul.f32 0.01, %v518_v26 }
 0x11e   :  { %534 = vst.msk [vmem:[%s967_s3 + $0x8] sm:$0xff] %vm533_vm2, %v529_v29  ;;  %v530_v31 = vsel %vm522_vm3, %v516_v24, %v526_v28 }
 0x11f   :  { %535 = vst [vmem:[%s967_s3 + $0x10] sm:$0xff] %v530_v31  ;;  %v531_v32 = vsel %vm523_vm4, %v518_v26, %v527_v30 }
 0x120   :  { %536 = vst.msk [vmem:[%s967_s3 + $0x18] sm:$0xff] %vm533_vm2, %v531_v32 }

// kernel: landsat2viirs_forward.15
= control target key start
LH: loop header
LB: loop body
LE: loop exit
PB: predicated region body
PF: predicated region fallthrough
CT: control target
= control target key end

     0   :  { %v2101_v14 = vmov 0   ;;  %v224_v39 = vlaneseq  ;;  %v2102_v40 = vmov 1966171168   ;;  %vm1156_vm0 = vcmask 130048   ;;  %s2715_s1 = inlined_call_operand.vmem [shape: bf16[400,882], index: 1, kind: input, shape index: {}]   ;;  %s2716_s0 = inlined_call_operand.vmem [shape: bf16[1,400], index: 0, kind: input, shape index: {}]   ;;  %s2717_s2 = inlined_call_operand.<no memory space> [shape: f32[1,1], index: 2, kind: input, shape index: {}]   ;;  %s2718_s3 = inlined_call_operand.vmem [shape: f32[1,882], index: 3, kind: output, shape index: {}]  }
   0x1   :  { %v1823_v0 = vld [vmem:[%s2715_s1 + $0x4] ss:$28 sps:$4 sm:$0xff]   ;;  %v1825_v1 = vld [vmem:[%s2715_s1 + $0xc] ss:$28 sps:$4 sm:$0xff]   ;;  %v1829_v4 = vld [vmem:[%s2715_s1 + $0x3c] ss:$28 sps:$4 sm:$0xff]   ;;  %1822 = vset.pattern.permute.xlu0 %v2101_v14  ;;  %v238_v41 = vunpack.c.l.s4 %v2102_v40  ;;  %v8_v62 = vstv %s2717_s2 }
   0x2   :  { %1160 = vmatprep.subr.bf16.mxu0 %v1823_v0  ;;  %v1827_v2 = vld [vmem:[%s2715_s1] ss:$28 sps:$4 sm:$0xff]   ;;  %v1828_v3 = vld [vmem:[%s2715_s1 + $0x8] ss:$28 sps:$4 sm:$0xff]   ;;  %1242 = vmatprep.subr.bf16.mxu1 %v1825_v1  ;;  %v1833_v6 = vld [vmem:[%s2715_s1 + $0x38] ss:$28 sps:$4 sm:$0xff]  }
   0x3   :  { %1161 = vmatpush1.bf16.msra.mxu0 %v1827_v2  ;;  %1243 = vmatpush1.bf16.msra.mxu1 %v1828_v3  ;;  %v1831_v5 = vld [vmem:[%s2715_s1 + $0x44] ss:$28 sps:$4 sm:$0xff]   ;;  %v1835_v8 = vld [vmem:[%s2715_s1 + $0x74] ss:$28 sps:$4 sm:$0xff]   ;;  %v1837_v9 = vld [vmem:[%s2715_s1 + $0x7c] ss:$28 sps:$4 sm:$0xff]   ;;  %v239_v47 = vunpack.c.0.s8 %v238_v41 }
   0x4   :  { %1162 = vmatprep.subr.bf16.mxu0 %v1829_v4  ;;  %v1834_v7 = vld [vmem:[%s2715_s1 + $0x40] ss:$28 sps:$4 sm:$0xff]   ;;  %1244 = vmatprep.subr.bf16.mxu1 %v1831_v5  ;;  %v1839_v10 = vld [vmem:[%s2715_s1 + $0x70] ss:$28 sps:$4 sm:$0xff]   ;;  %v1840_v11 = vld [vmem:[%s2715_s1 + $0x78] ss:$28 sps:$4 sm:$0xff]  }
   0x5   :  { %v1841_v12 = vld [vmem:[%s2715_s1 + $0xac] ss:$28 sps:$4 sm:$0xff]   ;;  %v1843_v13 = vld [vmem:[%s2715_s1 + $0xb4] ss:$28 sps:$4 sm:$0xff]   ;;  %v1847_v17 = vld [vmem:[%s2715_s1 + $0xe4] ss:$28 sps:$4 sm:$0xff]  }
   0x6   :  { %v1845_v15 = vld [vmem:[%s2715_s1 + $0xa8] ss:$28 sps:$4 sm:$0xff]   ;;  %v1846_v16 = vld [vmem:[%s2715_s1 + $0xb0] ss:$28 sps:$4 sm:$0xff]   ;;  %v1851_v19 = vld [vmem:[%s2715_s1 + $0xe0] ss:$28 sps:$4 sm:$0xff]  }
   0x7   :  { %1163 = vmatpush1.bf16.msra.mxu0 %v1833_v6  ;;  %1245 = vmatpush1.bf16.msra.mxu1 %v1834_v7  ;;  %v1849_v18 = vld [vmem:[%s2715_s1 + $0xec] ss:$28 sps:$4 sm:$0xff]   ;;  %v1853_v21 = vld [vmem:[%s2715_s1 + $0x11c] ss:$28 sps:$4 sm:$0xff]   ;;  %v1855_v22 = vld [vmem:[%s2715_s1 + $0x124] ss:$28 sps:$4 sm:$0xff]  }
   0x8   :  { %1164 = vmatprep.subr.bf16.mxu0 %v1835_v8  ;;  %1246 = vmatprep.subr.bf16.mxu1 %v1837_v9  ;;  %v1852_v20 = vld [vmem:[%s2715_s1 + $0xe8] ss:$28 sps:$4 sm:$0xff]   ;;  %v1857_v23 = vld [vmem:[%s2715_s1 + $0x118] ss:$28 sps:$4 sm:$0xff]   ;;  %v1858_v24 = vld [vmem:[%s2715_s1 + $0x120] ss:$28 sps:$4 sm:$0xff]  }
   0x9   :  { %v1859_v25 = vld [vmem:[%s2715_s1 + $0x154] ss:$28 sps:$4 sm:$0xff]   ;;  %v1861_v26 = vld [vmem:[%s2715_s1 + $0x15c] ss:$28 sps:$4 sm:$0xff]   ;;  %v1865_v29 = vld [vmem:[%s2715_s1 + $0x18c] ss:$28 sps:$4 sm:$0xff]  }
   0xa   :  { %v1863_v27 = vld [vmem:[%s2715_s1 + $0x150] ss:$28 sps:$4 sm:$0xff]   ;;  %v1864_v28 = vld [vmem:[%s2715_s1 + $0x158] ss:$28 sps:$4 sm:$0xff]   ;;  %v1869_v31 = vld [vmem:[%s2715_s1 + $0x188] ss:$28 sps:$4 sm:$0xff]  }
   0xb   :  { %1165 = vmatpush1.bf16.msra.mxu0 %v1839_v10  ;;  %1247 = vmatpush1.bf16.msra.mxu1 %v1840_v11  ;;  %v1867_v30 = vld [vmem:[%s2715_s1 + $0x194] ss:$28 sps:$4 sm:$0xff]   ;;  %v1871_v33 = vld [vmem:[%s2715_s1 + $0x1c4] ss:$28 sps:$4 sm:$0xff]   ;;  %v1873_v34 = vld [vmem:[%s2715_s1 + $0x1cc] ss:$28 sps:$4 sm:$0xff]  }
   0xc   :  { %1166 = vmatprep.subr.bf16.mxu0 %v1841_v12  ;;  %1248 = vmatprep.subr.bf16.mxu1 %v1843_v13  ;;  %v1870_v32 = vld [vmem:[%s2715_s1 + $0x190] ss:$28 sps:$4 sm:$0xff]   ;;  %v1875_v35 = vld [vmem:[%s2715_s1 + $0x1c0] ss:$28 sps:$4 sm:$0xff]   ;;  %v1876_v36 = vld [vmem:[%s2715_s1 + $0x1c8] ss:$28 sps:$4 sm:$0xff]  }
   0xd   :  { %v1877_v37 = vld [vmem:[%s2715_s1 + $0x1fc] ss:$28 sps:$4 sm:$0xff]   ;;  %v1879_v38 = vld [vmem:[%s2715_s1 + $0x204] ss:$28 sps:$4 sm:$0xff]   ;;  %v1883_v44 = vld [vmem:[%s2715_s1 + $0x234] ss:$28 sps:$4 sm:$0xff]  }
   0xe   :  { %v1881_v42 = vld [vmem:[%s2715_s1 + $0x1f8] ss:$28 sps:$4 sm:$0xff]   ;;  %v1882_v43 = vld [vmem:[%s2715_s1 + $0x200] ss:$28 sps:$4 sm:$0xff]   ;;  %v2251_v46 = vshrl.u32 %v224_v39, 7  ;;  %vm1586_vm1 = vcmp.lt.s32.totalorder %v224_v39, 882 }
   0xf   :  { %1167 = vmatpush1.bf16.msra.mxu0 %v1845_v15  ;;  %1249 = vmatpush1.bf16.msra.mxu1 %v1846_v16  ;;  %v1885_v45 = vld [vmem:[%s2715_s1 + $0x23c] ss:$28 sps:$4 sm:$0xff]   ;;  %v1887_v48 = vld [vmem:[%s2715_s1 + $0x230] ss:$28 sps:$4 sm:$0xff]   ;;  %v1893_v54 = vld [vmem:[%s2715_s1 + $0x268] ss:$28 sps:$4 sm:$0xff]  }
  0x10   :  { %1168 = vmatprep.subr.bf16.mxu0 %v1847_v17  ;;  %1250 = vmatprep.subr.bf16.mxu1 %v1849_v18  ;;  %v1888_v49 = vld [vmem:[%s2715_s1 + $0x238] ss:$28 sps:$4 sm:$0xff]   ;;  %v1889_v50 = vld [vmem:[%s2715_s1 + $0x26c] ss:$28 sps:$4 sm:$0xff]   ;;  %v2266_v52 = vsub.s32 %v239_v47, %v2251_v46  ;;  %v1895_v57 = vld [vmem:[%s2715_s1 + $0x2a4] ss:$28 sps:$4 sm:$0xff]  }
  0x11   :  { %v1891_v51 = vld [vmem:[%s2715_s1 + $0x274] ss:$28 sps:$4 sm:$0xff]   ;;  %v1593_v53 = vld.sshfl [vmem:[%s2716_s0] sm:$0x33 pattern:$0x75316420] }
  0x12   :  { %v1894_v55 = vld [vmem:[%s2715_s1 + $0x270] ss:$28 sps:$4 sm:$0xff]   ;;  %v236_v56 = vcombine.high %v1593_v53, %v1593_v53  ;;  %v1899_v60 = vld [vmem:[%s2715_s1 + $0x2a0] ss:$28 sps:$4 sm:$0xff]   ;;  %v1900_v61 = vld [vmem:[%s2715_s1 + $0x2a8] ss:$28 sps:$4 sm:$0xff]   ;;  %v2343_v15 = vrot.slane %v1593_v53, %v2266_v52 }
  0x13   :  { %1169 = vmatpush1.bf16.msra.mxu0 %v1851_v19  ;;  %1251 = vmatpush1.bf16.msra.mxu1 %v1852_v20  ;;  %v1897_v58 = vld [vmem:[%s2715_s1 + $0x2ac] ss:$28 sps:$4 sm:$0xff]   ;;  %v1901_v63 = vld [vmem:[%s2715_s1 + $0x2dc] ss:$28 sps:$4 sm:$0xff]   ;;  %v1903_v0 = vld [vmem:[%s2715_s1 + $0x2e4] ss:$28 sps:$4 sm:$0xff]  }
  0x14   :  { %1170 = vmatprep.subr.bf16.mxu0 %v1853_v21  ;;  %1252 = vmatprep.subr.bf16.mxu1 %v1855_v22  ;;  %v2284_v59 = vrot.slane %v236_v56, %v2266_v52  ;;  %9 = vst [vmem:[#allocation2] sm:$0x1] %v8_v62  ;;  %v1905_v1 = vld [vmem:[%s2715_s1 + $0x2d8] ss:$28 sps:$4 sm:$0xff]   ;;  %v1906_v2 = vld [vmem:[%s2715_s1 + $0x2e0] ss:$28 sps:$4 sm:$0xff]  }
  0x15   :  { %v1907_v3 = vld [vmem:[%s2715_s1 + $0x314] ss:$28 sps:$4 sm:$0xff]   ;;  %v1909_v4 = vld [vmem:[%s2715_s1 + $0x31c] ss:$28 sps:$4 sm:$0xff]   ;;  %v1913_v7 = vld [vmem:[%s2715_s1 + $0x34c] ss:$28 sps:$4 sm:$0xff]  }
  0x16   :  { %1192 = vmatprep.mubr.bf16.mxu0 %v2284_v59  ;;  %1274 = vmatprep.mubr.bf16.mxu1 %v2284_v59  ;;  %v1911_v5 = vld [vmem:[%s2715_s1 + $0x310] ss:$28 sps:$4 sm:$0xff]   ;;  %v1912_v6 = vld [vmem:[%s2715_s1 + $0x318] ss:$28 sps:$4 sm:$0xff]   ;;  %v1917_v9 = vld [vmem:[%s2715_s1 + $0x348] ss:$28 sps:$4 sm:$0xff]   ;;  %v2356_v19 = vcombine.high %v2284_v59, %v2284_v59 }
  0x17   :  { %1171 = vmatpush1.bf16.msra.mxu0 %v1857_v23  ;;  %1253 = vmatpush1.bf16.msra.mxu1 %v1858_v24  ;;  %v1915_v8 = vld [vmem:[%s2715_s1 + $0x354] ss:$28 sps:$4 sm:$0xff]   ;;  %v1921_v11 = vld [vmem:[%s2715_s1 + $0x384] ss:$28 sps:$4 sm:$0xff]   ;;  %v1924_v12 = vld [vmem:[%s2715_s1 + $0x38c] ss:$28 sps:$4 sm:$0xff]  }
  0x18   :  { %1172 = vmatprep.subr.bf16.mxu0 %v1859_v25  ;;  %1254 = vmatprep.subr.bf16.mxu1 %v1861_v26  ;;  %v1918_v10 = vld [vmem:[%s2715_s1 + $0x350] ss:$28 sps:$4 sm:$0xff]   ;;  %v1919_v13 = vld [vmem:[%s2715_s1 + $0x380] ss:$28 sps:$4 sm:$0xff]   ;;  %v1922_v16 = vld [vmem:[%s2715_s1 + $0x388] ss:$28 sps:$4 sm:$0xff]  }
  0x19   :  { %v1927_v17 = vld [vmem:[%s2715_s1 + $0x3bc] ss:$28 sps:$4 sm:$0xff]   ;;  %v1930_v18 = vld [vmem:[%s2715_s1 + $0x3c4] ss:$28 sps:$4 sm:$0xff]   ;;  %v1933_v22 = vld [vmem:[%s2715_s1 + $0x3f4] ss:$28 sps:$4 sm:$0xff]  }
  0x1a   :  { %v1925_v20 = vld [vmem:[%s2715_s1 + $0x3b8] ss:$28 sps:$4 sm:$0xff]   ;;  %v1928_v21 = vld [vmem:[%s2715_s1 + $0x3c0] ss:$28 sps:$4 sm:$0xff]   ;;  %v1931_v24 = vld [vmem:[%s2715_s1 + $0x3f0] ss:$28 sps:$4 sm:$0xff]  }
  0x1b   :  { %1173 = vmatpush1.bf16.msra.mxu0 %v1863_v27  ;;  %1255 = vmatpush1.bf16.msra.mxu1 %v1864_v28  ;;  %v1936_v23 = vld [vmem:[%s2715_s1 + $0x3fc] ss:$28 sps:$4 sm:$0xff]   ;;  %v1939_v26 = vld [vmem:[%s2715_s1 + $0x42c] ss:$28 sps:$4 sm:$0xff]   ;;  %v1942_v27 = vld [vmem:[%s2715_s1 + $0x434] ss:$28 sps:$4 sm:$0xff]  }
  0x1c   :  { %1174 = vmatprep.subr.bf16.mxu0 %v1865_v29  ;;  %1256 = vmatprep.subr.bf16.mxu1 %v1867_v30  ;;  %v1934_v25 = vld [vmem:[%s2715_s1 + $0x3f8] ss:$28 sps:$4 sm:$0xff]   ;;  %v1937_v28 = vld [vmem:[%s2715_s1 + $0x428] ss:$28 sps:$4 sm:$0xff]   ;;  %v1940_v29 = vld [vmem:[%s2715_s1 + $0x430] ss:$28 sps:$4 sm:$0xff]  }
  0x1d   :  { %v1945_v30 = vld [vmem:[%s2715_s1 + $0x464] ss:$28 sps:$4 sm:$0xff]   ;;  %v1960_v40 = vld [vmem:[%s2715_s1 + $0x4dc] ss:$28 sps:$4 sm:$0xff]   ;;  %v1955_v41 = vld [vmem:[%s2715_s1 + $0x4d0] ss:$28 sps:$4 sm:$0xff]  }
  0x1e   :  { %v1964_v47 = vld [vmem:[%s2715_s1 + $0x510] ss:$28 sps:$4 sm:$0xff]  }
  0x1f   :  { %1175 = vmatpush1.bf16.msra.mxu0 %v1869_v31  ;;  %1257 = vmatpush1.bf16.msra.mxu1 %v1870_v32  ;;  %v1948_v31 = vld [vmem:[%s2715_s1 + $0x46c] ss:$28 sps:$4 sm:$0xff]   ;;  %v1943_v32 = vld [vmem:[%s2715_s1 + $0x460] ss:$28 sps:$4 sm:$0xff]   ;;  %v1975_v53 = vld [vmem:[%s2715_s1 + $0x14] ss:$28 sps:$4 sm:$0xff]  }
  0x20   :  { %1176 = vmatprep.subr.bf16.mxu0 %v1871_v33  ;;  %1258 = vmatprep.subr.bf16.mxu1 %v1873_v34  ;;  %v1946_v33 = vld [vmem:[%s2715_s1 + $0x468] ss:$28 sps:$4 sm:$0xff]   ;;  %v1951_v34 = vld [vmem:[%s2715_s1 + $0x49c] ss:$28 sps:$4 sm:$0xff]   ;;  %v1973_v56 = vld [vmem:[%s2715_s1 + $0x10] ss:$28 sps:$4 sm:$0xff]  }
  0x21   :  { %v1985_v62 = vld [vmem:[%s2715_s1 + $0x50] ss:$28 sps:$4 sm:$0xff]  }
  0x23   :  { %1177 = vmatpush1.bf16.msra.mxu0 %v1875_v35  ;;  %1259 = vmatpush1.bf16.msra.mxu1 %v1876_v36  ;;  %v1954_v35 = vld [vmem:[%s2715_s1 + $0x4a4] ss:$28 sps:$4 sm:$0xff]   ;;  %v1949_v36 = vld [vmem:[%s2715_s1 + $0x498] ss:$28 sps:$4 sm:$0xff]  }
  0x24   :  { %1178 = vmatprep.subr.bf16.mxu0 %v1877_v37  ;;  %1260 = vmatprep.subr.bf16.mxu1 %v1879_v38  ;;  %v1952_v37 = vld [vmem:[%s2715_s1 + $0x4a0] ss:$28 sps:$4 sm:$0xff]   ;;  %v1957_v38 = vld [vmem:[%s2715_s1 + $0x4d4] ss:$28 sps:$4 sm:$0xff]  }
  0x27   :  { %1179 = vmatpush1.bf16.msra.mxu0 %v1881_v42  ;;  %1261 = vmatpush1.bf16.msra.mxu1 %v1882_v43  ;;  %v1958_v42 = vld [vmem:[%s2715_s1 + $0x4d8] ss:$28 sps:$4 sm:$0xff]   ;;  %v1963_v43 = vld [vmem:[%s2715_s1 + $0x50c] ss:$28 sps:$4 sm:$0xff]  }
  0x28   :  { %1180 = vmatprep.subr.bf16.mxu0 %v1883_v44  ;;  %1262 = vmatprep.subr.bf16.mxu1 %v1885_v45  ;;  %v1966_v44 = vld [vmem:[%s2715_s1 + $0x514] ss:$28 sps:$4 sm:$0xff]   ;;  %v1961_v45 = vld [vmem:[%s2715_s1 + $0x508] ss:$28 sps:$4 sm:$0xff]  }
  0x2b   :  { %1181 = vmatpush1.bf16.msra.mxu0 %v1887_v48  ;;  %1263 = vmatpush1.bf16.msra.mxu1 %v1888_v49  ;;  %v1969_v48 = vld [vmem:[%s2715_s1 + $0x544] ss:$28 sps:$4 sm:$0xff]   ;;  %v1972_v49 = vld [vmem:[%s2715_s1 + $0x54c] ss:$28 sps:$4 sm:$0xff]  }
  0x2c   :  { %1182 = vmatprep.subr.bf16.mxu0 %v1889_v50  ;;  %1264 = vmatprep.subr.bf16.mxu1 %v1891_v51  ;;  %v1967_v50 = vld [vmem:[%s2715_s1 + $0x540] ss:$28 sps:$4 sm:$0xff]   ;;  %v1970_v51 = vld [vmem:[%s2715_s1 + $0x548] ss:$28 sps:$4 sm:$0xff]  }
  0x2f   :  { %1183 = vmatpush1.bf16.msra.mxu0 %v1893_v54  ;;  %1265 = vmatpush1.bf16.msra.mxu1 %v1894_v55  ;;  %v1979_v54 = vld [vmem:[%s2715_s1 + $0x1d8] ss:$28 sps:$4 sm:$0xff]   ;;  %v2462_v55 = vcombine.high %v2343_v15, %v2343_v15 }
  0x30   :  { %1184 = vmatprep.subr.bf16.mxu0 %v1895_v57  ;;  %1266 = vmatprep.subr.bf16.mxu1 %v1897_v58  ;;  %v1978_v57 = vld [vmem:[%s2715_s1 + $0x4c] ss:$28 sps:$4 sm:$0xff]   ;;  %v1980_v58 = vld [vmem:[%s2715_s1 + $0x18] ss:$28 sps:$4 sm:$0xff]  }
  0x33   :  { %1185 = vmatpush1.bf16.msra.mxu0 %v1899_v60  ;;  %1267 = vmatpush1.bf16.msra.mxu1 %v1900_v61  ;;  %v1984_v60 = vld [vmem:[%s2715_s1 + $0x210] ss:$28 sps:$4 sm:$0xff]   ;;  %v1976_v61 = vld [vmem:[%s2715_s1 + $0x48] ss:$28 sps:$4 sm:$0xff]  }
  0x34   :  { %1186 = vmatprep.subr.bf16.mxu0 %v1901_v63  ;;  %1268 = vmatprep.subr.bf16.mxu1 %v1903_v0  ;;  %v1983_v63 = vld [vmem:[%s2715_s1 + $0x84] ss:$28 sps:$4 sm:$0xff]  }
  0x35   :  { %v1989_v0 = vld [vmem:[%s2715_s1 + $0x248] ss:$28 sps:$4 sm:$0xff]  }
  0x37   :  { %1187 = vmatpush1.bf16.msra.mxu0 %v1905_v1  ;;  %1269 = vmatpush1.bf16.msra.mxu1 %v1906_v2  ;;  %v1981_v1 = vld [vmem:[%s2715_s1 + $0x80] ss:$28 sps:$4 sm:$0xff]  }
  0x38   :  { %1188 = vmatprep.subr.bf16.mxu0 %v1907_v3  ;;  %1270 = vmatprep.subr.bf16.mxu1 %v1909_v4  ;;  %v1988_v2 = vld [vmem:[%s2715_s1 + $0xbc] ss:$28 sps:$4 sm:$0xff]   ;;  %v1990_v3 = vld [vmem:[%s2715_s1 + $0x88] ss:$28 sps:$4 sm:$0xff]  }
  0x39   :  { %v1986_v4 = vld [vmem:[%s2715_s1 + $0xb8] ss:$28 sps:$4 sm:$0xff]  }
  0x3b   :  { %1189 = vmatpush1.bf16.msra.mxu0 %v1911_v5  ;;  %1271 = vmatpush1.bf16.msra.mxu1 %v1912_v6  ;;  %v1993_v5 = vld [vmem:[%s2715_s1 + $0xf4] ss:$28 sps:$4 sm:$0xff]   ;;  %v1995_v6 = vld [vmem:[%s2715_s1 + $0xc0] ss:$28 sps:$4 sm:$0xff]  }
  0x3c   :  { %1190 = vmatprep.subr.bf16.mxu0 %v1913_v7  ;;  %1272 = vmatprep.subr.bf16.mxu1 %v1915_v8  ;;  %v1999_v7 = vld [vmem:[%s2715_s1 + $0x2b8] ss:$28 sps:$4 sm:$0xff]   ;;  %v1991_v8 = vld [vmem:[%s2715_s1 + $0xf0] ss:$28 sps:$4 sm:$0xff]  }
  0x3f   :  { %1191 = vmatpush1.bf16.msra.mxu0 %v1917_v9  ;;  %1273 = vmatpush1.bf16.msra.mxu1 %v1918_v10  ;;  %v1998_v9 = vld [vmem:[%s2715_s1 + $0x12c] ss:$28 sps:$4 sm:$0xff]   ;;  %v2000_v10 = vld [vmem:[%s2715_s1 + $0xf8] ss:$28 sps:$4 sm:$0xff]  }
  0x40   :  { %1201 = vmatprep.subr.bf16.mxu0 %v1921_v11  ;;  %1283 = vmatprep.subr.bf16.mxu1 %v1924_v12  ;;  %v2004_v11 = vld [vmem:[%s2715_s1 + $0x2f0] ss:$28 sps:$4 sm:$0xff]   ;;  %v1996_v12 = vld [vmem:[%s2715_s1 + $0x128] ss:$28 sps:$4 sm:$0xff]  }
  0x42   :  { %1193 = vmatmul.mubr.bf16.vlgmr.msra.gmra.mrb[0].mxu0 %v2343_v15  ;;  %1275 = vmatmul.mubr.bf16.vlgmr.msra.gmra.mrb[0].mxu1 %v2343_v15 }
  0x43   :  { %1202 = vmatpush1.bf16.msra.mxu0 %v1919_v13  ;;  %1284 = vmatpush1.bf16.msra.mxu1 %v1922_v16  ;;  %v2005_v13 = vld [vmem:[%s2715_s1 + $0x130] ss:$28 sps:$4 sm:$0xff]   ;;  %v218_v16 = vld [vmem:[#allocation2] sm:$0x1] }
  0x44   :  { %1203 = vmatprep.subr.bf16.mxu0 %v1927_v17  ;;  %1285 = vmatprep.subr.bf16.mxu1 %v1930_v18  ;;  %v2003_v17 = vld [vmem:[%s2715_s1 + $0x164] ss:$28 sps:$4 sm:$0xff]  }
  0x45   :  { %1769 = vmatprep.mubr.msk.bf16.mxu0 %vm1156_vm0, %v2356_v19  ;;  %1770 = vmatprep.mubr.msk.bf16.mxu1 %vm1156_vm0, %v2356_v19  ;;  %v2009_v18 = vld [vmem:[%s2715_s1 + $0x328] ss:$28 sps:$4 sm:$0xff]  }
  0x46   :  { %221 = vperm.xlu0 %1822, %v218_v16  }
  0x47   :  { %1204 = vmatpush1.bf16.msra.mxu0 %v1925_v20  ;;  %1286 = vmatpush1.bf16.msra.mxu1 %v1928_v21  ;;  %v2001_v20 = vld [vmem:[%s2715_s1 + $0x160] ss:$28 sps:$4 sm:$0xff]   ;;  %v2010_v21 = vld [vmem:[%s2715_s1 + $0x168] ss:$28 sps:$4 sm:$0xff]  }
  0x48   :  { %1205 = vmatprep.subr.bf16.mxu0 %v1933_v22  ;;  %1287 = vmatprep.subr.bf16.mxu1 %v1936_v23  ;;  %v2008_v22 = vld [vmem:[%s2715_s1 + $0x19c] ss:$28 sps:$4 sm:$0xff]  }
  0x49   :  { %v2014_v23 = vld [vmem:[%s2715_s1 + $0x360] ss:$28 sps:$4 sm:$0xff]  }
  0x4b   :  { %1206 = vmatpush1.bf16.msra.mxu0 %v1931_v24  ;;  %1288 = vmatpush1.bf16.msra.mxu1 %v1934_v25  ;;  %v2006_v24 = vld [vmem:[%s2715_s1 + $0x198] ss:$28 sps:$4 sm:$0xff]   ;;  %v2015_v25 = vld [vmem:[%s2715_s1 + $0x1a0] ss:$28 sps:$4 sm:$0xff]  }
  0x4c   :  { %1207 = vmatprep.subr.bf16.mxu0 %v1939_v26  ;;  %1289 = vmatprep.subr.bf16.mxu1 %v1942_v27  ;;  %v2013_v26 = vld [vmem:[%s2715_s1 + $0x1d4] ss:$28 sps:$4 sm:$0xff]  }
  0x4d   :  { %v2011_v27 = vld [vmem:[%s2715_s1 + $0x1d0] ss:$28 sps:$4 sm:$0xff]  }
  0x4f   :  { %1208 = vmatpush1.bf16.msra.mxu0 %v1937_v28  ;;  %1290 = vmatpush1.bf16.msra.mxu1 %v1940_v29  ;;  %v2019_v28 = vld [vmem:[%s2715_s1 + $0x398] ss:$28 sps:$4 sm:$0xff]   ;;  %v2018_v29 = vld [vmem:[%s2715_s1 + $0x20c] ss:$28 sps:$4 sm:$0xff]  }
  0x50   :  { %1209 = vmatprep.subr.bf16.mxu0 %v1945_v30  ;;  %1291 = vmatprep.subr.bf16.mxu1 %v1948_v31  ;;  %v2016_v30 = vld [vmem:[%s2715_s1 + $0x208] ss:$28 sps:$4 sm:$0xff]   ;;  %v2023_v31 = vld [vmem:[%s2715_s1 + $0x3d0] ss:$28 sps:$4 sm:$0xff]  }
  0x53   :  { %1210 = vmatpush1.bf16.msra.mxu0 %v1943_v32  ;;  %1292 = vmatpush1.bf16.msra.mxu1 %v1946_v33  ;;  %v2022_v32 = vld [vmem:[%s2715_s1 + $0x244] ss:$28 sps:$4 sm:$0xff]  }
  0x54   :  { %1211 = vmatprep.subr.bf16.mxu0 %v1951_v34  ;;  %1293 = vmatprep.subr.bf16.mxu1 %v1954_v35  ;;  %v2020_v33 = vld [vmem:[%s2715_s1 + $0x240] ss:$28 sps:$4 sm:$0xff]   ;;  %v2027_v34 = vld [vmem:[%s2715_s1 + $0x408] ss:$28 sps:$4 sm:$0xff]  }
  0x55   :  { %v2026_v35 = vld [vmem:[%s2715_s1 + $0x27c] ss:$28 sps:$4 sm:$0xff]  }
  0x57   :  { %1212 = vmatpush1.bf16.msra.mxu0 %v1949_v36  ;;  %1294 = vmatpush1.bf16.msra.mxu1 %v1952_v37  ;;  %v2024_v36 = vld [vmem:[%s2715_s1 + $0x278] ss:$28 sps:$4 sm:$0xff]   ;;  %v2031_v37 = vld [vmem:[%s2715_s1 + $0x440] ss:$28 sps:$4 sm:$0xff]  }
  0x58   :  { %1213 = vmatprep.subr.bf16.mxu0 %v1957_v38  ;;  %1295 = vmatprep.subr.bf16.mxu1 %v1960_v40  ;;  %v2030_v38 = vld [vmem:[%s2715_s1 + $0x2b4] ss:$28 sps:$4 sm:$0xff]  }
  0x59   :  { %v2028_v40 = vld [vmem:[%s2715_s1 + $0x2b0] ss:$28 sps:$4 sm:$0xff]  }
  0x5b   :  { %1214 = vmatpush1.bf16.msra.mxu0 %v1955_v41  ;;  %1296 = vmatpush1.bf16.msra.mxu1 %v1958_v42  ;;  %v2035_v41 = vld [vmem:[%s2715_s1 + $0x478] ss:$28 sps:$4 sm:$0xff]   ;;  %v2034_v42 = vld [vmem:[%s2715_s1 + $0x2ec] ss:$28 sps:$4 sm:$0xff]  }
  0x5c   :  { %1215 = vmatprep.subr.bf16.mxu0 %v1963_v43  ;;  %1297 = vmatprep.subr.bf16.mxu1 %v1966_v44  ;;  %v2032_v43 = vld [vmem:[%s2715_s1 + $0x2e8] ss:$28 sps:$4 sm:$0xff]   ;;  %v2039_v44 = vld [vmem:[%s2715_s1 + $0x4b0] ss:$28 sps:$4 sm:$0xff]  }
  0x5f   :  { %1216 = vmatpush1.bf16.msra.mxu0 %v1961_v45  ;;  %1298 = vmatpush1.bf16.msra.mxu1 %v1964_v47  ;;  %v2038_v45 = vld [vmem:[%s2715_s1 + $0x324] ss:$28 sps:$4 sm:$0xff]  }
  0x60   :  { %1217 = vmatprep.subr.bf16.mxu0 %v1969_v48  ;;  %1299 = vmatprep.subr.bf16.mxu1 %v1972_v49  ;;  %v2036_v47 = vld [vmem:[%s2715_s1 + $0x320] ss:$28 sps:$4 sm:$0xff]   ;;  %v2043_v48 = vld [vmem:[%s2715_s1 + $0x4e8] ss:$28 sps:$4 sm:$0xff]  }
  0x61   :  { %v2042_v49 = vld [vmem:[%s2715_s1 + $0x35c] ss:$28 sps:$4 sm:$0xff]  }
  0x63   :  { %1218 = vmatpush1.bf16.msra.mxu0 %v1967_v50  ;;  %1300 = vmatpush1.bf16.msra.mxu1 %v1970_v51  ;;  %v2040_v50 = vld [vmem:[%s2715_s1 + $0x358] ss:$28 sps:$4 sm:$0xff]   ;;  %v2047_v51 = vld [vmem:[%s2715_s1 + $0x520] ss:$28 sps:$4 sm:$0xff]  }
  0x64   :  { %1324 = vmatprep.subr.bf16.mxu0 %v1975_v53  ;;  %1780 = vmatprep.subr.bf16.mxu1 %v1979_v54  ;;  %v2046_v53 = vld [vmem:[%s2715_s1 + $0x394] ss:$28 sps:$4 sm:$0xff]  }
  0x65   :  { %v2044_v54 = vld [vmem:[%s2715_s1 + $0x390] ss:$28 sps:$4 sm:$0xff]  }
  0x66   :  { %1234 = vmatmul.mubr.bf16.vlgmr.msra.gmra.mrb[0].mxu0 %v2462_v55  ;;  %1316 = vmatmul.mubr.bf16.vlgmr.msra.gmra.mrb[0].mxu1 %v2462_v55 }
  0x67   :  { %1325 = vmatpush1.bf16.msra.mxu0 %v1973_v56  ;;  %1781 = vmatpush3.bf16.msra.mxu1 %v1980_v58  ;;  %v2051_v56 = vld [vmem:[%s2715_s1 + $0x558] ss:$28 sps:$4 sm:$0xff]   ;;  %v2048_v58 = vld [vmem:[%s2715_s1 + $0x3c8] ss:$28 sps:$4 sm:$0xff]  }
  0x68   :  { %1326 = vmatprep.subr.bf16.mxu0 %v1978_v57  ;;  %1782 = vmatprep.subr.bf16.mxu1 %v1984_v60  ;;  %v2050_v57 = vld [vmem:[%s2715_s1 + $0x3cc] ss:$28 sps:$4 sm:$0xff]   ;;  %v2054_v60 = vld [vmem:[%s2715_s1 + $0x404] ss:$28 sps:$4 sm:$0xff]  }
  0x69   :  { %1438 = vmatprep.mubr.bf16.mxu1 %v2284_v59  ;;  %1356 = vmatprep.mubr.bf16.mxu0 %v2284_v59  ;;  %v1994_v59 = vld [vmem:[%s2715_s1 + $0x280] ss:$28 sps:$4 sm:$0xff]  }
  0x6b   :  { %1327 = vmatpush1.bf16.msra.mxu0 %v1976_v61  ;;  %1783 = vmatpush3.bf16.msra.mxu1 %v1985_v62  ;;  %v2055_v61 = vld [vmem:[%s2715_s1 + $0x438] ss:$28 sps:$4 sm:$0xff]   ;;  %v2058_v62 = vld [vmem:[%s2715_s1 + $0x470] ss:$28 sps:$4 sm:$0xff]  }
  0x6c   :  { %1328 = vmatprep.subr.bf16.mxu0 %v1983_v63  ;;  %1784 = vmatprep.subr.bf16.mxu1 %v1989_v0  ;;  %v2063_v63 = vld [vmem:[%s2715_s1 + $0x4ac] ss:$28 sps:$4 sm:$0xff]  }
  0x6d   :  { %v2061_v0 = vld [vmem:[%s2715_s1 + $0x4a8] ss:$28 sps:$4 sm:$0xff]  }
  0x6f   :  { %1329 = vmatpush1.bf16.msra.mxu0 %v1981_v1  ;;  %1785 = vmatpush3.bf16.msra.mxu1 %v1990_v3  ;;  %v2066_v1 = vld [vmem:[%s2715_s1 + $0x4e4] ss:$28 sps:$4 sm:$0xff]   ;;  %v2069_v3 = vld [vmem:[%s2715_s1 + $0x51c] ss:$28 sps:$4 sm:$0xff]  }
  0x70   :  { %1330 = vmatprep.subr.bf16.mxu0 %v1988_v2  ;;  %1786 = vmatprep.subr.bf16.mxu1 %v1994_v59  ;;  %v2064_v2 = vld [vmem:[%s2715_s1 + $0x4e0] ss:$28 sps:$4 sm:$0xff]   ;;  %v2067_v59 = vld [vmem:[%s2715_s1 + $0x518] ss:$28 sps:$4 sm:$0xff]  }
  0x73   :  { %1331 = vmatpush1.bf16.msra.mxu0 %v1986_v4  ;;  %1787 = vmatpush3.bf16.msra.mxu1 %v1995_v6  ;;  %v2072_v4 = vld [vmem:[%s2715_s1 + $0x554] ss:$28 sps:$4 sm:$0xff]   ;;  %v226_v6 = vsub.s32 0, %v2251_v46 }
  0x74   :  { %1332 = vmatprep.subr.bf16.mxu0 %v1993_v5  ;;  %1788 = vmatprep.subr.bf16.mxu1 %v1999_v7  ;;  %v2070_v5 = vld [vmem:[%s2715_s1 + $0x550] ss:$28 sps:$4 sm:$0xff]  }
  0x77   :  { %1333 = vmatpush1.bf16.msra.mxu0 %v1991_v8  ;;  %1789 = vmatpush3.bf16.msra.mxu1 %v2000_v10 }
  0x78   :  { %1334 = vmatprep.subr.bf16.mxu0 %v1998_v9  ;;  %1790 = vmatprep.subr.bf16.mxu1 %v2004_v11 }
  0x7b   :  { %1335 = vmatpush1.bf16.msra.mxu0 %v1996_v12  ;;  %1791 = vmatpush3.bf16.msra.mxu1 %v2005_v13 }
  0x7c   :  { %1336 = vmatprep.subr.bf16.mxu0 %v2003_v17  ;;  %1792 = vmatprep.subr.bf16.mxu1 %v2009_v18 }
  0x7f   :  { %1337 = vmatpush1.bf16.msra.mxu0 %v2001_v20  ;;  %1793 = vmatpush3.bf16.msra.mxu1 %v2010_v21 }
  0x80   :  { %1338 = vmatprep.subr.bf16.mxu0 %v2008_v22  ;;  %1794 = vmatprep.subr.bf16.mxu1 %v2014_v23 }
  0x83   :  { %1339 = vmatpush1.bf16.msra.mxu0 %v2006_v24  ;;  %1795 = vmatpush3.bf16.msra.mxu1 %v2015_v25 }
  0x84   :  { %1340 = vmatprep.subr.bf16.mxu0 %v2013_v26  ;;  %1446 = vmatprep.subr.bf16.mxu1 %v2101_v14 }
  0x86   :  { %1439 = vmatmul.mubr.bf16.vlgmr.msra.gmra.mrb[4].mxu1 %v2343_v15 }
  0x87   :  { %1341 = vmatpush1.bf16.msra.mxu0 %v2011_v27  ;;  %1447 = vmatpush1.bf16.msra.mxu1 %v2019_v28 }
  0x88   :  { %1342 = vmatprep.subr.bf16.mxu0 %v2018_v29  ;;  %1448 = vmatprep.subr.bf16.mxu1 %v2101_v14 }
  0x89   :  { %1772 = vmatprep.mubr.msk.bf16.mxu1 %vm1156_vm0, %v2356_v19 }
  0x8b   :  { %1343 = vmatpush1.bf16.msra.mxu0 %v2016_v30  ;;  %1449 = vmatpush1.bf16.msra.mxu1 %v2023_v31 }
  0x8c   :  { %1344 = vmatprep.subr.bf16.mxu0 %v2022_v32  ;;  %1450 = vmatprep.subr.bf16.mxu1 %v2101_v14 }
  0x8f   :  { %1345 = vmatpush1.bf16.msra.mxu0 %v2020_v33  ;;  %1451 = vmatpush1.bf16.msra.mxu1 %v2027_v34 }
  0x90   :  { %1346 = vmatprep.subr.bf16.mxu0 %v2026_v35  ;;  %1452 = vmatprep.subr.bf16.mxu1 %v2101_v14 }
  0x93   :  { %1347 = vmatpush1.bf16.msra.mxu0 %v2024_v36  ;;  %1453 = vmatpush1.bf16.msra.mxu1 %v2031_v37 }
  0x94   :  { %1348 = vmatprep.subr.bf16.mxu0 %v2030_v38  ;;  %1454 = vmatprep.subr.bf16.mxu1 %v2101_v14 }
  0x97   :  { %1349 = vmatpush1.bf16.msra.mxu0 %v2028_v40  ;;  %1455 = vmatpush1.bf16.msra.mxu1 %v2035_v41 }
  0x98   :  { %1350 = vmatprep.subr.bf16.mxu0 %v2034_v42  ;;  %1456 = vmatprep.subr.bf16.mxu1 %v2101_v14 }
  0x9b   :  { %1351 = vmatpush1.bf16.msra.mxu0 %v2032_v43  ;;  %1457 = vmatpush1.bf16.msra.mxu1 %v2039_v44 }
  0x9c   :  { %1352 = vmatprep.subr.bf16.mxu0 %v2038_v45  ;;  %1458 = vmatprep.subr.bf16.mxu1 %v2101_v14 }
  0x9f   :  { %1353 = vmatpush1.bf16.msra.mxu0 %v2036_v47  ;;  %1459 = vmatpush1.bf16.msra.mxu1 %v2043_v48 }
  0xa0   :  { %1354 = vmatprep.subr.bf16.mxu0 %v2042_v49  ;;  %1460 = vmatprep.subr.bf16.mxu1 %v2101_v14 }
  0xa3   :  { %1355 = vmatpush1.bf16.msra.mxu0 %v2040_v50  ;;  %1461 = vmatpush1.bf16.msra.mxu1 %v2047_v51 }
  0xa4   :  { %1365 = vmatprep.subr.bf16.mxu0 %v2046_v53  ;;  %1462 = vmatprep.subr.bf16.mxu1 %v2101_v14  ;;  %v2052_v14 = vld [vmem:[%s2715_s1 + $0x400] ss:$28 sps:$4 sm:$0xff]  }
  0xa6   :  { %1357 = vmatmul.mubr.bf16.vlgmr.msra.gmra.mrb[4].mxu0 %v2343_v15  ;;  %v2057_v15 = vld [vmem:[%s2715_s1 + $0x43c] ss:$28 sps:$4 sm:$0xff]  }
  0xa7   :  { %1366 = vmatpush1.bf16.msra.mxu0 %v2044_v54  ;;  %1463 = vmatpush1.bf16.msra.mxu1 %v2051_v56 }
  0xa8   :  { %1367 = vmatprep.subr.bf16.mxu0 %v2050_v57  ;;  %1771 = vmatprep.mubr.msk.bf16.mxu0 %vm1156_vm0, %v2356_v19  ;;  %v2060_v19 = vld [vmem:[%s2715_s1 + $0x474] ss:$28 sps:$4 sm:$0xff]  }
  0xaa   :  { %1479 = vmatmul.mubr.bf16.vlgmr.msra.gmra.mrb[8].mxu1 %v2462_v55 }
  0xab   :  { %1368 = vmatpush1.bf16.msra.mxu0 %v2048_v58 }
  0xac   :  { %1369 = vmatprep.subr.bf16.mxu0 %v2054_v60 }
  0xaf   :  { %1370 = vmatpush1.bf16.msra.mxu0 %v2052_v14 }
  0xb0   :  { %1371 = vmatprep.subr.bf16.mxu0 %v2057_v15 }
  0xb3   :  { %1372 = vmatpush1.bf16.msra.mxu0 %v2055_v61 }
  0xb4   :  { %1373 = vmatprep.subr.bf16.mxu0 %v2060_v19 }
  0xb7   :  { %1374 = vmatpush1.bf16.msra.mxu0 %v2058_v62 }
  0xb8   :  { %1375 = vmatprep.subr.bf16.mxu0 %v2063_v63 }
  0xbb   :  { %1376 = vmatpush1.bf16.msra.mxu0 %v2061_v0 }
  0xbc   :  { %1377 = vmatprep.subr.bf16.mxu0 %v2066_v1 }
  0xbf   :  { %1378 = vmatpush1.bf16.msra.mxu0 %v2064_v2 }
  0xc0   :  { %1379 = vmatprep.subr.bf16.mxu0 %v2069_v3 }
  0xc3   :  { %1380 = vmatpush1.bf16.msra.mxu0 %v2067_v59 }
  0xc4   :  { %1381 = vmatprep.subr.bf16.mxu0 %v2072_v4 }
  0xc5   :  { %v222_v7 = vpop.permute.xlu0 %221 }
  0xc6   :  { %v227_v8 = vrot.slane %v222_v7, %v226_v6 }
  0xc7   :  { %1382 = vmatpush1.bf16.msra.mxu0 %v2070_v5 }
  0xca   :  { %1398 = vmatmul.mubr.bf16.vlgmr.msra.gmra.mrb[4].mxu0 %v2462_v55 }
 0x139   :  { %v1235_v9 = vpop.f32.mrb[0].mxu0  ;;  %v1317_v10 = vpop.f32.mrb[0].mxu1 }
 0x13a   :  { %v1802_v11 = vadd.f32 %v1235_v9, %v227_v8  ;;  %v1804_v12 = vadd.f32 %v1317_v10, %v227_v8  ;;  %v1237_v13 = vpop.f32.mrb[1].mxu0  ;;  %v1319_v16 = vpop.f32.mrb[1].mxu1 }
 0x13b   :  { %v1803_v17 = vadd.f32 %v1237_v13, %v227_v8  ;;  %v1805_v18 = vadd.f32 %v1319_v16, %v227_v8  ;;  %v1239_v20 = vpop.f32.mrb[2].mxu0  ;;  %v1321_v21 = vpop.f32.mrb[2].mxu1 }
 0x13c   :  { %v1773_v22 = vmul.f32 -1.442695, %v1802_v11  ;;  %v1775_v23 = vmul.f32 -1.442695, %v1804_v12  ;;  %v1240_v24 = vpop.f32.mrb[3].mxu0  ;;  %v1322_v25 = vpop.f32.mrb[3].mxu1 }
 0x13d   :  { %v1774_v26 = vmul.f32 -1.442695, %v1803_v17  ;;  %v1776_v55 = vmul.f32 -1.442695, %v1805_v18 }
 0x13e   :  { %2073 = vpow2.f32 %v1773_v22 }
 0x13f   :  { %2075 = vpow2.f32 %v1775_v23 }
 0x140   :  { %2077 = vpow2.f32 %v1774_v26 }
 0x141   :  { %2079 = vpow2.f32 %v1776_v55 }
 0x148   :  { %v2074_v46 = vpop.eup %2073 }
 0x149   :  { %v2076_v27 = vpop.eup %2075  ;;  %v1507_v28 = vadd.f32 1.0, %v2074_v46 }
 0x14a   :  { %v2078_v29 = vpop.eup %2077  ;;  %v1509_v30 = vadd.f32 1.0, %v2076_v27 }
 0x14b   :  { %v2080_v31 = vpop.eup %2079  ;;  %2081 = vrcp.f32 %v1507_v28  ;;  %v1508_v32 = vadd.f32 1.0, %v2078_v29 }
 0x14c   :  { %2083 = vrcp.f32 %v1509_v30  ;;  %v1510_v33 = vadd.f32 1.0, %v2080_v31 }
 0x14d   :  { %2085 = vrcp.f32 %v1508_v32 }
 0x14e   :  { %2087 = vrcp.f32 %v1510_v33 }
 0x155   :  { %v2082_v34 = vpop.eup %2081 }
 0x156   :  { %v2084_v35 = vpop.eup %2083 }
 0x157   :  { %v2086_v36 = vpop.eup %2085 }
 0x158   :  { %v2088_v37 = vpop.eup %2087  ;;  %v1535_v38 = vcombine.low %v2082_v34, %v2086_v36 }
 0x159   :  { %v1536_v40 = vcombine.low %v2084_v35, %v2088_v37  ;;  %v1796_v41 = vpop.f32.mrb[4].mxu1 }
 0x15a   :  { %v1544_v42 = vrot.slane %v1535_v38, %v2266_v52  ;;  %v1797_v43 = vpop.f32.mrb[5].mxu1 }
 0x15b   :  { %v1551_v44 = vrot.slane %v1536_v40, %v2266_v52  ;;  %v1798_v45 = vadd.f32 %v1797_v43, %v1796_v41  ;;  %v1799_v47 = vpop.f32.mrb[6].mxu1 }
 0x15c   :  { %v1800_v48 = vpop.f32.mrb[7].mxu1 }
 0x15d   :  { %v1566_v49 = vcombine.low %v1544_v42, %v1551_v44  ;;  %v1441_v50 = vadd.f32 %v1798_v45, %v227_v8 }
 0x15f   :  { %v1574_v13 = vrot.slane %v1566_v49, %v2266_v52 }
 0x17d   :  { %v1480_v51 = vpop.f32.mrb[8].mxu1 }
 0x17e   :  { %v1481_v53 = vadd.f32 %v1480_v51, %v1441_v50  ;;  %v1482_v54 = vpop.f32.mrb[9].mxu1 }
 0x17f   :  { %v1483_v56 = vpop.f32.mrb[10].mxu1 }
 0x180   :  { %v1484_v57 = vpop.f32.mrb[11].mxu1  ;;  %v1779_v58 = vmul.f32 -1.442695, %v1481_v53 }
 0x182   :  { %2089 = vpow2.f32 %v1779_v58 }
 0x18c   :  { %v2090_v1 = vpop.eup %2089 }
 0x18d   :  { %v1513_v2 = vadd.f32 1.0, %v2090_v1 }
 0x19d   :  { %v1399_v60 = vpop.f32.mrb[4].mxu0 }
 0x19e   :  { %v1806_v14 = vadd.f32 %v1399_v60, %v227_v8  ;;  %v1401_v15 = vpop.f32.mrb[5].mxu0 }
 0x19f   :  { %v1807_v61 = vadd.f32 %v1401_v15, %v227_v8  ;;  %v1403_v19 = vpop.f32.mrb[6].mxu0 }
 0x1a0   :  { %v1777_v62 = vmul.f32 -1.442695, %v1806_v14  ;;  %v1404_v63 = vpop.f32.mrb[7].mxu0 }
 0x1a1   :  { %v1778_v0 = vmul.f32 -1.442695, %v1807_v61 }
 0x1a2   :  { %2091 = vpow2.f32 %v1777_v62 }
 0x1a3   :  { %2093 = vpow2.f32 %v1778_v0 }
 0x1a4   :  { %2095 = vrcp.f32 %v1513_v2 }
 0x1ac   :  { %v2092_v3 = vpop.eup %2091 }
 0x1ad   :  { %v2094_v59 = vpop.eup %2093  ;;  %v1511_v4 = vadd.f32 1.0, %v2092_v3 }
 0x1ae   :  { %v1512_v5 = vadd.f32 1.0, %v2094_v59  ;;  %v2096_v6 = vpop.eup %2095 }
 0x1af   :  { %2097 = vrcp.f32 %v1511_v4  ;;  %v1565_v8 = vrot.slane %v2096_v6, %v2266_v52 }
 0x1b0   :  { %2099 = vrcp.f32 %v1512_v5 }
 0x1b9   :  { %v2098_v7 = vpop.eup %2097 }
 0x1ba   :  { %v2100_v9 = vpop.eup %2099 }
 0x1bb   :  { %v1537_v10 = vcombine.low %v2098_v7, %v2100_v9 }
 0x1bd   :  { %v1558_v11 = vrot.slane %v1537_v10, %v2266_v52 }
 0x1bf   :  { %v1567_v12 = vcombine.low %v1558_v11, %v1565_v8 }
 0x1c1   :  { %v1581_v16 = vrot.slane %v1567_v12, %v2266_v52 }
 0x1c3   :  { %v1582_v17 = vcombine.low %v1574_v13, %v1581_v16 }
 0x1c5   :  { %1588 = vst.msk [vmem:[%s2718_s3] sm:$0x7f] %vm1586_vm1, %v1582_v17 }

</bundles_post_ra>
